<compile_context>
chip_gen: v5e
topology: v5e:2x2
jax: 0.10.0
libtpu: 0.0.40
codegen_flags: <defaults>
</compile_context>

<pallas_src>
import functools

import jax
import jax.numpy as jnp
from jax.experimental import pallas as pl
from jax.experimental.pallas import tpu as pltpu

LANES = 128   # Cout padding -> lane-dense stores

IMAGENET_MEAN = jnp.array([0.485, 0.456, 0.406], jnp.float32)
IMAGENET_STD = jnp.array([0.229, 0.224, 0.225], jnp.float32)


# ----------------------------------------------------------------------------
# VMEM budget (generation aware)
# ----------------------------------------------------------------------------
@functools.lru_cache(maxsize=None)
def _vmem_limit_bytes():
    cap = 64 << 20                       # conservative default (v7x physical)
    try:
        info = pltpu.get_tpu_info()
        cap = int(getattr(info, "vmem_capacity_bytes", cap)) or cap
    except Exception:
        pass
    # ~3/4 of physical, clamped: 96 MiB on v5e/v6e (128 MiB), 48 MiB on v7x.
    return int(max(32 << 20, min((cap * 3) // 4, 96 << 20)))


# ----------------------------------------------------------------------------
# Pallas kernels
# ----------------------------------------------------------------------------
def _mm_kernel(a_ref, b_ref, bias_ref, o_ref, *, relu):
    acc = jnp.dot(a_ref[...], b_ref[...], preferred_element_type=jnp.float32)
    acc = acc + bias_ref[...]
    if relu:
        acc = jnp.maximum(acc, 0.0)
    o_ref[...] = acc.astype(o_ref.dtype)


def _mm_res_relu_kernel(a_ref, b_ref, bias_ref, res_ref, o_ref):
    acc = jnp.dot(a_ref[...], b_ref[...], preferred_element_type=jnp.float32)
    acc = acc + bias_ref[...] + res_ref[...].astype(jnp.float32)
    o_ref[...] = jnp.maximum(acc, 0.0).astype(o_ref.dtype)


def _mm_partial_relu_kernel(a_ref, b_ref, bias_ref, o_ref, *, n_relu):
    # ReLU only on the first n_relu lanes (conv1 path); the remaining lanes are
    # the fused linear downsample (identity branch) and must stay un-activated.
    acc = jnp.dot(a_ref[...], b_ref[...], preferred_element_type=jnp.float32)
    acc = acc + bias_ref[...]
    col = jax.lax.broadcasted_iota(jnp.int32, acc.shape, 1)
    o_ref[...] = jnp.where(col < n_relu, jnp.maximum(acc, 0.0), acc).astype(o_ref.dtype)


def _max_window_kernel(*refs):
    # refs = (win_0, ..., win_{k*k-1}, out); elementwise max tree-reduce.
    out_ref = refs[-1]
    m = refs[0][...]
    for r in refs[1:-1]:
        m = jnp.maximum(m, r[...])
    out_ref[...] = m


def _gap_fc_kernel(x_ref, w_ref, b_ref, o_ref, acc_ref, *, inv_hw):
    # Partial spatial sums accumulated in f32 scratch; FC applied on last step.
    @pl.when(pl.program_id(0) == 0)
    def _():
        acc_ref[...] = jnp.zeros_like(acc_ref)

    acc_ref[...] += jnp.sum(x_ref[...].astype(jnp.float32), axis=1)

    @pl.when(pl.program_id(0) == pl.num_programs(0) - 1)
    def _():
        pooled = (acc_ref[...] * inv_hw).astype(w_ref.dtype)
        o_ref[...] = (
            jnp.dot(pooled, w_ref[...], preferred_element_type=jnp.float32)
            + b_ref[...]
        )


# ----------------------------------------------------------------------------
# Pallas wrappers
# ----------------------------------------------------------------------------
def _pick_tm(m):
    """Split M into >=2 blocks (dual-core / pipelining) with bf16-friendly
    (multiple-of-16) tiles whenever possible."""
    if m < 32:
        return m
    for t in (512, 256, 128, 64, 32, 16):
        if m % t == 0 and m // t >= 2:
            return t
    return m


def _pick_hw_tile(hw):
    if hw <= 256:
        return hw
    for t in (256, 128, 64, 32, 16, 8):
        if hw % t == 0:
            return t
    return hw


def fused_matmul(a_bf16, w_bf16, bias_f32, *, residual=None, relu=False,
                 partial_relu_lanes=None, out_dtype=jnp.bfloat16):
    """out = epilogue(a @ w + bias); bf16 operands, f32 accumulation, bf16 out.

    epilogue: relu, or residual-add+relu, or lane-masked relu (fused downsample).
    """
    M, K = a_bf16.shape
    Kw, Nout = w_bf16.shape
    assert K == Kw
    # Residual-add without ReLU is not a BasicBlock pattern; forbid it so the
    # relu flag is never silently ignored.
    assert residual is None or relu, "residual add requires relu=True"

    tm = _pick_tm(M)
    grid = (M // tm,)
    bias = bias_f32.reshape(1, Nout).astype(jnp.float32)

    in_specs = [
        pl.BlockSpec((tm, K), lambda i: (i, 0)),
        # TODO(synk): pipeline_mode=pl.Buffered(1) on weight/bias (constant
        # index_map) would free VMEM for larger tm at real widths.
        pl.BlockSpec((K, Nout), lambda i: (0, 0)),
        pl.BlockSpec((1, Nout), lambda i: (0, 0)),
    ]
    args = [a_bf16, w_bf16, bias]

    if residual is not None:
        kernel = _mm_res_relu_kernel
        in_specs.append(pl.BlockSpec((tm, Nout), lambda i: (i, 0)))
        args.append(residual.astype(jnp.bfloat16))
    elif partial_relu_lanes is not None:
        kernel = functools.partial(_mm_partial_relu_kernel,
                                   n_relu=partial_relu_lanes)
    else:
        kernel = functools.partial(_mm_kernel, relu=relu)

    return pl.pallas_call(
        kernel,
        out_shape=jax.ShapeDtypeStruct((M, Nout), out_dtype),
        grid=grid,
        in_specs=in_specs,
        out_specs=pl.BlockSpec((tm, Nout), lambda i: (i, 0)),
        compiler_params=pltpu.CompilerParams(
            dimension_semantics=("parallel",),
            vmem_limit_bytes=_vmem_limit_bytes(),
        ),
    )(*args)


def conv2d_fused(x_nhwc, wt, bias, kh, kw, stride, padding, cin_real, *,
                 relu=False, residual=None, partial_relu_lanes=None,
                 out_dtype=jnp.bfloat16):
    """Conv2d via im2col (XLA glue, real-Cin only, bf16) + ONE fused Pallas
    matmul kernel (bias + [residual] + [relu] in the epilogue)."""
    N, H, W, _ = x_nhwc.shape
    K, Cout = wt.shape
    assert K == kh * kw * cin_real
    Ho = (H + 2 * padding - kh) // stride + 1
    Wo = (W + 2 * padding - kw) // stride + 1

    xr = x_nhwc[..., :cin_real].astype(jnp.bfloat16)   # trim padded channels
    if padding:
        xr = jnp.pad(xr, ((0, 0), (padding, padding), (padding, padding), (0, 0)))

    if kh == 1 and kw == 1:
        a = xr[:, :stride * Ho:stride, :stride * Wo:stride, :]
        a = a.reshape(N * Ho * Wo, cin_real)
    else:
        # TODO(synk): replace this XLA patch gather with an in-kernel
        # shifted-window accumulation (tap grid axis + strided ref reads); with
        # bf16 + trimmed Cin the materialized A matrix is already 8-16x smaller
        # than before, but it is still kh*kw x the activation bytes.
        patches = [
            xr[:, i:i + stride * Ho:stride, j:j + stride * Wo:stride, :]
            for i in range(kh) for j in range(kw)
        ]
        a = jnp.concatenate(patches, axis=-1).reshape(N * Ho * Wo, K)

    res2 = None
    if residual is not None:
        res2 = residual.reshape(N * Ho * Wo, Cout)

    out = fused_matmul(a, wt, bias, residual=res2, relu=relu,
                       partial_relu_lanes=partial_relu_lanes,
                       out_dtype=out_dtype)
    return out.reshape(N, Ho, Wo, Cout)


def maxpool2d(x, k=3, stride=2, padding=1):
    """Max pool: k*k strided views passed as separate inputs, max tree-reduced
    in-kernel, tiled over M (no (k*k, M, C) HBM stack, no grid=(1,) block)."""
    N, H, W, C = x.shape
    Ho = (H + 2 * padding - k) // stride + 1
    Wo = (W + 2 * padding - k) // stride + 1
    # Input is post-ReLU (>= 0) with padded channels exactly 0, so zero spatial
    # padding is equivalent to -inf padding here.
    xp = jnp.pad(x, ((0, 0), (padding, padding), (padding, padding), (0, 0)))
    M = N * Ho * Wo
    wins = [
        xp[:, i:i + stride * Ho:stride, j:j + stride * Wo:stride, :].reshape(M, C)
        for i in range(k) for j in range(k)
    ]
    tm = _pick_tm(M)
    out = pl.pallas_call(
        _max_window_kernel,
        out_shape=jax.ShapeDtypeStruct((M, C), x.dtype),
        grid=(M // tm,),
        in_specs=[pl.BlockSpec((tm, C), lambda i: (i, 0)) for _ in wins],
        out_specs=pl.BlockSpec((tm, C), lambda i: (i, 0)),
        compiler_params=pltpu.CompilerParams(
            dimension_semantics=("parallel",),
            vmem_limit_bytes=_vmem_limit_bytes(),
        ),
    )(*wins)
    return out.reshape(N, Ho, Wo, C)


def global_avg_pool_fc(x, w_bf16, bias_f32, num_classes):
    """Global average pool + FC, tiled over the HW axis with an f32 accumulator
    (mathematically identical to the 1x1-conv classifier followed by pooling)."""
    N, H, W, C = x.shape
    HW = H * W
    x3 = x.reshape(N, HW, C)
    Cw, Nout = w_bf16.shape
    assert Cw == C
    thw = _pick_hw_tile(HW)
    grid = (HW // thw,)
    kernel = functools.partial(_gap_fc_kernel, inv_hw=1.0 / HW)
    out = pl.pallas_call(
        kernel,
        out_shape=jax.ShapeDtypeStruct((N, Nout), jnp.float32),
        grid=grid,
        in_specs=[
            pl.BlockSpec((N, thw, C), lambda i: (0, i, 0)),
            pl.BlockSpec((Cw, Nout), lambda i: (0, 0)),
            pl.BlockSpec((1, Nout), lambda i: (0, 0)),
        ],
        out_specs=pl.BlockSpec((N, Nout), lambda i: (0, 0)),
        scratch_shapes=[pltpu.VMEM((N, C), jnp.float32)],
        compiler_params=pltpu.CompilerParams(
            dimension_semantics=("arbitrary",),
            vmem_limit_bytes=_vmem_limit_bytes(),
        ),
    )(x3, w_bf16, bias_f32.reshape(1, Nout).astype(jnp.float32))
    return out[:, :num_classes]


# ----------------------------------------------------------------------------
# BN / Normalise folding (glue, constant-folded under jit)
# ----------------------------------------------------------------------------
def _bn_scale_shift(bn, eps=1e-5):
    scale = bn["gamma"] / jnp.sqrt(bn["var"] + eps)
    shift = bn["beta"] - bn["mean"] * scale
    return scale, shift


def fold_conv(w_oihw, bn=None, in_scale=None, extra_bias=None, cout_pad=LANES):
    """(Cout, Cin, kh, kw) -> (kh*kw*Cin, cout_pad) bf16 weight with BN /
    input-scale folded in (K uses the REAL Cin; only Cout is lane-padded),
    plus a padded f32 bias. Returns (wt, bias, kh, kw, cin_real)."""
    Co, Ci, kh, kw = w_oihw.shape
    w = w_oihw.astype(jnp.float32)
    if in_scale is not None:                      # fold Normalise 1/std (per Cin)
        w = w * in_scale[None, :, None, None]
    if bn is not None:                            # fold BN (per Cout)
        scale, shift = _bn_scale_shift(bn)
        w = w * scale[:, None, None, None]
        bias = shift
    else:
        bias = jnp.zeros((Co,), jnp.float32)
    if extra_bias is not None:
        bias = bias + extra_bias
    w4 = jnp.transpose(w, (2, 3, 1, 0))           # (kh, kw, Ci, Co)
    w4 = jnp.pad(w4, ((0, 0), (0, 0), (0, 0), (0, cout_pad - Co)))
    wt = w4.reshape(kh * kw * Ci, cout_pad).astype(jnp.bfloat16)
    b = jnp.pad(bias, (0, cout_pad - Co)).astype(jnp.float32)
    return wt, b, kh, kw, Ci


# ----------------------------------------------------------------------------
# Model (synthetic deterministic params, ResNet18 topology, scaled-down widths)
# ----------------------------------------------------------------------------
def init_params(key, num_classes=10, widths=(8, 16, 32, 64)):
    keys = iter(jax.random.split(key, 256))

    def nk():
        return next(keys)

    def conv_w(cout, cin, k):
        return 0.1 * jax.random.normal(nk(), (cout, cin, k, k), jnp.float32)

    def bn(c):
        return dict(
            gamma=1.0 + 0.1 * jax.random.normal(nk(), (c,), jnp.float32),
            beta=0.1 * jax.random.normal(nk(), (c,), jnp.float32),
            mean=0.1 * jax.random.normal(nk(), (c,), jnp.float32),
            var=jnp.abs(jax.random.normal(nk(), (c,), jnp.float32)) + 0.5,
        )

    params = {"conv1_w": conv_w(widths[0], 3, 7), "bn1": bn(widths[0])}
    layers = []
    in_c = widths[0]
    for li, out_c in enumerate(widths):
        layer_stride = 1 if li == 0 else 2
        blocks = []
        for bi in range(2):  # 2 BasicBlocks per layer (ResNet18)
            s = layer_stride if bi == 0 else 1
            blk = dict(
                stride=s,
                conv1_w=conv_w(out_c, in_c, 3),
                bn1=bn(out_c),
                conv2_w=conv_w(out_c, out_c, 3),
                bn2=bn(out_c),
            )
            if s != 1 or in_c != out_c:
                blk["down_w"] = conv_w(out_c, in_c, 1)
                blk["down_bn"] = bn(out_c)
            blocks.append(blk)
            in_c = out_c
        layers.append(blocks)
    params["layers"] = layers
    params["fc_w"] = conv_w(num_classes, widths[-1], 1)   # fc as 1x1 conv
    params["fc_b"] = 0.1 * jax.random.normal(nk(), (num_classes,), jnp.float32)
    return params


def basic_block(x, blk):
    s = blk["stride"]
    wt1, b1, kh1, kw1, ci1 = fold_conv(blk["conv1_w"], blk["bn1"])

    if "down_w" in blk:
        # Fuse the 1x1 stride-s downsample into conv1's matmul: shared A load,
        # one pallas_call, 256-lane output (full MXU width on v6e/v7x).  The
        # downsample weight lives only on the centre tap's K rows; ReLU is
        # applied to the first 128 lanes (conv1 path) only.
        wtd, bd, _, _, _ = fold_conv(blk["down_w"], blk["down_bn"])
        ktap = (kh1 // 2) * kw1 + (kw1 // 2)
        wd_full = jnp.zeros_like(wt1).at[ktap * ci1:(ktap + 1) * ci1, :].set(wtd)
        w_cat = jnp.concatenate([wt1, wd_full], axis=1)       # (kh*kw*ci, 256)
        b_cat = jnp.concatenate([b1, bd])
        both = conv2d_fused(x, w_cat, b_cat, kh1, kw1, stride=s, padding=1,
                            cin_real=ci1, partial_relu_lanes=LANES)
        out = both[..., :LANES]
        identity = both[..., LANES:]
    else:
        out = conv2d_fused(x, wt1, b1, kh1, kw1, stride=s, padding=1,
                           cin_real=ci1, relu=True)
        identity = x

    wt2, b2, kh2, kw2, ci2 = fold_conv(blk["conv2_w"], blk["bn2"])
    # BN2 + residual add + ReLU fused into conv2's matmul epilogue.
    return conv2d_fused(out, wt2, b2, kh2, kw2, stride=1, padding=1,
                        cin_real=ci2, residual=identity, relu=True)


def my_resnet_forward(params, x_nchw, num_classes):
    # NCHW (PyTorch) -> NHWC (lane axis = channels).
    x = jnp.transpose(x_nchw, (0, 2, 3, 1)).astype(jnp.float32)

    # Normalise: subtract the mean here; the 1/std scale folds exactly into
    # conv1's weights because zero-padding a mean-subtracted image matches
    # padding the fully-normalised image.
    x = x - IMAGENET_MEAN[None, None, None, :]

    wt1, b1, kh, kw, ci = fold_conv(params["conv1_w"], params["bn1"],
                                    in_scale=1.0 / IMAGENET_STD)
    x = conv2d_fused(x, wt1, b1, kh, kw, stride=2, padding=3, cin_real=ci,
                     relu=True)
    x = maxpool2d(x, k=3, stride=2, padding=1)

    for layer in params["layers"]:
        for blk in layer:
            x = basic_block(x, blk)

    # Classifier: avg-pool then FC (linear, identical to 1x1-conv then pool).
    c_real = params["fc_w"].shape[1]
    wfc, bfc, _, _, _ = fold_conv(params["fc_w"], bn=None,
                                  extra_bias=params["fc_b"])
    return global_avg_pool_fc(x[..., :c_real], wfc, bfc, num_classes)


if __name__ == "__main__":
    key = jax.random.PRNGKey(0)
    pkey, xkey = jax.random.split(key)
    num_classes = 10
    params = init_params(pkey, num_classes=num_classes)

    # small NCHW input consistent with the module (3-channel images)
    x = jax.random.uniform(xkey, (2, 3, 32, 32), jnp.float32)

    fwd = jax.jit(functools.partial(my_resnet_forward, params,
                                    num_classes=num_classes))
    out = jax.block_until_ready(fwd(x))
    assert out.shape == (2, num_classes), out.shape
    assert bool(jnp.all(jnp.isfinite(out)))
    print("KERNEL_OK")
</pallas_src>

<mosaic_0001>
module attributes {stable_mosaic.version = 11 : i64} {
  func.func @_mm_kernel(%arg0: i32, %arg1: memref<256x147xbf16, #tpu.memory_space<vmem>>, %arg2: memref<147x128xbf16, #tpu.memory_space<vmem>>, %arg3: memref<1x128xf32, #tpu.memory_space<vmem>>, %arg4: memref<256x128xbf16, #tpu.memory_space<vmem>>) attributes {dimension_semantics = [#tpu.dimension_semantics<parallel>], iteration_bounds = array<i64: 2>, scalar_prefetch = 0 : i64, scratch_operands = 0 : i64, tpu.core_type = #tpu.core_type<tc>, window_params = [{transform_indices = @transform_0, window_bounds = array<i64: 256, 147>}, {pipeline_mode = #tpu.pipeline_mode<synchronous>, transform_indices = @transform_1, window_bounds = array<i64: 147, 128>}, {pipeline_mode = #tpu.pipeline_mode<synchronous>, transform_indices = @transform_2, window_bounds = array<i64: 1, 128>}, {transform_indices = @transform_3, window_bounds = array<i64: 256, 128>}]} {
    %c0 = arith.constant 0 : index
    %c0_0 = arith.constant 0 : index
    %0 = vector.load %arg1[%c0, %c0_0] : memref<256x147xbf16, #tpu.memory_space<vmem>>, vector<256x147xbf16>
    %c0_1 = arith.constant 0 : index
    %c0_2 = arith.constant 0 : index
    %1 = vector.load %arg2[%c0_1, %c0_2] : memref<147x128xbf16, #tpu.memory_space<vmem>>, vector<147x128xbf16>
    %cst = arith.constant dense<0.000000e+00> : vector<256x128xf32>
    %2 = tpu.matmul %0, %1, %cst {dimension_numbers = #tpu.dot_dimension_numbers<[1], [0], [0], [1], [0, 0, 1, 1], [], []>} : vector<256x147xbf16>, vector<147x128xbf16>, vector<256x128xf32> -> vector<256x128xf32>
    %c0_3 = arith.constant 0 : index
    %c0_4 = arith.constant 0 : index
    %3 = vector.load %arg3[%c0_3, %c0_4] : memref<1x128xf32, #tpu.memory_space<vmem>>, vector<1x128xf32>
    %4 = vector.broadcast %3 : vector<1x128xf32> to vector<256x128xf32>
    %5 = arith.addf %2, %4 : vector<256x128xf32>
    %cst_5 = arith.constant 0.000000e+00 : f32
    %6 = vector.broadcast %cst_5 : f32 to vector<256x128xf32>
    %7 = arith.maximumf %5, %6 : vector<256x128xf32>
    %8 = arith.truncf %7 : vector<256x128xf32> to vector<256x128xbf16>
    %c0_6 = arith.constant 0 : index
    %c0_7 = arith.constant 0 : index
    %9 = vector.load %arg4[%c0_6, %c0_7] : memref<256x128xbf16, #tpu.memory_space<vmem>>, vector<256x128xbf16>
    tpu.vector_store %arg4[%c0_6, %c0_7], %8 {strides = array<i32>} : memref<256x128xbf16, #tpu.memory_space<vmem>>, vector<256x128xbf16>,
    return
  }
  func.func @transform_0(%arg0: i32) -> (i32, i32) {
    %c0_i32 = arith.constant 0 : i32
    %c0_i32_0 = arith.constant 0 : i32
    return %arg0, %c0_i32 : i32, i32
  }
  func.func @transform_1(%arg0: i32) -> (i32, i32) {
    %c0_i32 = arith.constant 0 : i32
    %c0_i32_0 = arith.constant 0 : i32
    %c0_i32_1 = arith.constant 0 : i32
    return %c0_i32, %c0_i32_0 : i32, i32
  }
  func.func @transform_2(%arg0: i32) -> (i32, i32) {
    %c0_i32 = arith.constant 0 : i32
    %c0_i32_0 = arith.constant 0 : i32
    %c0_i32_1 = arith.constant 0 : i32
    return %c0_i32, %c0_i32_0 : i32, i32
  }
  func.func @transform_3(%arg0: i32) -> (i32, i32) {
    %c0_i32 = arith.constant 0 : i32
    %c0_i32_0 = arith.constant 0 : i32
    return %arg0, %c0_i32 : i32, i32
  }
}

module attributes {stable_mosaic.version = 11 : i64} {
  func.func @_max_window_kernel(%arg0: i32, %arg1: memref<64x128xbf16, #tpu.memory_space<vmem>>, %arg2: memref<64x128xbf16, #tpu.memory_space<vmem>>, %arg3: memref<64x128xbf16, #tpu.memory_space<vmem>>, %arg4: memref<64x128xbf16, #tpu.memory_space<vmem>>, %arg5: memref<64x128xbf16, #tpu.memory_space<vmem>>, %arg6: memref<64x128xbf16, #tpu.memory_space<vmem>>, %arg7: memref<64x128xbf16, #tpu.memory_space<vmem>>, %arg8: memref<64x128xbf16, #tpu.memory_space<vmem>>, %arg9: memref<64x128xbf16, #tpu.memory_space<vmem>>, %arg10: memref<64x128xbf16, #tpu.memory_space<vmem>>) attributes {dimension_semantics = [#tpu.dimension_semantics<parallel>], iteration_bounds = array<i64: 2>, scalar_prefetch = 0 : i64, scratch_operands = 0 : i64, tpu.core_type = #tpu.core_type<tc>, window_params = [{transform_indices = @transform_0, window_bounds = array<i64: 64, 128>}, {transform_indices = @transform_1, window_bounds = array<i64: 64, 128>}, {transform_indices = @transform_2, window_bounds = array<i64: 64, 128>}, {transform_indices = @transform_3, window_bounds = array<i64: 64, 128>}, {transform_indices = @transform_4, window_bounds = array<i64: 64, 128>}, {transform_indices = @transform_5, window_bounds = array<i64: 64, 128>}, {transform_indices = @transform_6, window_bounds = array<i64: 64, 128>}, {transform_indices = @transform_7, window_bounds = array<i64: 64, 128>}, {transform_indices = @transform_8, window_bounds = array<i64: 64, 128>}, {transform_indices = @transform_9, window_bounds = array<i64: 64, 128>}]} {
    %c0 = arith.constant 0 : index
    %c0_0 = arith.constant 0 : index
    %0 = vector.load %arg1[%c0, %c0_0] : memref<64x128xbf16, #tpu.memory_space<vmem>>, vector<64x128xbf16>
    %c0_1 = arith.constant 0 : index
    %c0_2 = arith.constant 0 : index
    %1 = vector.load %arg2[%c0_1, %c0_2] : memref<64x128xbf16, #tpu.memory_space<vmem>>, vector<64x128xbf16>
    %2 = arith.maximumf %0, %1 : vector<64x128xbf16>
    %c0_3 = arith.constant 0 : index
    %c0_4 = arith.constant 0 : index
    %3 = vector.load %arg3[%c0_3, %c0_4] : memref<64x128xbf16, #tpu.memory_space<vmem>>, vector<64x128xbf16>
    %4 = arith.maximumf %2, %3 : vector<64x128xbf16>
    %c0_5 = arith.constant 0 : index
    %c0_6 = arith.constant 0 : index
    %5 = vector.load %arg4[%c0_5, %c0_6] : memref<64x128xbf16, #tpu.memory_space<vmem>>, vector<64x128xbf16>
    %6 = arith.maximumf %4, %5 : vector<64x128xbf16>
    %c0_7 = arith.constant 0 : index
    %c0_8 = arith.constant 0 : index
    %7 = vector.load %arg5[%c0_7, %c0_8] : memref<64x128xbf16, #tpu.memory_space<vmem>>, vector<64x128xbf16>
    %8 = arith.maximumf %6, %7 : vector<64x128xbf16>
    %c0_9 = arith.constant 0 : index
    %c0_10 = arith.constant 0 : index
    %9 = vector.load %arg6[%c0_9, %c0_10] : memref<64x128xbf16, #tpu.memory_space<vmem>>, vector<64x128xbf16>
    %10 = arith.maximumf %8, %9 : vector<64x128xbf16>
    %c0_11 = arith.constant 0 : index
    %c0_12 = arith.constant 0 : index
    %11 = vector.load %arg7[%c0_11, %c0_12] : memref<64x128xbf16, #tpu.memory_space<vmem>>, vector<64x128xbf16>
    %12 = arith.maximumf %10, %11 : vector<64x128xbf16>
    %c0_13 = arith.constant 0 : index
    %c0_14 = arith.constant 0 : index
    %13 = vector.load %arg8[%c0_13, %c0_14] : memref<64x128xbf16, #tpu.memory_space<vmem>>, vector<64x128xbf16>
    %14 = arith.maximumf %12, %13 : vector<64x128xbf16>
    %c0_15 = arith.constant 0 : index
    %c0_16 = arith.constant 0 : index
    %15 = vector.load %arg9[%c0_15, %c0_16] : memref<64x128xbf16, #tpu.memory_space<vmem>>, vector<64x128xbf16>
    %16 = arith.maximumf %14, %15 : vector<64x128xbf16>
    %c0_17 = arith.constant 0 : index
    %c0_18 = arith.constant 0 : index
    %17 = vector.load %arg10[%c0_17, %c0_18] : memref<64x128xbf16, #tpu.memory_space<vmem>>, vector<64x128xbf16>
    tpu.vector_store %arg10[%c0_17, %c0_18], %16 {strides = array<i32>} : memref<64x128xbf16, #tpu.memory_space<vmem>>, vector<64x128xbf16>,
    return
  }
  func.func @transform_0(%arg0: i32) -> (i32, i32) {
    %c0_i32 = arith.constant 0 : i32
    %c0_i32_0 = arith.constant 0 : i32
    return %arg0, %c0_i32 : i32, i32
  }
  func.func @transform_1(%arg0: i32) -> (i32, i32) {
    %c0_i32 = arith.constant 0 : i32
    %c0_i32_0 = arith.constant 0 : i32
    return %arg0, %c0_i32 : i32, i32
  }
  func.func @transform_2(%arg0: i32) -> (i32, i32) {
    %c0_i32 = arith.constant 0 : i32
    %c0_i32_0 = arith.constant 0 : i32
    return %arg0, %c0_i32 : i32, i32
  }
  func.func @transform_3(%arg0: i32) -> (i32, i32) {
    %c0_i32 = arith.constant 0 : i32
    %c0_i32_0 = arith.constant 0 : i32
    return %arg0, %c0_i32 : i32, i32
  }
  func.func @transform_4(%arg0: i32) -> (i32, i32) {
    %c0_i32 = arith.constant 0 : i32
    %c0_i32_0 = arith.constant 0 : i32
    return %arg0, %c0_i32 : i32, i32
  }
  func.func @transform_5(%arg0: i32) -> (i32, i32) {
    %c0_i32 = arith.constant 0 : i32
    %c0_i32_0 = arith.constant 0 : i32
    return %arg0, %c0_i32 : i32, i32
  }
  func.func @transform_6(%arg0: i32) -> (i32, i32) {
    %c0_i32 = arith.constant 0 : i32
    %c0_i32_0 = arith.constant 0 : i32
    return %arg0, %c0_i32 : i32, i32
  }
  func.func @transform_7(%arg0: i32) -> (i32, i32) {
    %c0_i32 = arith.constant 0 : i32
    %c0_i32_0 = arith.constant 0 : i32
    return %arg0, %c0_i32 : i32, i32
  }
  func.func @transform_8(%arg0: i32) -> (i32, i32) {
    %c0_i32 = arith.constant 0 : i32
    %c0_i32_0 = arith.constant 0 : i32
    return %arg0, %c0_i32 : i32, i32
  }
  func.func @transform_9(%arg0: i32) -> (i32, i32) {
    %c0_i32 = arith.constant 0 : i32
    %c0_i32_0 = arith.constant 0 : i32
    return %arg0, %c0_i32 : i32, i32
  }
}

module attributes {stable_mosaic.version = 11 : i64} {
  func.func @_mm_res_relu_kernel(%arg0: i32, %arg1: memref<64x72xbf16, #tpu.memory_space<vmem>>, %arg2: memref<72x128xbf16, #tpu.memory_space<vmem>>, %arg3: memref<1x128xf32, #tpu.memory_space<vmem>>, %arg4: memref<64x128xbf16, #tpu.memory_space<vmem>>, %arg5: memref<64x128xbf16, #tpu.memory_space<vmem>>) attributes {dimension_semantics = [#tpu.dimension_semantics<parallel>], iteration_bounds = array<i64: 2>, scalar_prefetch = 0 : i64, scratch_operands = 0 : i64, tpu.core_type = #tpu.core_type<tc>, window_params = [{transform_indices = @transform_0, window_bounds = array<i64: 64, 72>}, {pipeline_mode = #tpu.pipeline_mode<synchronous>, transform_indices = @transform_1, window_bounds = array<i64: 72, 128>}, {pipeline_mode = #tpu.pipeline_mode<synchronous>, transform_indices = @transform_2, window_bounds = array<i64: 1, 128>}, {transform_indices = @transform_3, window_bounds = array<i64: 64, 128>}, {transform_indices = @transform_4, window_bounds = array<i64: 64, 128>}]} {
    %c0 = arith.constant 0 : index
    %c0_0 = arith.constant 0 : index
    %0 = vector.load %arg1[%c0, %c0_0] : memref<64x72xbf16, #tpu.memory_space<vmem>>, vector<64x72xbf16>
    %c0_1 = arith.constant 0 : index
    %c0_2 = arith.constant 0 : index
    %1 = vector.load %arg2[%c0_1, %c0_2] : memref<72x128xbf16, #tpu.memory_space<vmem>>, vector<72x128xbf16>
    %cst = arith.constant dense<0.000000e+00> : vector<64x128xf32>
    %2 = tpu.matmul %0, %1, %cst {dimension_numbers = #tpu.dot_dimension_numbers<[1], [0], [0], [1], [0, 0, 1, 1], [], []>} : vector<64x72xbf16>, vector<72x128xbf16>, vector<64x128xf32> -> vector<64x128xf32>
    %c0_3 = arith.constant 0 : index
    %c0_4 = arith.constant 0 : index
    %3 = vector.load %arg3[%c0_3, %c0_4] : memref<1x128xf32, #tpu.memory_space<vmem>>, vector<1x128xf32>
    %4 = vector.broadcast %3 : vector<1x128xf32> to vector<64x128xf32>
    %5 = arith.addf %2, %4 : vector<64x128xf32>
    %c0_5 = arith.constant 0 : index
    %c0_6 = arith.constant 0 : index
    %6 = vector.load %arg4[%c0_5, %c0_6] : memref<64x128xbf16, #tpu.memory_space<vmem>>, vector<64x128xbf16>
    %7 = arith.extf %6 : vector<64x128xbf16> to vector<64x128xf32>
    %8 = arith.addf %5, %7 : vector<64x128xf32>
    %cst_7 = arith.constant 0.000000e+00 : f32
    %9 = vector.broadcast %cst_7 : f32 to vector<64x128xf32>
    %10 = arith.maximumf %8, %9 : vector<64x128xf32>
    %11 = arith.truncf %10 : vector<64x128xf32> to vector<64x128xbf16>
    %c0_8 = arith.constant 0 : index
    %c0_9 = arith.constant 0 : index
    %12 = vector.load %arg5[%c0_8, %c0_9] : memref<64x128xbf16, #tpu.memory_space<vmem>>, vector<64x128xbf16>
    tpu.vector_store %arg5[%c0_8, %c0_9], %11 {strides = array<i32>} : memref<64x128xbf16, #tpu.memory_space<vmem>>, vector<64x128xbf16>,
    return
  }
  func.func @transform_0(%arg0: i32) -> (i32, i32) {
    %c0_i32 = arith.constant 0 : i32
    %c0_i32_0 = arith.constant 0 : i32
    return %arg0, %c0_i32 : i32, i32
  }
  func.func @transform_1(%arg0: i32) -> (i32, i32) {
    %c0_i32 = arith.constant 0 : i32
    %c0_i32_0 = arith.constant 0 : i32
    %c0_i32_1 = arith.constant 0 : i32
    return %c0_i32, %c0_i32_0 : i32, i32
  }
  func.func @transform_2(%arg0: i32) -> (i32, i32) {
    %c0_i32 = arith.constant 0 : i32
    %c0_i32_0 = arith.constant 0 : i32
    %c0_i32_1 = arith.constant 0 : i32
    return %c0_i32, %c0_i32_0 : i32, i32
  }
  func.func @transform_3(%arg0: i32) -> (i32, i32) {
    %c0_i32 = arith.constant 0 : i32
    %c0_i32_0 = arith.constant 0 : i32
    return %arg0, %c0_i32 : i32, i32
  }
  func.func @transform_4(%arg0: i32) -> (i32, i32) {
    %c0_i32 = arith.constant 0 : i32
    %c0_i32_0 = arith.constant 0 : i32
    return %arg0, %c0_i32 : i32, i32
  }
}

module attributes {stable_mosaic.version = 11 : i64} {
  func.func @_mm_kernel(%arg0: i32, %arg1: memref<64x72xbf16, #tpu.memory_space<vmem>>, %arg2: memref<72x128xbf16, #tpu.memory_space<vmem>>, %arg3: memref<1x128xf32, #tpu.memory_space<vmem>>, %arg4: memref<64x128xbf16, #tpu.memory_space<vmem>>) attributes {dimension_semantics = [#tpu.dimension_semantics<parallel>], iteration_bounds = array<i64: 2>, scalar_prefetch = 0 : i64, scratch_operands = 0 : i64, tpu.core_type = #tpu.core_type<tc>, window_params = [{transform_indices = @transform_0, window_bounds = array<i64: 64, 72>}, {pipeline_mode = #tpu.pipeline_mode<synchronous>, transform_indices = @transform_1, window_bounds = array<i64: 72, 128>}, {pipeline_mode = #tpu.pipeline_mode<synchronous>, transform_indices = @transform_2, window_bounds = array<i64: 1, 128>}, {transform_indices = @transform_3, window_bounds = array<i64: 64, 128>}]} {
    %c0 = arith.constant 0 : index
    %c0_0 = arith.constant 0 : index
    %0 = vector.load %arg1[%c0, %c0_0] : memref<64x72xbf16, #tpu.memory_space<vmem>>, vector<64x72xbf16>
    %c0_1 = arith.constant 0 : index
    %c0_2 = arith.constant 0 : index
    %1 = vector.load %arg2[%c0_1, %c0_2] : memref<72x128xbf16, #tpu.memory_space<vmem>>, vector<72x128xbf16>
    %cst = arith.constant dense<0.000000e+00> : vector<64x128xf32>
    %2 = tpu.matmul %0, %1, %cst {dimension_numbers = #tpu.dot_dimension_numbers<[1], [0], [0], [1], [0, 0, 1, 1], [], []>} : vector<64x72xbf16>, vector<72x128xbf16>, vector<64x128xf32> -> vector<64x128xf32>
    %c0_3 = arith.constant 0 : index
    %c0_4 = arith.constant 0 : index
    %3 = vector.load %arg3[%c0_3, %c0_4] : memref<1x128xf32, #tpu.memory_space<vmem>>, vector<1x128xf32>
    %4 = vector.broadcast %3 : vector<1x128xf32> to vector<64x128xf32>
    %5 = arith.addf %2, %4 : vector<64x128xf32>
    %cst_5 = arith.constant 0.000000e+00 : f32
    %6 = vector.broadcast %cst_5 : f32 to vector<64x128xf32>
    %7 = arith.maximumf %5, %6 : vector<64x128xf32>
    %8 = arith.truncf %7 : vector<64x128xf32> to vector<64x128xbf16>
    %c0_6 = arith.constant 0 : index
    %c0_7 = arith.constant 0 : index
    %9 = vector.load %arg4[%c0_6, %c0_7] : memref<64x128xbf16, #tpu.memory_space<vmem>>, vector<64x128xbf16>
    tpu.vector_store %arg4[%c0_6, %c0_7], %8 {strides = array<i32>} : memref<64x128xbf16, #tpu.memory_space<vmem>>, vector<64x128xbf16>,
    return
  }
  func.func @transform_0(%arg0: i32) -> (i32, i32) {
    %c0_i32 = arith.constant 0 : i32
    %c0_i32_0 = arith.constant 0 : i32
    return %arg0, %c0_i32 : i32, i32
  }
  func.func @transform_1(%arg0: i32) -> (i32, i32) {
    %c0_i32 = arith.constant 0 : i32
    %c0_i32_0 = arith.constant 0 : i32
    %c0_i32_1 = arith.constant 0 : i32
    return %c0_i32, %c0_i32_0 : i32, i32
  }
  func.func @transform_2(%arg0: i32) -> (i32, i32) {
    %c0_i32 = arith.constant 0 : i32
    %c0_i32_0 = arith.constant 0 : i32
    %c0_i32_1 = arith.constant 0 : i32
    return %c0_i32, %c0_i32_0 : i32, i32
  }
  func.func @transform_3(%arg0: i32) -> (i32, i32) {
    %c0_i32 = arith.constant 0 : i32
    %c0_i32_0 = arith.constant 0 : i32
    return %arg0, %c0_i32 : i32, i32
  }
}

module attributes {stable_mosaic.version = 11 : i64} {
  func.func @_mm_partial_relu_kernel(%arg0: i32, %arg1: memref<16x72xbf16, #tpu.memory_space<vmem>>, %arg2: memref<72x256xbf16, #tpu.memory_space<vmem>>, %arg3: memref<1x256xf32, #tpu.memory_space<vmem>>, %arg4: memref<16x256xbf16, #tpu.memory_space<vmem>>) attributes {dimension_semantics = [#tpu.dimension_semantics<parallel>], iteration_bounds = array<i64: 2>, scalar_prefetch = 0 : i64, scratch_operands = 0 : i64, tpu.core_type = #tpu.core_type<tc>, window_params = [{transform_indices = @transform_0, window_bounds = array<i64: 16, 72>}, {pipeline_mode = #tpu.pipeline_mode<synchronous>, transform_indices = @transform_1, window_bounds = array<i64: 72, 256>}, {pipeline_mode = #tpu.pipeline_mode<synchronous>, transform_indices = @transform_2, window_bounds = array<i64: 1, 256>}, {transform_indices = @transform_3, window_bounds = array<i64: 16, 256>}]} {
    %c0 = arith.constant 0 : index
    %c0_0 = arith.constant 0 : index
    %0 = vector.load %arg1[%c0, %c0_0] : memref<16x72xbf16, #tpu.memory_space<vmem>>, vector<16x72xbf16>
    %c0_1 = arith.constant 0 : index
    %c0_2 = arith.constant 0 : index
    %1 = vector.load %arg2[%c0_1, %c0_2] : memref<72x256xbf16, #tpu.memory_space<vmem>>, vector<72x256xbf16>
    %cst = arith.constant dense<0.000000e+00> : vector<16x256xf32>
    %2 = tpu.matmul %0, %1, %cst {dimension_numbers = #tpu.dot_dimension_numbers<[1], [0], [0], [1], [0, 0, 1, 1], [], []>} : vector<16x72xbf16>, vector<72x256xbf16>, vector<16x256xf32> -> vector<16x256xf32>
    %c0_3 = arith.constant 0 : index
    %c0_4 = arith.constant 0 : index
    %3 = vector.load %arg3[%c0_3, %c0_4] : memref<1x256xf32, #tpu.memory_space<vmem>>, vector<1x256xf32>
    %4 = vector.broadcast %3 : vector<1x256xf32> to vector<16x256xf32>
    %5 = arith.addf %2, %4 : vector<16x256xf32>
    %6 = tpu.iota {dimensions = array<i32: 1>} : vector<16x256xi32>
    %c128_i32 = arith.constant 128 : i32
    %7 = vector.broadcast %c128_i32 : i32 to vector<16x256xi32>
    %8 = arith.cmpi slt, %6, %7 : vector<16x256xi32>
    %cst_5 = arith.constant 0.000000e+00 : f32
    %9 = vector.broadcast %cst_5 : f32 to vector<16x256xf32>
    %10 = arith.maximumf %5, %9 : vector<16x256xf32>
    %11 = arith.select %8, %10, %5 : vector<16x256xi1>, vector<16x256xf32>
    %12 = arith.truncf %11 : vector<16x256xf32> to vector<16x256xbf16>
    %c0_6 = arith.constant 0 : index
    %c0_7 = arith.constant 0 : index
    %13 = vector.load %arg4[%c0_6, %c0_7] : memref<16x256xbf16, #tpu.memory_space<vmem>>, vector<16x256xbf16>
    tpu.vector_store %arg4[%c0_6, %c0_7], %12 {strides = array<i32>} : memref<16x256xbf16, #tpu.memory_space<vmem>>, vector<16x256xbf16>,
    return
  }
  func.func @transform_0(%arg0: i32) -> (i32, i32) {
    %c0_i32 = arith.constant 0 : i32
    %c0_i32_0 = arith.constant 0 : i32
    return %arg0, %c0_i32 : i32, i32
  }
  func.func @transform_1(%arg0: i32) -> (i32, i32) {
    %c0_i32 = arith.constant 0 : i32
    %c0_i32_0 = arith.constant 0 : i32
    %c0_i32_1 = arith.constant 0 : i32
    return %c0_i32, %c0_i32_0 : i32, i32
  }
  func.func @transform_2(%arg0: i32) -> (i32, i32) {
    %c0_i32 = arith.constant 0 : i32
    %c0_i32_0 = arith.constant 0 : i32
    %c0_i32_1 = arith.constant 0 : i32
    return %c0_i32, %c0_i32_0 : i32, i32
  }
  func.func @transform_3(%arg0: i32) -> (i32, i32) {
    %c0_i32 = arith.constant 0 : i32
    %c0_i32_0 = arith.constant 0 : i32
    return %arg0, %c0_i32 : i32, i32
  }
}

module attributes {stable_mosaic.version = 11 : i64} {
  func.func @_mm_kernel(%arg0: i32, %arg1: memref<16x144xbf16, #tpu.memory_space<vmem>>, %arg2: memref<144x128xbf16, #tpu.memory_space<vmem>>, %arg3: memref<1x128xf32, #tpu.memory_space<vmem>>, %arg4: memref<16x128xbf16, #tpu.memory_space<vmem>>) attributes {dimension_semantics = [#tpu.dimension_semantics<parallel>], iteration_bounds = array<i64: 2>, scalar_prefetch = 0 : i64, scratch_operands = 0 : i64, tpu.core_type = #tpu.core_type<tc>, window_params = [{transform_indices = @transform_0, window_bounds = array<i64: 16, 144>}, {pipeline_mode = #tpu.pipeline_mode<synchronous>, transform_indices = @transform_1, window_bounds = array<i64: 144, 128>}, {pipeline_mode = #tpu.pipeline_mode<synchronous>, transform_indices = @transform_2, window_bounds = array<i64: 1, 128>}, {transform_indices = @transform_3, window_bounds = array<i64: 16, 128>}]} {
    %c0 = arith.constant 0 : index
    %c0_0 = arith.constant 0 : index
    %0 = vector.load %arg1[%c0, %c0_0] : memref<16x144xbf16, #tpu.memory_space<vmem>>, vector<16x144xbf16>
    %c0_1 = arith.constant 0 : index
    %c0_2 = arith.constant 0 : index
    %1 = vector.load %arg2[%c0_1, %c0_2] : memref<144x128xbf16, #tpu.memory_space<vmem>>, vector<144x128xbf16>
    %cst = arith.constant dense<0.000000e+00> : vector<16x128xf32>
    %2 = tpu.matmul %0, %1, %cst {dimension_numbers = #tpu.dot_dimension_numbers<[1], [0], [0], [1], [0, 0, 1, 1], [], []>} : vector<16x144xbf16>, vector<144x128xbf16>, vector<16x128xf32> -> vector<16x128xf32>
    %c0_3 = arith.constant 0 : index
    %c0_4 = arith.constant 0 : index
    %3 = vector.load %arg3[%c0_3, %c0_4] : memref<1x128xf32, #tpu.memory_space<vmem>>, vector<1x128xf32>
    %4 = vector.broadcast %3 : vector<1x128xf32> to vector<16x128xf32>
    %5 = arith.addf %2, %4 : vector<16x128xf32>
    %cst_5 = arith.constant 0.000000e+00 : f32
    %6 = vector.broadcast %cst_5 : f32 to vector<16x128xf32>
    %7 = arith.maximumf %5, %6 : vector<16x128xf32>
    %8 = arith.truncf %7 : vector<16x128xf32> to vector<16x128xbf16>
    %c0_6 = arith.constant 0 : index
    %c0_7 = arith.constant 0 : index
    %9 = vector.load %arg4[%c0_6, %c0_7] : memref<16x128xbf16, #tpu.memory_space<vmem>>, vector<16x128xbf16>
    tpu.vector_store %arg4[%c0_6, %c0_7], %8 {strides = array<i32>} : memref<16x128xbf16, #tpu.memory_space<vmem>>, vector<16x128xbf16>,
    return
  }
  func.func @transform_0(%arg0: i32) -> (i32, i32) {
    %c0_i32 = arith.constant 0 : i32
    %c0_i32_0 = arith.constant 0 : i32
    return %arg0, %c0_i32 : i32, i32
  }
  func.func @transform_1(%arg0: i32) -> (i32, i32) {
    %c0_i32 = arith.constant 0 : i32
    %c0_i32_0 = arith.constant 0 : i32
    %c0_i32_1 = arith.constant 0 : i32
    return %c0_i32, %c0_i32_0 : i32, i32
  }
  func.func @transform_2(%arg0: i32) -> (i32, i32) {
    %c0_i32 = arith.constant 0 : i32
    %c0_i32_0 = arith.constant 0 : i32
    %c0_i32_1 = arith.constant 0 : i32
    return %c0_i32, %c0_i32_0 : i32, i32
  }
  func.func @transform_3(%arg0: i32) -> (i32, i32) {
    %c0_i32 = arith.constant 0 : i32
    %c0_i32_0 = arith.constant 0 : i32
    return %arg0, %c0_i32 : i32, i32
  }
}

module attributes {stable_mosaic.version = 11 : i64} {
  func.func @_mm_res_relu_kernel(%arg0: i32, %arg1: memref<16x144xbf16, #tpu.memory_space<vmem>>, %arg2: memref<144x128xbf16, #tpu.memory_space<vmem>>, %arg3: memref<1x128xf32, #tpu.memory_space<vmem>>, %arg4: memref<16x128xbf16, #tpu.memory_space<vmem>>, %arg5: memref<16x128xbf16, #tpu.memory_space<vmem>>) attributes {dimension_semantics = [#tpu.dimension_semantics<parallel>], iteration_bounds = array<i64: 2>, scalar_prefetch = 0 : i64, scratch_operands = 0 : i64, tpu.core_type = #tpu.core_type<tc>, window_params = [{transform_indices = @transform_0, window_bounds = array<i64: 16, 144>}, {pipeline_mode = #tpu.pipeline_mode<synchronous>, transform_indices = @transform_1, window_bounds = array<i64: 144, 128>}, {pipeline_mode = #tpu.pipeline_mode<synchronous>, transform_indices = @transform_2, window_bounds = array<i64: 1, 128>}, {transform_indices = @transform_3, window_bounds = array<i64: 16, 128>}, {transform_indices = @transform_4, window_bounds = array<i64: 16, 128>}]} {
    %c0 = arith.constant 0 : index
    %c0_0 = arith.constant 0 : index
    %0 = vector.load %arg1[%c0, %c0_0] : memref<16x144xbf16, #tpu.memory_space<vmem>>, vector<16x144xbf16>
    %c0_1 = arith.constant 0 : index
    %c0_2 = arith.constant 0 : index
    %1 = vector.load %arg2[%c0_1, %c0_2] : memref<144x128xbf16, #tpu.memory_space<vmem>>, vector<144x128xbf16>
    %cst = arith.constant dense<0.000000e+00> : vector<16x128xf32>
    %2 = tpu.matmul %0, %1, %cst {dimension_numbers = #tpu.dot_dimension_numbers<[1], [0], [0], [1], [0, 0, 1, 1], [], []>} : vector<16x144xbf16>, vector<144x128xbf16>, vector<16x128xf32> -> vector<16x128xf32>
    %c0_3 = arith.constant 0 : index
    %c0_4 = arith.constant 0 : index
    %3 = vector.load %arg3[%c0_3, %c0_4] : memref<1x128xf32, #tpu.memory_space<vmem>>, vector<1x128xf32>
    %4 = vector.broadcast %3 : vector<1x128xf32> to vector<16x128xf32>
    %5 = arith.addf %2, %4 : vector<16x128xf32>
    %c0_5 = arith.constant 0 : index
    %c0_6 = arith.constant 0 : index
    %6 = vector.load %arg4[%c0_5, %c0_6] : memref<16x128xbf16, #tpu.memory_space<vmem>>, vector<16x128xbf16>
    %7 = arith.extf %6 : vector<16x128xbf16> to vector<16x128xf32>
    %8 = arith.addf %5, %7 : vector<16x128xf32>
    %cst_7 = arith.constant 0.000000e+00 : f32
    %9 = vector.broadcast %cst_7 : f32 to vector<16x128xf32>
    %10 = arith.maximumf %8, %9 : vector<16x128xf32>
    %11 = arith.truncf %10 : vector<16x128xf32> to vector<16x128xbf16>
    %c0_8 = arith.constant 0 : index
    %c0_9 = arith.constant 0 : index
    %12 = vector.load %arg5[%c0_8, %c0_9] : memref<16x128xbf16, #tpu.memory_space<vmem>>, vector<16x128xbf16>
    tpu.vector_store %arg5[%c0_8, %c0_9], %11 {strides = array<i32>} : memref<16x128xbf16, #tpu.memory_space<vmem>>, vector<16x128xbf16>,
    return
  }
  func.func @transform_0(%arg0: i32) -> (i32, i32) {
    %c0_i32 = arith.constant 0 : i32
    %c0_i32_0 = arith.constant 0 : i32
    return %arg0, %c0_i32 : i32, i32
  }
  func.func @transform_1(%arg0: i32) -> (i32, i32) {
    %c0_i32 = arith.constant 0 : i32
    %c0_i32_0 = arith.constant 0 : i32
    %c0_i32_1 = arith.constant 0 : i32
    return %c0_i32, %c0_i32_0 : i32, i32
  }
  func.func @transform_2(%arg0: i32) -> (i32, i32) {
    %c0_i32 = arith.constant 0 : i32
    %c0_i32_0 = arith.constant 0 : i32
    %c0_i32_1 = arith.constant 0 : i32
    return %c0_i32, %c0_i32_0 : i32, i32
  }
  func.func @transform_3(%arg0: i32) -> (i32, i32) {
    %c0_i32 = arith.constant 0 : i32
    %c0_i32_0 = arith.constant 0 : i32
    return %arg0, %c0_i32 : i32, i32
  }
  func.func @transform_4(%arg0: i32) -> (i32, i32) {
    %c0_i32 = arith.constant 0 : i32
    %c0_i32_0 = arith.constant 0 : i32
    return %arg0, %c0_i32 : i32, i32
  }
}

module attributes {stable_mosaic.version = 11 : i64} {
  func.func @_mm_partial_relu_kernel(%arg0: i32, %arg1: memref<8x144xbf16, #tpu.memory_space<vmem>>, %arg2: memref<144x256xbf16, #tpu.memory_space<vmem>>, %arg3: memref<1x256xf32, #tpu.memory_space<vmem>>, %arg4: memref<8x256xbf16, #tpu.memory_space<vmem>>) attributes {dimension_semantics = [#tpu.dimension_semantics<parallel>], iteration_bounds = array<i64: 1>, scalar_prefetch = 0 : i64, scratch_operands = 0 : i64, tpu.core_type = #tpu.core_type<tc>, window_params = [{transform_indices = @transform_0, window_bounds = array<i64: 8, 144>}, {pipeline_mode = #tpu.pipeline_mode<synchronous>, transform_indices = @transform_1, window_bounds = array<i64: 144, 256>}, {pipeline_mode = #tpu.pipeline_mode<synchronous>, transform_indices = @transform_2, window_bounds = array<i64: 1, 256>}, {transform_indices = @transform_3, window_bounds = array<i64: 8, 256>}]} {
    %c0 = arith.constant 0 : index
    %c0_0 = arith.constant 0 : index
    %0 = vector.load %arg1[%c0, %c0_0] : memref<8x144xbf16, #tpu.memory_space<vmem>>, vector<8x144xbf16>
    %c0_1 = arith.constant 0 : index
    %c0_2 = arith.constant 0 : index
    %1 = vector.load %arg2[%c0_1, %c0_2] : memref<144x256xbf16, #tpu.memory_space<vmem>>, vector<144x256xbf16>
    %cst = arith.constant dense<0.000000e+00> : vector<8x256xf32>
    %2 = tpu.matmul %0, %1, %cst {dimension_numbers = #tpu.dot_dimension_numbers<[1], [0], [0], [1], [0, 0, 1, 1], [], []>} : vector<8x144xbf16>, vector<144x256xbf16>, vector<8x256xf32> -> vector<8x256xf32>
    %c0_3 = arith.constant 0 : index
    %c0_4 = arith.constant 0 : index
    %3 = vector.load %arg3[%c0_3, %c0_4] : memref<1x256xf32, #tpu.memory_space<vmem>>, vector<1x256xf32>
    %4 = vector.broadcast %3 : vector<1x256xf32> to vector<8x256xf32>
    %5 = arith.addf %2, %4 : vector<8x256xf32>
    %6 = tpu.iota {dimensions = array<i32: 1>} : vector<8x256xi32>
    %c128_i32 = arith.constant 128 : i32
    %7 = vector.broadcast %c128_i32 : i32 to vector<8x256xi32>
    %8 = arith.cmpi slt, %6, %7 : vector<8x256xi32>
    %cst_5 = arith.constant 0.000000e+00 : f32
    %9 = vector.broadcast %cst_5 : f32 to vector<8x256xf32>
    %10 = arith.maximumf %5, %9 : vector<8x256xf32>
    %11 = arith.select %8, %10, %5 : vector<8x256xi1>, vector<8x256xf32>
    %12 = arith.truncf %11 : vector<8x256xf32> to vector<8x256xbf16>
    %c0_6 = arith.constant 0 : index
    %c0_7 = arith.constant 0 : index
    %13 = vector.load %arg4[%c0_6, %c0_7] : memref<8x256xbf16, #tpu.memory_space<vmem>>, vector<8x256xbf16>
    tpu.vector_store %arg4[%c0_6, %c0_7], %12 {strides = array<i32>} : memref<8x256xbf16, #tpu.memory_space<vmem>>, vector<8x256xbf16>,
    return
  }
  func.func @transform_0(%arg0: i32) -> (i32, i32) {
    %c0_i32 = arith.constant 0 : i32
    %c0_i32_0 = arith.constant 0 : i32
    return %arg0, %c0_i32 : i32, i32
  }
  func.func @transform_1(%arg0: i32) -> (i32, i32) {
    %c0_i32 = arith.constant 0 : i32
    %c0_i32_0 = arith.constant 0 : i32
    %c0_i32_1 = arith.constant 0 : i32
    return %c0_i32, %c0_i32_0 : i32, i32
  }
  func.func @transform_2(%arg0: i32) -> (i32, i32) {
    %c0_i32 = arith.constant 0 : i32
    %c0_i32_0 = arith.constant 0 : i32
    %c0_i32_1 = arith.constant 0 : i32
    return %c0_i32, %c0_i32_0 : i32, i32
  }
  func.func @transform_3(%arg0: i32) -> (i32, i32) {
    %c0_i32 = arith.constant 0 : i32
    %c0_i32_0 = arith.constant 0 : i32
    return %arg0, %c0_i32 : i32, i32
  }
}

module attributes {stable_mosaic.version = 11 : i64} {
  func.func @_mm_res_relu_kernel(%arg0: i32, %arg1: memref<8x288xbf16, #tpu.memory_space<vmem>>, %arg2: memref<288x128xbf16, #tpu.memory_space<vmem>>, %arg3: memref<1x128xf32, #tpu.memory_space<vmem>>, %arg4: memref<8x128xbf16, #tpu.memory_space<vmem>>, %arg5: memref<8x128xbf16, #tpu.memory_space<vmem>>) attributes {dimension_semantics = [#tpu.dimension_semantics<parallel>], iteration_bounds = array<i64: 1>, scalar_prefetch = 0 : i64, scratch_operands = 0 : i64, tpu.core_type = #tpu.core_type<tc>, window_params = [{transform_indices = @transform_0, window_bounds = array<i64: 8, 288>}, {pipeline_mode = #tpu.pipeline_mode<synchronous>, transform_indices = @transform_1, window_bounds = array<i64: 288, 128>}, {pipeline_mode = #tpu.pipeline_mode<synchronous>, transform_indices = @transform_2, window_bounds = array<i64: 1, 128>}, {transform_indices = @transform_3, window_bounds = array<i64: 8, 128>}, {transform_indices = @transform_4, window_bounds = array<i64: 8, 128>}]} {
    %c0 = arith.constant 0 : index
    %c0_0 = arith.constant 0 : index
    %0 = vector.load %arg1[%c0, %c0_0] : memref<8x288xbf16, #tpu.memory_space<vmem>>, vector<8x288xbf16>
    %c0_1 = arith.constant 0 : index
    %c0_2 = arith.constant 0 : index
    %1 = vector.load %arg2[%c0_1, %c0_2] : memref<288x128xbf16, #tpu.memory_space<vmem>>, vector<288x128xbf16>
    %cst = arith.constant dense<0.000000e+00> : vector<8x128xf32>
    %2 = tpu.matmul %0, %1, %cst {dimension_numbers = #tpu.dot_dimension_numbers<[1], [0], [0], [1], [0, 0, 1, 1], [], []>} : vector<8x288xbf16>, vector<288x128xbf16>, vector<8x128xf32> -> vector<8x128xf32>
    %c0_3 = arith.constant 0 : index
    %c0_4 = arith.constant 0 : index
    %3 = vector.load %arg3[%c0_3, %c0_4] : memref<1x128xf32, #tpu.memory_space<vmem>>, vector<1x128xf32>
    %4 = vector.broadcast %3 : vector<1x128xf32> to vector<8x128xf32>
    %5 = arith.addf %2, %4 : vector<8x128xf32>
    %c0_5 = arith.constant 0 : index
    %c0_6 = arith.constant 0 : index
    %6 = vector.load %arg4[%c0_5, %c0_6] : memref<8x128xbf16, #tpu.memory_space<vmem>>, vector<8x128xbf16>
    %7 = arith.extf %6 : vector<8x128xbf16> to vector<8x128xf32>
    %8 = arith.addf %5, %7 : vector<8x128xf32>
    %cst_7 = arith.constant 0.000000e+00 : f32
    %9 = vector.broadcast %cst_7 : f32 to vector<8x128xf32>
    %10 = arith.maximumf %8, %9 : vector<8x128xf32>
    %11 = arith.truncf %10 : vector<8x128xf32> to vector<8x128xbf16>
    %c0_8 = arith.constant 0 : index
    %c0_9 = arith.constant 0 : index
    %12 = vector.load %arg5[%c0_8, %c0_9] : memref<8x128xbf16, #tpu.memory_space<vmem>>, vector<8x128xbf16>
    tpu.vector_store %arg5[%c0_8, %c0_9], %11 {strides = array<i32>} : memref<8x128xbf16, #tpu.memory_space<vmem>>, vector<8x128xbf16>,
    return
  }
  func.func @transform_0(%arg0: i32) -> (i32, i32) {
    %c0_i32 = arith.constant 0 : i32
    %c0_i32_0 = arith.constant 0 : i32
    return %arg0, %c0_i32 : i32, i32
  }
  func.func @transform_1(%arg0: i32) -> (i32, i32) {
    %c0_i32 = arith.constant 0 : i32
    %c0_i32_0 = arith.constant 0 : i32
    %c0_i32_1 = arith.constant 0 : i32
    return %c0_i32, %c0_i32_0 : i32, i32
  }
  func.func @transform_2(%arg0: i32) -> (i32, i32) {
    %c0_i32 = arith.constant 0 : i32
    %c0_i32_0 = arith.constant 0 : i32
    %c0_i32_1 = arith.constant 0 : i32
    return %c0_i32, %c0_i32_0 : i32, i32
  }
  func.func @transform_3(%arg0: i32) -> (i32, i32) {
    %c0_i32 = arith.constant 0 : i32
    %c0_i32_0 = arith.constant 0 : i32
    return %arg0, %c0_i32 : i32, i32
  }
  func.func @transform_4(%arg0: i32) -> (i32, i32) {
    %c0_i32 = arith.constant 0 : i32
    %c0_i32_0 = arith.constant 0 : i32
    return %arg0, %c0_i32 : i32, i32
  }
}

module attributes {stable_mosaic.version = 11 : i64} {
  func.func @_mm_kernel(%arg0: i32, %arg1: memref<8x288xbf16, #tpu.memory_space<vmem>>, %arg2: memref<288x128xbf16, #tpu.memory_space<vmem>>, %arg3: memref<1x128xf32, #tpu.memory_space<vmem>>, %arg4: memref<8x128xbf16, #tpu.memory_space<vmem>>) attributes {dimension_semantics = [#tpu.dimension_semantics<parallel>], iteration_bounds = array<i64: 1>, scalar_prefetch = 0 : i64, scratch_operands = 0 : i64, tpu.core_type = #tpu.core_type<tc>, window_params = [{transform_indices = @transform_0, window_bounds = array<i64: 8, 288>}, {pipeline_mode = #tpu.pipeline_mode<synchronous>, transform_indices = @transform_1, window_bounds = array<i64: 288, 128>}, {pipeline_mode = #tpu.pipeline_mode<synchronous>, transform_indices = @transform_2, window_bounds = array<i64: 1, 128>}, {transform_indices = @transform_3, window_bounds = array<i64: 8, 128>}]} {
    %c0 = arith.constant 0 : index
    %c0_0 = arith.constant 0 : index
    %0 = vector.load %arg1[%c0, %c0_0] : memref<8x288xbf16, #tpu.memory_space<vmem>>, vector<8x288xbf16>
    %c0_1 = arith.constant 0 : index
    %c0_2 = arith.constant 0 : index
    %1 = vector.load %arg2[%c0_1, %c0_2] : memref<288x128xbf16, #tpu.memory_space<vmem>>, vector<288x128xbf16>
    %cst = arith.constant dense<0.000000e+00> : vector<8x128xf32>
    %2 = tpu.matmul %0, %1, %cst {dimension_numbers = #tpu.dot_dimension_numbers<[1], [0], [0], [1], [0, 0, 1, 1], [], []>} : vector<8x288xbf16>, vector<288x128xbf16>, vector<8x128xf32> -> vector<8x128xf32>
    %c0_3 = arith.constant 0 : index
    %c0_4 = arith.constant 0 : index
    %3 = vector.load %arg3[%c0_3, %c0_4] : memref<1x128xf32, #tpu.memory_space<vmem>>, vector<1x128xf32>
    %4 = vector.broadcast %3 : vector<1x128xf32> to vector<8x128xf32>
    %5 = arith.addf %2, %4 : vector<8x128xf32>
    %cst_5 = arith.constant 0.000000e+00 : f32
    %6 = vector.broadcast %cst_5 : f32 to vector<8x128xf32>
    %7 = arith.maximumf %5, %6 : vector<8x128xf32>
    %8 = arith.truncf %7 : vector<8x128xf32> to vector<8x128xbf16>
    %c0_6 = arith.constant 0 : index
    %c0_7 = arith.constant 0 : index
    %9 = vector.load %arg4[%c0_6, %c0_7] : memref<8x128xbf16, #tpu.memory_space<vmem>>, vector<8x128xbf16>
    tpu.vector_store %arg4[%c0_6, %c0_7], %8 {strides = array<i32>} : memref<8x128xbf16, #tpu.memory_space<vmem>>, vector<8x128xbf16>,
    return
  }
  func.func @transform_0(%arg0: i32) -> (i32, i32) {
    %c0_i32 = arith.constant 0 : i32
    %c0_i32_0 = arith.constant 0 : i32
    return %arg0, %c0_i32 : i32, i32
  }
  func.func @transform_1(%arg0: i32) -> (i32, i32) {
    %c0_i32 = arith.constant 0 : i32
    %c0_i32_0 = arith.constant 0 : i32
    %c0_i32_1 = arith.constant 0 : i32
    return %c0_i32, %c0_i32_0 : i32, i32
  }
  func.func @transform_2(%arg0: i32) -> (i32, i32) {
    %c0_i32 = arith.constant 0 : i32
    %c0_i32_0 = arith.constant 0 : i32
    %c0_i32_1 = arith.constant 0 : i32
    return %c0_i32, %c0_i32_0 : i32, i32
  }
  func.func @transform_3(%arg0: i32) -> (i32, i32) {
    %c0_i32 = arith.constant 0 : i32
    %c0_i32_0 = arith.constant 0 : i32
    return %arg0, %c0_i32 : i32, i32
  }
}

module attributes {stable_mosaic.version = 11 : i64} {
  func.func @_mm_partial_relu_kernel(%arg0: i32, %arg1: memref<2x288xbf16, #tpu.memory_space<vmem>>, %arg2: memref<288x256xbf16, #tpu.memory_space<vmem>>, %arg3: memref<1x256xf32, #tpu.memory_space<vmem>>, %arg4: memref<2x256xbf16, #tpu.memory_space<vmem>>) attributes {dimension_semantics = [#tpu.dimension_semantics<parallel>], iteration_bounds = array<i64: 1>, scalar_prefetch = 0 : i64, scratch_operands = 0 : i64, tpu.core_type = #tpu.core_type<tc>, window_params = [{transform_indices = @transform_0, window_bounds = array<i64: 2, 288>}, {pipeline_mode = #tpu.pipeline_mode<synchronous>, transform_indices = @transform_1, window_bounds = array<i64: 288, 256>}, {pipeline_mode = #tpu.pipeline_mode<synchronous>, transform_indices = @transform_2, window_bounds = array<i64: 1, 256>}, {transform_indices = @transform_3, window_bounds = array<i64: 2, 256>}]} {
    %c0 = arith.constant 0 : index
    %c0_0 = arith.constant 0 : index
    %0 = vector.load %arg1[%c0, %c0_0] : memref<2x288xbf16, #tpu.memory_space<vmem>>, vector<2x288xbf16>
    %c0_1 = arith.constant 0 : index
    %c0_2 = arith.constant 0 : index
    %1 = vector.load %arg2[%c0_1, %c0_2] : memref<288x256xbf16, #tpu.memory_space<vmem>>, vector<288x256xbf16>
    %cst = arith.constant dense<0.000000e+00> : vector<2x256xf32>
    %2 = tpu.matmul %0, %1, %cst {dimension_numbers = #tpu.dot_dimension_numbers<[1], [0], [0], [1], [0, 0, 1, 1], [], []>} : vector<2x288xbf16>, vector<288x256xbf16>, vector<2x256xf32> -> vector<2x256xf32>
    %c0_3 = arith.constant 0 : index
    %c0_4 = arith.constant 0 : index
    %3 = vector.load %arg3[%c0_3, %c0_4] : memref<1x256xf32, #tpu.memory_space<vmem>>, vector<1x256xf32>
    %4 = vector.broadcast %3 : vector<1x256xf32> to vector<2x256xf32>
    %5 = arith.addf %2, %4 : vector<2x256xf32>
    %6 = tpu.iota {dimensions = array<i32: 1>} : vector<2x256xi32>
    %c128_i32 = arith.constant 128 : i32
    %7 = vector.broadcast %c128_i32 : i32 to vector<2x256xi32>
    %8 = arith.cmpi slt, %6, %7 : vector<2x256xi32>
    %cst_5 = arith.constant 0.000000e+00 : f32
    %9 = vector.broadcast %cst_5 : f32 to vector<2x256xf32>
    %10 = arith.maximumf %5, %9 : vector<2x256xf32>
    %11 = arith.select %8, %10, %5 : vector<2x256xi1>, vector<2x256xf32>
    %12 = arith.truncf %11 : vector<2x256xf32> to vector<2x256xbf16>
    %c0_6 = arith.constant 0 : index
    %c0_7 = arith.constant 0 : index
    %13 = vector.load %arg4[%c0_6, %c0_7] : memref<2x256xbf16, #tpu.memory_space<vmem>>, vector<2x256xbf16>
    tpu.vector_store %arg4[%c0_6, %c0_7], %12 {strides = array<i32>} : memref<2x256xbf16, #tpu.memory_space<vmem>>, vector<2x256xbf16>,
    return
  }
  func.func @transform_0(%arg0: i32) -> (i32, i32) {
    %c0_i32 = arith.constant 0 : i32
    %c0_i32_0 = arith.constant 0 : i32
    return %arg0, %c0_i32 : i32, i32
  }
  func.func @transform_1(%arg0: i32) -> (i32, i32) {
    %c0_i32 = arith.constant 0 : i32
    %c0_i32_0 = arith.constant 0 : i32
    %c0_i32_1 = arith.constant 0 : i32
    return %c0_i32, %c0_i32_0 : i32, i32
  }
  func.func @transform_2(%arg0: i32) -> (i32, i32) {
    %c0_i32 = arith.constant 0 : i32
    %c0_i32_0 = arith.constant 0 : i32
    %c0_i32_1 = arith.constant 0 : i32
    return %c0_i32, %c0_i32_0 : i32, i32
  }
  func.func @transform_3(%arg0: i32) -> (i32, i32) {
    %c0_i32 = arith.constant 0 : i32
    %c0_i32_0 = arith.constant 0 : i32
    return %arg0, %c0_i32 : i32, i32
  }
}

module attributes {stable_mosaic.version = 11 : i64} {
  func.func @_mm_kernel(%arg0: i32, %arg1: memref<2x576xbf16, #tpu.memory_space<vmem>>, %arg2: memref<576x128xbf16, #tpu.memory_space<vmem>>, %arg3: memref<1x128xf32, #tpu.memory_space<vmem>>, %arg4: memref<2x128xbf16, #tpu.memory_space<vmem>>) attributes {dimension_semantics = [#tpu.dimension_semantics<parallel>], iteration_bounds = array<i64: 1>, scalar_prefetch = 0 : i64, scratch_operands = 0 : i64, tpu.core_type = #tpu.core_type<tc>, window_params = [{transform_indices = @transform_0, window_bounds = array<i64: 2, 576>}, {pipeline_mode = #tpu.pipeline_mode<synchronous>, transform_indices = @transform_1, window_bounds = array<i64: 576, 128>}, {pipeline_mode = #tpu.pipeline_mode<synchronous>, transform_indices = @transform_2, window_bounds = array<i64: 1, 128>}, {transform_indices = @transform_3, window_bounds = array<i64: 2, 128>}]} {
    %c0 = arith.constant 0 : index
    %c0_0 = arith.constant 0 : index
    %0 = vector.load %arg1[%c0, %c0_0] : memref<2x576xbf16, #tpu.memory_space<vmem>>, vector<2x576xbf16>
    %c0_1 = arith.constant 0 : index
    %c0_2 = arith.constant 0 : index
    %1 = vector.load %arg2[%c0_1, %c0_2] : memref<576x128xbf16, #tpu.memory_space<vmem>>, vector<576x128xbf16>
    %cst = arith.constant dense<0.000000e+00> : vector<2x128xf32>
    %2 = tpu.matmul %0, %1, %cst {dimension_numbers = #tpu.dot_dimension_numbers<[1], [0], [0], [1], [0, 0, 1, 1], [], []>} : vector<2x576xbf16>, vector<576x128xbf16>, vector<2x128xf32> -> vector<2x128xf32>
    %c0_3 = arith.constant 0 : index
    %c0_4 = arith.constant 0 : index
    %3 = vector.load %arg3[%c0_3, %c0_4] : memref<1x128xf32, #tpu.memory_space<vmem>>, vector<1x128xf32>
    %4 = vector.broadcast %3 : vector<1x128xf32> to vector<2x128xf32>
    %5 = arith.addf %2, %4 : vector<2x128xf32>
    %cst_5 = arith.constant 0.000000e+00 : f32
    %6 = vector.broadcast %cst_5 : f32 to vector<2x128xf32>
    %7 = arith.maximumf %5, %6 : vector<2x128xf32>
    %8 = arith.truncf %7 : vector<2x128xf32> to vector<2x128xbf16>
    %c0_6 = arith.constant 0 : index
    %c0_7 = arith.constant 0 : index
    %9 = vector.load %arg4[%c0_6, %c0_7] : memref<2x128xbf16, #tpu.memory_space<vmem>>, vector<2x128xbf16>
    tpu.vector_store %arg4[%c0_6, %c0_7], %8 {strides = array<i32>} : memref<2x128xbf16, #tpu.memory_space<vmem>>, vector<2x128xbf16>,
    return
  }
  func.func @transform_0(%arg0: i32) -> (i32, i32) {
    %c0_i32 = arith.constant 0 : i32
    %c0_i32_0 = arith.constant 0 : i32
    return %arg0, %c0_i32 : i32, i32
  }
  func.func @transform_1(%arg0: i32) -> (i32, i32) {
    %c0_i32 = arith.constant 0 : i32
    %c0_i32_0 = arith.constant 0 : i32
    %c0_i32_1 = arith.constant 0 : i32
    return %c0_i32, %c0_i32_0 : i32, i32
  }
  func.func @transform_2(%arg0: i32) -> (i32, i32) {
    %c0_i32 = arith.constant 0 : i32
    %c0_i32_0 = arith.constant 0 : i32
    %c0_i32_1 = arith.constant 0 : i32
    return %c0_i32, %c0_i32_0 : i32, i32
  }
  func.func @transform_3(%arg0: i32) -> (i32, i32) {
    %c0_i32 = arith.constant 0 : i32
    %c0_i32_0 = arith.constant 0 : i32
    return %arg0, %c0_i32 : i32, i32
  }
}

module attributes {stable_mosaic.version = 11 : i64} {
  func.func @_mm_res_relu_kernel(%arg0: i32, %arg1: memref<2x576xbf16, #tpu.memory_space<vmem>>, %arg2: memref<576x128xbf16, #tpu.memory_space<vmem>>, %arg3: memref<1x128xf32, #tpu.memory_space<vmem>>, %arg4: memref<2x128xbf16, #tpu.memory_space<vmem>>, %arg5: memref<2x128xbf16, #tpu.memory_space<vmem>>) attributes {dimension_semantics = [#tpu.dimension_semantics<parallel>], iteration_bounds = array<i64: 1>, scalar_prefetch = 0 : i64, scratch_operands = 0 : i64, tpu.core_type = #tpu.core_type<tc>, window_params = [{transform_indices = @transform_0, window_bounds = array<i64: 2, 576>}, {pipeline_mode = #tpu.pipeline_mode<synchronous>, transform_indices = @transform_1, window_bounds = array<i64: 576, 128>}, {pipeline_mode = #tpu.pipeline_mode<synchronous>, transform_indices = @transform_2, window_bounds = array<i64: 1, 128>}, {transform_indices = @transform_3, window_bounds = array<i64: 2, 128>}, {transform_indices = @transform_4, window_bounds = array<i64: 2, 128>}]} {
    %c0 = arith.constant 0 : index
    %c0_0 = arith.constant 0 : index
    %0 = vector.load %arg1[%c0, %c0_0] : memref<2x576xbf16, #tpu.memory_space<vmem>>, vector<2x576xbf16>
    %c0_1 = arith.constant 0 : index
    %c0_2 = arith.constant 0 : index
    %1 = vector.load %arg2[%c0_1, %c0_2] : memref<576x128xbf16, #tpu.memory_space<vmem>>, vector<576x128xbf16>
    %cst = arith.constant dense<0.000000e+00> : vector<2x128xf32>
    %2 = tpu.matmul %0, %1, %cst {dimension_numbers = #tpu.dot_dimension_numbers<[1], [0], [0], [1], [0, 0, 1, 1], [], []>} : vector<2x576xbf16>, vector<576x128xbf16>, vector<2x128xf32> -> vector<2x128xf32>
    %c0_3 = arith.constant 0 : index
    %c0_4 = arith.constant 0 : index
    %3 = vector.load %arg3[%c0_3, %c0_4] : memref<1x128xf32, #tpu.memory_space<vmem>>, vector<1x128xf32>
    %4 = vector.broadcast %3 : vector<1x128xf32> to vector<2x128xf32>
    %5 = arith.addf %2, %4 : vector<2x128xf32>
    %c0_5 = arith.constant 0 : index
    %c0_6 = arith.constant 0 : index
    %6 = vector.load %arg4[%c0_5, %c0_6] : memref<2x128xbf16, #tpu.memory_space<vmem>>, vector<2x128xbf16>
    %7 = arith.extf %6 : vector<2x128xbf16> to vector<2x128xf32>
    %8 = arith.addf %5, %7 : vector<2x128xf32>
    %cst_7 = arith.constant 0.000000e+00 : f32
    %9 = vector.broadcast %cst_7 : f32 to vector<2x128xf32>
    %10 = arith.maximumf %8, %9 : vector<2x128xf32>
    %11 = arith.truncf %10 : vector<2x128xf32> to vector<2x128xbf16>
    %c0_8 = arith.constant 0 : index
    %c0_9 = arith.constant 0 : index
    %12 = vector.load %arg5[%c0_8, %c0_9] : memref<2x128xbf16, #tpu.memory_space<vmem>>, vector<2x128xbf16>
    tpu.vector_store %arg5[%c0_8, %c0_9], %11 {strides = array<i32>} : memref<2x128xbf16, #tpu.memory_space<vmem>>, vector<2x128xbf16>,
    return
  }
  func.func @transform_0(%arg0: i32) -> (i32, i32) {
    %c0_i32 = arith.constant 0 : i32
    %c0_i32_0 = arith.constant 0 : i32
    return %arg0, %c0_i32 : i32, i32
  }
  func.func @transform_1(%arg0: i32) -> (i32, i32) {
    %c0_i32 = arith.constant 0 : i32
    %c0_i32_0 = arith.constant 0 : i32
    %c0_i32_1 = arith.constant 0 : i32
    return %c0_i32, %c0_i32_0 : i32, i32
  }
  func.func @transform_2(%arg0: i32) -> (i32, i32) {
    %c0_i32 = arith.constant 0 : i32
    %c0_i32_0 = arith.constant 0 : i32
    %c0_i32_1 = arith.constant 0 : i32
    return %c0_i32, %c0_i32_0 : i32, i32
  }
  func.func @transform_3(%arg0: i32) -> (i32, i32) {
    %c0_i32 = arith.constant 0 : i32
    %c0_i32_0 = arith.constant 0 : i32
    return %arg0, %c0_i32 : i32, i32
  }
  func.func @transform_4(%arg0: i32) -> (i32, i32) {
    %c0_i32 = arith.constant 0 : i32
    %c0_i32_0 = arith.constant 0 : i32
    return %arg0, %c0_i32 : i32, i32
  }
}

module attributes {stable_mosaic.version = 11 : i64} {
  func.func @_gap_fc_kernel(%arg0: i32, %arg1: memref<2x1x64xbf16, #tpu.memory_space<vmem>>, %arg2: memref<64x128xbf16, #tpu.memory_space<vmem>>, %arg3: memref<1x128xf32, #tpu.memory_space<vmem>>, %arg4: memref<2x128xf32, #tpu.memory_space<vmem>>, %arg5: memref<2x64xf32, #tpu.memory_space<vmem>>) attributes {dimension_semantics = [#tpu.dimension_semantics<arbitrary>], iteration_bounds = array<i64: 1>, scalar_prefetch = 0 : i64, scratch_operands = 1 : i64, tpu.core_type = #tpu.core_type<tc>, window_params = [{transform_indices = @transform_0, window_bounds = array<i64: 2, 1, 64>}, {pipeline_mode = #tpu.pipeline_mode<synchronous>, transform_indices = @transform_1, window_bounds = array<i64: 64, 128>}, {pipeline_mode = #tpu.pipeline_mode<synchronous>, transform_indices = @transform_2, window_bounds = array<i64: 1, 128>}, {pipeline_mode = #tpu.pipeline_mode<synchronous>, transform_indices = @transform_3, window_bounds = array<i64: 2, 128>}]} {
    %c0_i32 = arith.constant 0 : i32
    %0 = arith.cmpi eq, %arg0, %c0_i32 : i32
    %1 = arith.extui %0 : i1 to i32
    %c0_i32_0 = arith.constant 0 : i32
    %2 = arith.cmpi ne, %1, %c0_i32_0 : i32
    scf.if %2 {
      %cst_9 = arith.constant 0.000000e+00 : f32
      %12 = vector.broadcast %cst_9 : f32 to vector<2x64xf32>
      %c0_10 = arith.constant 0 : index
      %c0_11 = arith.constant 0 : index
      %13 = vector.load %arg5[%c0_10, %c0_11] : memref<2x64xf32, #tpu.memory_space<vmem>>, vector<2x64xf32>
      tpu.vector_store %arg5[%c0_10, %c0_11], %12 {strides = array<i32>} : memref<2x64xf32, #tpu.memory_space<vmem>>, vector<2x64xf32>,
    } else {
    }
    %c0 = arith.constant 0 : index
    %c0_1 = arith.constant 0 : index
    %3 = vector.load %arg5[%c0, %c0_1] : memref<2x64xf32, #tpu.memory_space<vmem>>, vector<2x64xf32>
    %c0_2 = arith.constant 0 : index
    %c0_3 = arith.constant 0 : index
    %c0_4 = arith.constant 0 : index
    %4 = vector.load %arg1[%c0_2, %c0_3, %c0_4] : memref<2x1x64xbf16, #tpu.memory_space<vmem>>, vector<2x1x64xbf16>
    %5 = arith.extf %4 : vector<2x1x64xbf16> to vector<2x1x64xf32>
    %cst = arith.constant dense<0.000000e+00> : vector<2x64xf32>
    %6 = vector.multi_reduction <add>, %5, %cst [1] : vector<2x1x64xf32> to vector<2x64xf32>
    %7 = arith.addf %3, %6 : vector<2x64xf32>
    %c0_5 = arith.constant 0 : index
    %c0_6 = arith.constant 0 : index
    %8 = vector.load %arg5[%c0_5, %c0_6] : memref<2x64xf32, #tpu.memory_space<vmem>>, vector<2x64xf32>
    tpu.vector_store %arg5[%c0_5, %c0_6], %7 {strides = array<i32>} : memref<2x64xf32, #tpu.memory_space<vmem>>, vector<2x64xf32>,
    %c0_i32_7 = arith.constant 0 : i32
    %9 = arith.cmpi eq, %arg0, %c0_i32_7 : i32
    %10 = arith.extui %9 : i1 to i32
    %c0_i32_8 = arith.constant 0 : i32
    %11 = arith.cmpi ne, %10, %c0_i32_8 : i32
    scf.if %11 {
      %c0_9 = arith.constant 0 : index
      %c0_10 = arith.constant 0 : index
      %12 = vector.load %arg5[%c0_9, %c0_10] : memref<2x64xf32, #tpu.memory_space<vmem>>, vector<2x64xf32>
      %cst_11 = arith.constant 1.000000e+00 : f32
      %13 = vector.broadcast %cst_11 : f32 to vector<2x64xf32>
      %14 = arith.mulf %12, %13 : vector<2x64xf32>
      %15 = arith.truncf %14 : vector<2x64xf32> to vector<2x64xbf16>
      %c0_12 = arith.constant 0 : index
      %c0_13 = arith.constant 0 : index
      %16 = vector.load %arg2[%c0_12, %c0_13] : memref<64x128xbf16, #tpu.memory_space<vmem>>, vector<64x128xbf16>
      %cst_14 = arith.constant dense<0.000000e+00> : vector<2x128xf32>
      %17 = tpu.matmul %15, %16, %cst_14 {dimension_numbers = #tpu.dot_dimension_numbers<[1], [0], [0], [1], [0, 0, 1, 1], [], []>} : vector<2x64xbf16>, vector<64x128xbf16>, vector<2x128xf32> -> vector<2x128xf32>
      %c0_15 = arith.constant 0 : index
      %c0_16 = arith.constant 0 : index
      %18 = vector.load %arg3[%c0_15, %c0_16] : memref<1x128xf32, #tpu.memory_space<vmem>>, vector<1x128xf32>
      %19 = vector.broadcast %18 : vector<1x128xf32> to vector<2x128xf32>
      %20 = arith.addf %17, %19 : vector<2x128xf32>
      %c0_17 = arith.constant 0 : index
      %c0_18 = arith.constant 0 : index
      %21 = vector.load %arg4[%c0_17, %c0_18] : memref<2x128xf32, #tpu.memory_space<vmem>>, vector<2x128xf32>
      tpu.vector_store %arg4[%c0_17, %c0_18], %20 {strides = array<i32>} : memref<2x128xf32, #tpu.memory_space<vmem>>, vector<2x128xf32>,
    } else {
    }
    return
  }
  func.func @transform_0(%arg0: i32) -> (i32, i32, i32) {
    %c0_i32 = arith.constant 0 : i32
    %c0_i32_0 = arith.constant 0 : i32
    %c0_i32_1 = arith.constant 0 : i32
    return %c0_i32, %arg0, %c0_i32_0 : i32, i32, i32
  }
  func.func @transform_1(%arg0: i32) -> (i32, i32) {
    %c0_i32 = arith.constant 0 : i32
    %c0_i32_0 = arith.constant 0 : i32
    %c0_i32_1 = arith.constant 0 : i32
    return %c0_i32, %c0_i32_0 : i32, i32
  }
  func.func @transform_2(%arg0: i32) -> (i32, i32) {
    %c0_i32 = arith.constant 0 : i32
    %c0_i32_0 = arith.constant 0 : i32
    %c0_i32_1 = arith.constant 0 : i32
    return %c0_i32, %c0_i32_0 : i32, i32
  }
  func.func @transform_3(%arg0: i32) -> (i32, i32) {
    %c0_i32 = arith.constant 0 : i32
    %c0_i32_0 = arith.constant 0 : i32
    %c0_i32_1 = arith.constant 0 : i32
    return %c0_i32, %c0_i32_0 : i32, i32
  }
}

</mosaic_0001>

<bundles_post_ra>
// kernel: my_resnet_forward.19
= control target key start
LH: loop header
LB: loop body
LE: loop exit
PB: predicated region body
PF: predicated region fallthrough
CT: control target
= control target key end

     0   :  { %s1198_s12 = smov 0   ;;  %s1392_s0 = inlined_call_operand.vmem [shape: bf16[512,147], index: 0, kind: input, shape index: {}]   ;;  %s1393_s1 = inlined_call_operand.vmem [shape: bf16[147,128], index: 1, kind: input, shape index: {}]   ;;  %s1394_s2 = inlined_call_operand.vmem [shape: f32[1,128], index: 2, kind: input, shape index: {}]   ;;  %s1395_s3 = inlined_call_operand.vmem [shape: bf16[512,128], index: 3, kind: output, shape index: {}]  }
   0x1 LB: > { %s820_s13 = sadd.s32 4294967295, %s1175_s12   ;;  %p824_p0 = scmp.ge.s32.totalorder %s1175_s12, 1  ;;  %s1175_s12 = sphi %s1198_s12, %s13_s12  }
   0x2   : > { %p139_p1 = scmp.lt.s32.totalorder %s1175_s12, 3 }
   0x4   : > { %p140_p2 = pnand %p824_p0, %p139_p1 }
   0x5   : > { %s825_s18 = sshll.u32 (!%p140_p2), %s820_s13, 5 }
   0x6   : > { %143 = sbr.rel (%p140_p2) target bundleno = 304 (0x130), region = 32  ;;  %p165_p3 = scmp.lt.s32.totalorder (!%p140_p2), %s825_s18, 63 }
   0xb   : > { %v1052_v0 = vld [vmem:[%s1393_s1 + $0x38] sm:$0xff]  ;;  %v228_v1 = vld [vmem:[%s1393_s1 + $0x48] sm:$0x3]  ;;  %vm483_vm0 = vcmask 1040384   ;;  %vm484_vm1 = vcmask 1041408   ;;  %v1051_v3 = vld [vmem:[%s1393_s1 + $0x30] sm:$0xff] }
   0xc   : > { %v414_v2 = vunpack.c.l.b16 %v228_v1  ;;  %490 = vmatpush.bf16.msra.mxu0 %v1052_v0  ;;  %1149 = vmatpush.bf16.msra.mxu2 %v1052_v0  ;;  %v1177_v4 = vmov 65535   ;;  %s1397_s18 = smov (!%p165_p3, %s825_s18), 63  ;;  %v1050_v9 = vld [vmem:[%s1393_s1 + $0x28] sm:$0xff]  ;;  %v1053_v10 = vld [vmem:[%s1393_s1 + $0x40] sm:$0xff]  ;;  %vm434_vm2 = vcmask 154624   ;;  %v1048_v18 = vld [vmem:[%s1393_s1 + $0x18] sm:$0xff] }
   0xd   : > { %v485_v5 = vsel %vm483_vm0, 4294967295, %v1177_v4  ;;  %s1012_s23 = sshll.u32 %s1397_s18, 3  ;;  %v1049_v14 = vld [vmem:[%s1393_s1 + $0x20] sm:$0xff]  ;;  %v1047_v19 = vld [vmem:[%s1393_s1 + $0x10] sm:$0xff]  ;;  %v1046_v20 = vld [vmem:[%s1393_s1 + $0x8] sm:$0xff]  ;;  %s829_s15 = sshll.u32 %s1397_s18, 2 }
   0xe   : > { %v424_v6 = vpack.c.b16 %v414_v2, %v414_v2  ;;  %v486_v7 = vsel %vm484_vm1, %v485_v5, 0  ;;  %s1227_s28 = scalar_lea.vmem %s1392_s0, %s1012_s23  ;;  %v1045_v26 = vld [vmem:[%s1393_s1] sm:$0xff]  ;;  %s1337_s19 = scalar_lea.vmem %s1395_s3, %s829_s15 }
   0xf   : > { %v1013_v11 = vld [vmem:[%s1227_s28 + $0x4] sm:$0xf]  ;;  %v834_v12 = vld [vmem:[%s1227_s28 + $0x8] sm:$0xf0]  ;;  %v1031_v15 = vld [vmem:[%s1227_s28 + $0x94] sm:$0xf] }
  0x10   : > { %v488_v8 = vand.u32 %v486_v7, %v424_v6  ;;  %491 = vmatpush.bf16.msra.mxu0 %v1051_v3  ;;  %1150 = vmatpush.bf16.msra.mxu2 %v1051_v3  ;;  %v837_v13 = vor.u32 %v1013_v11, %v834_v12  ;;  %v906_v16 = vld [vmem:[%s1227_s28 + $0x98] sm:$0xf0]  ;;  %v1015_v21 = vld [vmem:[%s1227_s28 + $0x14] sm:$0xf]  ;;  %v1033_v23 = vld [vmem:[%s1227_s28 + $0xa4] sm:$0xf] }
  0x11   : > { %v909_v17 = vor.u32 %v1031_v15, %v906_v16  ;;  %v842_v22 = vld [vmem:[%s1227_s28 + $0x18] sm:$0xf0]  ;;  %v914_v24 = vld [vmem:[%s1227_s28 + $0xa8] sm:$0xf0]  ;;  %v832_v27 = vld [vmem:[%s1227_s28] sm:$0xf] }
  0x12   : > { %585 = vmatpush.bf16.msra.mxu1 %v488_v8  ;;  %1157 = vmatpush.bf16.msra.mxu3 %v488_v8  ;;  %v845_v25 = vor.u32 %v1015_v21, %v842_v22  ;;  %v1014_v28 = vld [vmem:[%s1227_s28 + $0x4] sm:$0xf0]  ;;  %v896_v29 = vld [vmem:[%s1227_s28 + $0x80] sm:$0xf]  ;;  %v917_v31 = vor.u32 %v1033_v23, %v914_v24  ;;  %v1017_v34 = vld [vmem:[%s1227_s28 + $0x24] sm:$0xf] }
  0x13   : > { %v1030_v30 = vld [vmem:[%s1227_s28 + $0x84] sm:$0xf0]  ;;  %v833_v32 = vor.u32 %v1014_v28, %v832_v27  ;;  %v850_v35 = vld [vmem:[%s1227_s28 + $0x28] sm:$0xf0]  ;;  %v1035_v36 = vld [vmem:[%s1227_s28 + $0xb4] sm:$0xf] }
  0x14   : > { %492 = vmatpush.bf16.msra.mxu0 %v1050_v9  ;;  %1151 = vmatpush.bf16.msra.mxu2 %v1050_v9  ;;  %v897_v33 = vor.u32 %v1030_v30, %v896_v29  ;;  %v922_v37 = vld [vmem:[%s1227_s28 + $0xb8] sm:$0xf0]  ;;  %v853_v38 = vor.u32 %v1017_v34, %v850_v35  ;;  %v840_v39 = vld [vmem:[%s1227_s28 + $0x10] sm:$0xf]  ;;  %v1016_v40 = vld [vmem:[%s1227_s28 + $0x14] sm:$0xf0] }
  0x15   : > { %v904_v41 = vld [vmem:[%s1227_s28 + $0x90] sm:$0xf]  ;;  %v1032_v42 = vld [vmem:[%s1227_s28 + $0x94] sm:$0xf0]  ;;  %v925_v43 = vor.u32 %v1035_v36, %v922_v37  ;;  %v841_v44 = vor.u32 %v1016_v40, %v840_v39  ;;  %v1019_v46 = vld [vmem:[%s1227_s28 + $0x34] sm:$0xf] }
  0x16   : > { %586 = vmatpush.bf16.msra.mxu1 %v1053_v10  ;;  %1158 = vmatpush.bf16.msra.mxu3 %v1053_v10  ;;  %v905_v45 = vor.u32 %v1032_v42, %v904_v41  ;;  %v858_v47 = vld [vmem:[%s1227_s28 + $0x38] sm:$0xf0]  ;;  %v1037_v48 = vld [vmem:[%s1227_s28 + $0xc4] sm:$0xf]  ;;  %v930_v49 = vld [vmem:[%s1227_s28 + $0xc8] sm:$0xf0] }
  0x17   : > { %v861_v50 = vor.u32 %v1019_v46, %v858_v47  ;;  %v848_v51 = vld [vmem:[%s1227_s28 + $0x20] sm:$0xf]  ;;  %v1018_v52 = vld [vmem:[%s1227_s28 + $0x24] sm:$0xf0]  ;;  %v933_v55 = vor.u32 %v1037_v48, %v930_v49  ;;  %v1021_v58 = vld [vmem:[%s1227_s28 + $0x44] sm:$0xf] }
  0x18   : > { %493 = vmatpush.bf16.msra.mxu0 %v1049_v14  ;;  %1152 = vmatpush.bf16.msra.mxu2 %v1049_v14  ;;  %v912_v53 = vld [vmem:[%s1227_s28 + $0xa0] sm:$0xf]  ;;  %v1034_v54 = vld [vmem:[%s1227_s28 + $0xa4] sm:$0xf0]  ;;  %v849_v56 = vor.u32 %v1018_v52, %v848_v51  ;;  %v866_v59 = vld [vmem:[%s1227_s28 + $0x48] sm:$0xf0] }
  0x19   : > { %994 = vmatmul.msk.bf16.vlgmr.msra.gmra.mxu1 %vm434_vm2, %v837_v13  ;;  %1003 = vmatmul.msk.bf16.vlgmr.msra.gmra.mxu3 %vm434_vm2, %v909_v17  ;;  %v913_v57 = vor.u32 %v1034_v54, %v912_v53  ;;  %v1039_v60 = vld [vmem:[%s1227_s28 + $0xd4] sm:$0xf]  ;;  %v938_v61 = vld [vmem:[%s1227_s28 + $0xd8] sm:$0xf0]  ;;  %v869_v62 = vor.u32 %v1021_v58, %v866_v59  ;;  %v856_v63 = vld [vmem:[%s1227_s28 + $0x30] sm:$0xf] }
  0x1a   : > { %v1020_v0 = vld [vmem:[%s1227_s28 + $0x34] sm:$0xf0]  ;;  %v920_v1 = vld [vmem:[%s1227_s28 + $0xb0] sm:$0xf]  ;;  %v941_v3 = vor.u32 %v1039_v60, %v938_v61  ;;  %v1023_v6 = vld [vmem:[%s1227_s28 + $0x54] sm:$0xf] }
  0x1b   : > { %v1036_v2 = vld [vmem:[%s1227_s28 + $0xb4] sm:$0xf0]  ;;  %v857_v4 = vor.u32 %v1020_v0, %v856_v63  ;;  %v874_v7 = vld [vmem:[%s1227_s28 + $0x58] sm:$0xf0]  ;;  %v1041_v8 = vld [vmem:[%s1227_s28 + $0xe4] sm:$0xf] }
  0x1c   : > { %494 = vmatpush.bf16.msra.mxu0 %v1048_v18  ;;  %1153 = vmatpush.bf16.msra.mxu2 %v1048_v18  ;;  %v921_v5 = vor.u32 %v1036_v2, %v920_v1  ;;  %v946_v9 = vld [vmem:[%s1227_s28 + $0xe8] sm:$0xf0]  ;;  %v877_v10 = vor.u32 %v1023_v6, %v874_v7  ;;  %v864_v11 = vld [vmem:[%s1227_s28 + $0x40] sm:$0xf]  ;;  %v1022_v12 = vld [vmem:[%s1227_s28 + $0x44] sm:$0xf0] }
  0x1d   : > { %v928_v13 = vld [vmem:[%s1227_s28 + $0xc0] sm:$0xf]  ;;  %v1038_v14 = vld [vmem:[%s1227_s28 + $0xc4] sm:$0xf0]  ;;  %v949_v15 = vor.u32 %v1041_v8, %v946_v9  ;;  %v865_v16 = vor.u32 %v1022_v12, %v864_v11  ;;  %v1025_v18 = vld [vmem:[%s1227_s28 + $0x64] sm:$0xf] }
  0x1e   : > { %v929_v17 = vor.u32 %v1038_v14, %v928_v13  ;;  %v954_v21 = vld [vmem:[%s1227_s28 + $0xf8] sm:$0xf0]  ;;  %v872_v23 = vld [vmem:[%s1227_s28 + $0x50] sm:$0xf]  ;;  %v1024_v24 = vld [vmem:[%s1227_s28 + $0x54] sm:$0xf0] }
  0x1f   : > { %v873_v28 = vor.u32 %v1024_v24, %v872_v23  ;;  %v1027_v30 = vld [vmem:[%s1227_s28 + $0x74] sm:$0xf]  ;;  %v1026_v34 = vld [vmem:[%s1227_s28 + $0x64] sm:$0xf0]  ;;  %v944_v35 = vld [vmem:[%s1227_s28 + $0xe0] sm:$0xf] }
  0x20   : > { %495 = vmatpush.bf16.msra.mxu0 %v1047_v19  ;;  %1154 = vmatpush.bf16.msra.mxu2 %v1047_v19  ;;  %v882_v19 = vld [vmem:[%s1227_s28 + $0x68] sm:$0xf0]  ;;  %v1042_v36 = vld [vmem:[%s1227_s28 + $0xe4] sm:$0xf0]  ;;  %v1029_v39 = vld [vmem:[%s1227_s28 + $0x84] sm:$0xf] }
  0x21   : > { %v885_v22 = vor.u32 %v1025_v18, %v882_v19  ;;  %v898_v40 = vld [vmem:[%s1227_s28 + $0x88] sm:$0xf0]  ;;  %v888_v42 = vld [vmem:[%s1227_s28 + $0x70] sm:$0xf]  ;;  %v1044_v46 = vld [vmem:[%s1227_s28 + $0xf4] sm:$0xf0] }
  0x22   : > { %v901_v41 = vor.u32 %v1029_v39, %v898_v40  ;;  %v1327_v53 = vld [vmem:[%s1394_s2] ss:$0 sm:$0xff] }
  0x24   : > { %496 = vmatpush.bf16.msra.mxu0 %v1046_v20  ;;  %1155 = vmatpush.bf16.msra.mxu2 %v1046_v20  ;;  %v1043_v20 = vld [vmem:[%s1227_s28 + $0xf4] sm:$0xf] }
  0x25   : > { %v957_v27 = vor.u32 %v1043_v20, %v954_v21 }
  0x28   : > { %497 = vmatpush.bf16.msra.mxu0 %v1045_v26  ;;  %1156 = vmatpush.bf16.msra.mxu2 %v1045_v26  ;;  %v1040_v26 = vld [vmem:[%s1227_s28 + $0xd4] sm:$0xf0] }
  0x29   : > { %995 = vmatmul.msk.bf16.gmra.mxu1 %vm434_vm2, %v845_v25  ;;  %1004 = vmatmul.msk.bf16.gmra.mxu3 %vm434_vm2, %v917_v31  ;;  %v936_v25 = vld [vmem:[%s1227_s28 + $0xd0] sm:$0xf]  ;;  %v890_v31 = vld [vmem:[%s1227_s28 + $0x78] sm:$0xf0] }
  0x2a   : > { %v937_v29 = vor.u32 %v1040_v26, %v936_v25 }
  0x2b   : > { %498 = vmatmul.bf16.vlgmr.msra.gmra.mxu0 %v833_v32  ;;  %538 = vmatmul.bf16.vlgmr.msra.gmra.mxu2 %v897_v33  ;;  %v893_v32 = vor.u32 %v1027_v30, %v890_v31  ;;  %v880_v33 = vld [vmem:[%s1227_s28 + $0x60] sm:$0xf] }
  0x2c   : > { %v881_v37 = vor.u32 %v1026_v34, %v880_v33 }
  0x39   : > { %996 = vmatmul.msk.bf16.gmra.mxu1 %vm434_vm2, %v853_v38  ;;  %1005 = vmatmul.msk.bf16.gmra.mxu3 %vm434_vm2, %v925_v43  ;;  %v945_v38 = vor.u32 %v1042_v36, %v944_v35  ;;  %v1028_v43 = vld [vmem:[%s1227_s28 + $0x74] sm:$0xf0] }
  0x3a   : > { %v889_v47 = vor.u32 %v1028_v43, %v888_v42 }
  0x3b   : > { %503 = vmatmul.bf16.gmra.mxu0 %v841_v44  ;;  %543 = vmatmul.bf16.gmra.mxu2 %v905_v45  ;;  %v952_v45 = vld [vmem:[%s1227_s28 + $0xf0] sm:$0xf] }
  0x3c   : > { %v953_v48 = vor.u32 %v1044_v46, %v952_v45 }
  0x49   : > { %997 = vmatmul.msk.bf16.gmra.mxu1 %vm434_vm2, %v861_v50  ;;  %1006 = vmatmul.msk.bf16.gmra.mxu3 %vm434_vm2, %v933_v55 }
  0x4b   : > { %508 = vmatmul.bf16.gmra.mxu0 %v849_v56  ;;  %548 = vmatmul.bf16.gmra.mxu2 %v913_v57 }
  0x59   : > { %998 = vmatmul.msk.bf16.gmra.mxu1 %vm434_vm2, %v869_v62  ;;  %1007 = vmatmul.msk.bf16.gmra.mxu3 %vm434_vm2, %v941_v3 }
  0x5b   : > { %513 = vmatmul.bf16.gmra.mxu0 %v857_v4  ;;  %553 = vmatmul.bf16.gmra.mxu2 %v921_v5 }
  0x69   : > { %999 = vmatmul.msk.bf16.gmra.mxu1 %vm434_vm2, %v877_v10  ;;  %1008 = vmatmul.msk.bf16.gmra.mxu3 %vm434_vm2, %v949_v15 }
  0x6b   : > { %518 = vmatmul.bf16.gmra.mxu0 %v865_v16  ;;  %558 = vmatmul.bf16.gmra.mxu2 %v929_v17 }
  0x79   : > { %1000 = vmatmul.msk.bf16.gmra.mxu1 %vm434_vm2, %v885_v22  ;;  %1009 = vmatmul.msk.bf16.gmra.mxu3 %vm434_vm2, %v957_v27 }
  0x7b   : > { %523 = vmatmul.bf16.gmra.mxu0 %v873_v28  ;;  %563 = vmatmul.bf16.gmra.mxu2 %v937_v29 }
  0x89   : > { %1001 = vmatmul.msk.bf16.gmra.mxu1 %vm434_vm2, %v893_v32 }
  0x8b   : > { %528 = vmatmul.bf16.gmra.mxu0 %v881_v37  ;;  %568 = vmatmul.bf16.gmra.mxu2 %v945_v38 }
  0x96   : > { %v588_v44 = vpop.f32.mrf.mxu1 }
  0x99   : > { %1002 = vmatmul.msk.bf16.gmra.mxu1 %vm434_vm2, %v901_v41 }
  0x9b   : > { %533 = vmatmul.bf16.gmra.mxu0 %v889_v47  ;;  %573 = vmatmul.bf16.gmra.mxu2 %v953_v48 }
  0x9c   : > { %v633_v51 = vpop.f32.mrf.mxu3 }
  0x9e   : > { %v590_v49 = vpop.f32.mrf.mxu1 }
  0xa4   : > { %v635_v60 = vpop.f32.mrf.mxu3 }
  0xa6   : > { %v593_v50 = vpop.f32.mrf.mxu1 }
  0xa8   : > { %v499_v52 = vpop.f32.mrf.mxu0 }
  0xa9   : > { %v500_v54 = vadd.f32 %v1327_v53, %v499_v52 }
  0xab   : > { %v589_v58 = vadd.f32 %v588_v44, %v500_v54 }
  0xac   : > { %v638_v4 = vpop.f32.mrf.mxu3 }
  0xad   : > { %v668_v62 = vmax.f32 %v589_v58, 0.0 }
  0xae   : > { %v595_v55 = vpop.f32.mrf.mxu1  ;;  %v1330_v56 = vpop.f32.mrf.mxu2 }
  0xb0   : > { %v501_v57 = vpop.f32.mrf.mxu0 }
  0xb1   : > { %v502_v59 = vadd.f32 %v1327_v53, %v501_v57 }
  0xb3   : > { %v591_v61 = vadd.f32 %v590_v49, %v502_v59 }
  0xb4   : > { %v640_v16 = vpop.f32.mrf.mxu3 }
  0xb5   : > { %v669_v63 = vmax.f32 %v591_v61, 0.0 }
  0xb6   : > { %v598_v0 = vpop.f32.mrf.mxu1  ;;  %v1339_v2 = vpop.f32.mrf.mxu2 }
  0xb7   : > { %v1057_v1 = vpack.c.bf16 %v669_v63, %v668_v62 }
  0xb8   : > { %v504_v3 = vpop.f32.mrf.mxu0 }
  0xb9   : > { %1058 = vst [vmem:[%s1337_s19] sm:$0xff] %v1057_v1   ;;  %v505_v5 = vadd.f32 %v1327_v53, %v504_v3 }
  0xbb   : > { %v594_v9 = vadd.f32 %v593_v50, %v505_v5 }
  0xbc   : > { %v643_v29 = vpop.f32.mrf.mxu3 }
  0xbd   : > { %v670_v13 = vmax.f32 %v594_v9, 0.0 }
  0xbe   : > { %v600_v6 = vpop.f32.mrf.mxu1  ;;  %v544_v7 = vpop.f32.mrf.mxu2 }
  0xbf   : > { %v545_v12 = vadd.f32 %v1327_v53, %v544_v7 }
  0xc0   : > { %v506_v8 = vpop.f32.mrf.mxu0 }
  0xc1   : > { %v507_v10 = vadd.f32 %v1327_v53, %v506_v8  ;;  %v634_v19 = vadd.f32 %v633_v51, %v545_v12 }
  0xc3   : > { %v596_v11 = vadd.f32 %v595_v55, %v507_v10  ;;  %v686_v23 = vmax.f32 %v634_v19, 0.0 }
  0xc4   : > { %v645_v43 = vpop.f32.mrf.mxu3 }
  0xc5   : > { %v671_v14 = vmax.f32 %v596_v11, 0.0 }
  0xc6   : > { %v603_v15 = vpop.f32.mrf.mxu1  ;;  %v546_v18 = vpop.f32.mrf.mxu2 }
  0xc7   : > { %v1062_v17 = vpack.c.bf16 %v671_v14, %v670_v13  ;;  %v547_v20 = vadd.f32 %v1327_v53, %v546_v18 }
  0xc8   : > { %v509_v21 = vpop.f32.mrf.mxu0 }
  0xc9   : > { %1134 = vst [vmem:[%s1337_s19 + $0x8] sm:$0xff] %v1062_v17   ;;  %v636_v22 = vadd.f32 %v635_v60, %v547_v20  ;;  %v510_v25 = vadd.f32 %v1327_v53, %v509_v21 }
  0xcb   : > { %v687_v24 = vmax.f32 %v636_v22, 0.0  ;;  %v599_v31 = vadd.f32 %v598_v0, %v510_v25 }
  0xcc   : > { %v648_v57 = vpop.f32.mrf.mxu3 }
  0xcd   : > { %v1102_v27 = vpack.c.bf16 %v687_v24, %v686_v23  ;;  %v672_v35 = vmax.f32 %v599_v31, 0.0 }
  0xce   : > { %v605_v26 = vpop.f32.mrf.mxu1  ;;  %v549_v28 = vpop.f32.mrf.mxu2 }
  0xcf   : > { %1142 = vst [vmem:[%s1337_s19 + $0x48] sm:$0xff] %v1102_v27   ;;  %v550_v34 = vadd.f32 %v1327_v53, %v549_v28 }
  0xd0   : > { %v511_v30 = vpop.f32.mrf.mxu0 }
  0xd1   : > { %v512_v32 = vadd.f32 %v1327_v53, %v511_v30  ;;  %v639_v40 = vadd.f32 %v638_v4, %v550_v34 }
  0xd3   : > { %v601_v33 = vadd.f32 %v600_v6, %v512_v32  ;;  %v688_v45 = vmax.f32 %v639_v40, 0.0 }
  0xd4   : > { %v650_v9 = vpop.f32.mrf.mxu3 }
  0xd5   : > { %v673_v36 = vmax.f32 %v601_v33, 0.0 }
  0xd6   : > { %v608_v37 = vpop.f32.mrf.mxu1  ;;  %v551_v39 = vpop.f32.mrf.mxu2 }
  0xd7   : > { %v1067_v38 = vpack.c.bf16 %v673_v36, %v672_v35  ;;  %v552_v41 = vadd.f32 %v1327_v53, %v551_v39 }
  0xd8   : > { %v514_v42 = vpop.f32.mrf.mxu0 }
  0xd9   : > { %1135 = vst [vmem:[%s1337_s19 + $0x10] sm:$0xff] %v1067_v38   ;;  %v641_v44 = vadd.f32 %v640_v16, %v552_v41  ;;  %v515_v47 = vadd.f32 %v1327_v53, %v514_v42 }
  0xdb   : > { %v689_v46 = vmax.f32 %v641_v44, 0.0  ;;  %v604_v52 = vadd.f32 %v603_v15, %v515_v47 }
  0xdc   : > { %v653_v22 = vpop.f32.mrf.mxu3 }
  0xdd   : > { %v1107_v49 = vpack.c.bf16 %v689_v46, %v688_v45  ;;  %v674_v59 = vmax.f32 %v604_v52, 0.0 }
  0xde   : > { %v610_v48 = vpop.f32.mrf.mxu1  ;;  %v554_v50 = vpop.f32.mrf.mxu2 }
  0xdf   : > { %1143 = vst [vmem:[%s1337_s19 + $0x50] sm:$0xff] %v1107_v49   ;;  %v555_v58 = vadd.f32 %v1327_v53, %v554_v50 }
  0xe0   : > { %v516_v51 = vpop.f32.mrf.mxu0 }
  0xe1   : > { %v517_v54 = vadd.f32 %v1327_v53, %v516_v51  ;;  %v644_v0 = vadd.f32 %v643_v29, %v555_v58 }
  0xe3   : > { %v606_v55 = vadd.f32 %v605_v26, %v517_v54  ;;  %v690_v5 = vmax.f32 %v644_v0, 0.0 }
  0xe4   : > { %v655_v36 = vpop.f32.mrf.mxu3 }
  0xe5   : > { %v675_v60 = vmax.f32 %v606_v55, 0.0 }
  0xe6   : > { %v613_v61 = vpop.f32.mrf.mxu1  ;;  %v556_v63 = vpop.f32.mrf.mxu2 }
  0xe7   : > { %v1072_v62 = vpack.c.bf16 %v675_v60, %v674_v59  ;;  %v557_v1 = vadd.f32 %v1327_v53, %v556_v63 }
  0xe8   : > { %v519_v3 = vpop.f32.mrf.mxu0 }
  0xe9   : > { %1136 = vst [vmem:[%s1337_s19 + $0x18] sm:$0xff] %v1072_v62   ;;  %v646_v4 = vadd.f32 %v645_v43, %v557_v1  ;;  %v520_v7 = vadd.f32 %v1327_v53, %v519_v3 }
  0xeb   : > { %v691_v6 = vmax.f32 %v646_v4, 0.0  ;;  %v609_v13 = vadd.f32 %v608_v37, %v520_v7 }
  0xed   : > { %v1112_v10 = vpack.c.bf16 %v691_v6, %v690_v5  ;;  %v676_v17 = vmax.f32 %v609_v13, 0.0 }
  0xee   : > { %v615_v8 = vpop.f32.mrf.mxu1  ;;  %v559_v11 = vpop.f32.mrf.mxu2 }
  0xef   : > { %1144 = vst [vmem:[%s1337_s19 + $0x58] sm:$0xff] %v1112_v10   ;;  %v560_v16 = vadd.f32 %v1327_v53, %v559_v11  ;;  %v542_v10 = vadd.f32 %v1327_v53, %v1339_v2 }
  0xf0   : > { %v521_v12 = vpop.f32.mrf.mxu0 }
  0xf1   : > { %v522_v14 = vadd.f32 %v1327_v53, %v521_v12  ;;  %v649_v23 = vadd.f32 %v648_v57, %v560_v16 }
  0xf3   : > { %v611_v15 = vadd.f32 %v610_v48, %v522_v14  ;;  %v692_v27 = vmax.f32 %v649_v23, 0.0  ;;  %v658_v48 = vpop.f32.mrf.mxu3 }
  0xf5   : > { %v677_v18 = vmax.f32 %v611_v15, 0.0 }
  0xf6   : > { %v618_v19 = vpop.f32.mrf.mxu1  ;;  %v561_v21 = vpop.f32.mrf.mxu2 }
  0xf7   : > { %v1077_v20 = vpack.c.bf16 %v677_v18, %v676_v17  ;;  %v562_v24 = vadd.f32 %v1327_v53, %v561_v21 }
  0xf8   : > { %v524_v25 = vpop.f32.mrf.mxu0 }
  0xf9   : > { %1137 = vst [vmem:[%s1337_s19 + $0x20] sm:$0xff] %v1077_v20   ;;  %v651_v26 = vadd.f32 %v650_v9, %v562_v24  ;;  %v525_v29 = vadd.f32 %v1327_v53, %v524_v25 }
  0xfb   : > { %v693_v28 = vmax.f32 %v651_v26, 0.0  ;;  %v614_v34 = vadd.f32 %v613_v61, %v525_v29  ;;  %v660_v0 = vpop.f32.mrf.mxu3 }
  0xfd   : > { %v1117_v31 = vpack.c.bf16 %v693_v28, %v692_v27  ;;  %v678_v39 = vmax.f32 %v614_v34, 0.0 }
  0xfe   : > { %v620_v30 = vpop.f32.mrf.mxu1  ;;  %v564_v32 = vpop.f32.mrf.mxu2 }
  0xff   : > { %1145 = vst [vmem:[%s1337_s19 + $0x60] sm:$0xff] %v1117_v31   ;;  %v565_v38 = vadd.f32 %v1327_v53, %v564_v32 }
 0x100   : > { %v526_v33 = vpop.f32.mrf.mxu0 }
 0x101   : > { %v527_v35 = vadd.f32 %v1327_v53, %v526_v33  ;;  %v654_v44 = vadd.f32 %v653_v22, %v565_v38 }
 0x103   : > { %v616_v37 = vadd.f32 %v615_v8, %v527_v35  ;;  %v694_v49 = vmax.f32 %v654_v44, 0.0  ;;  %v540_v8 = vadd.f32 %v1327_v53, %v1330_v56  ;;  %v663_v18 = vpop.f32.mrf.mxu3 }
 0x105   : > { %v679_v40 = vmax.f32 %v616_v37, 0.0 }
 0x106   : > { %v623_v41 = vpop.f32.mrf.mxu1  ;;  %v566_v43 = vpop.f32.mrf.mxu2 }
 0x107   : > { %v1082_v42 = vpack.c.bf16 %v679_v40, %v678_v39  ;;  %v567_v45 = vadd.f32 %v1327_v53, %v566_v43 }
 0x108   : > { %v529_v46 = vpop.f32.mrf.mxu0 }
 0x109   : > { %1138 = vst [vmem:[%s1337_s19 + $0x28] sm:$0xff] %v1082_v42   ;;  %v656_v47 = vadd.f32 %v655_v36, %v567_v45  ;;  %v530_v51 = vadd.f32 %v1327_v53, %v529_v46 }
 0x10b   : > { %v695_v50 = vmax.f32 %v656_v47, 0.0  ;;  %v619_v58 = vadd.f32 %v618_v19, %v530_v51  ;;  %v665_v32 = vpop.f32.mrf.mxu3 }
 0x10d   : > { %v1122_v54 = vpack.c.bf16 %v695_v50, %v694_v49  ;;  %v680_v62 = vmax.f32 %v619_v58, 0.0 }
 0x10e   : > { %v625_v52 = vpop.f32.mrf.mxu1  ;;  %v569_v55 = vpop.f32.mrf.mxu2 }
 0x10f   : > { %1146 = vst [vmem:[%s1337_s19 + $0x68] sm:$0xff] %v1122_v54   ;;  %v570_v61 = vadd.f32 %v1327_v53, %v569_v55 }
 0x110   : > { %v531_v57 = vpop.f32.mrf.mxu0 }
 0x111   : > { %v532_v59 = vadd.f32 %v1327_v53, %v531_v57  ;;  %v659_v5 = vadd.f32 %v658_v48, %v570_v61 }
 0x113   : > { %v621_v60 = vadd.f32 %v620_v30, %v532_v59  ;;  %v696_v11 = vmax.f32 %v659_v5, 0.0 }
 0x115   : > { %v681_v63 = vmax.f32 %v621_v60, 0.0 }
 0x116   : > { %v628_v1 = vpop.f32.mrf.mxu1  ;;  %v571_v4 = vpop.f32.mrf.mxu2 }
 0x117   : > { %v1087_v3 = vpack.c.bf16 %v681_v63, %v680_v62  ;;  %v572_v6 = vadd.f32 %v1327_v53, %v571_v4  ;;  %v629_v12 = vadd.f32 %v628_v1, %v540_v8 }
 0x118   : > { %v534_v7 = vpop.f32.mrf.mxu0 }
 0x119   : > { %1139 = vst [vmem:[%s1337_s19 + $0x30] sm:$0xff] %v1087_v3   ;;  %v661_v9 = vadd.f32 %v660_v0, %v572_v6  ;;  %v535_v14 = vadd.f32 %v1327_v53, %v534_v7  ;;  %v684_v20 = vmax.f32 %v629_v12, 0.0 }
 0x11b   : > { %v697_v13 = vmax.f32 %v661_v9, 0.0  ;;  %v624_v22 = vadd.f32 %v623_v41, %v535_v14 }
 0x11d   : > { %v1127_v16 = vpack.c.bf16 %v697_v13, %v696_v11  ;;  %v682_v26 = vmax.f32 %v624_v22, 0.0 }
 0x11e   : > { %v630_v15 = vpop.f32.mrf.mxu1  ;;  %v574_v19 = vpop.f32.mrf.mxu2 }
 0x11f   : > { %v631_v17 = vadd.f32 %v630_v15, %v542_v10  ;;  %1147 = vst [vmem:[%s1337_s19 + $0x70] sm:$0xff] %v1127_v16   ;;  %v575_v25 = vadd.f32 %v1327_v53, %v574_v19 }
 0x120   : > { %v536_v56 = vpop.f32.mrf.mxu0 }
 0x121   : > { %v685_v21 = vmax.f32 %v631_v17, 0.0  ;;  %v537_v23 = vadd.f32 %v1327_v53, %v536_v56  ;;  %v664_v30 = vadd.f32 %v663_v18, %v575_v25 }
 0x123   : > { %v1097_v2 = vpack.c.bf16 %v685_v21, %v684_v20  ;;  %v626_v24 = vadd.f32 %v625_v52, %v537_v23  ;;  %v698_v34 = vmax.f32 %v664_v30, 0.0 }
 0x125   : > { %1141 = vst [vmem:[%s1337_s19 + $0x40] sm:$0xff] %v1097_v2   ;;  %v683_v27 = vmax.f32 %v626_v24, 0.0 }
 0x126   : > { %v576_v29 = vpop.f32.mrf.mxu2 }
 0x127   : > { %v1092_v28 = vpack.c.bf16 %v683_v27, %v682_v26  ;;  %v577_v31 = vadd.f32 %v1327_v53, %v576_v29 }
 0x129   : > { %1140 = vst [vmem:[%s1337_s19 + $0x38] sm:$0xff] %v1092_v28   ;;  %v666_v33 = vadd.f32 %v665_v32, %v577_v31 }
 0x12b   : > { %v699_v35 = vmax.f32 %v666_v33, 0.0 }
 0x12d   : > { %v1132_v36 = vpack.c.bf16 %v699_v35, %v698_v34 }
 0x12f   : > { %1148 = vst [vmem:[%s1337_s19 + $0x78] sm:$0xff] %v1132_v36  }
 0x130 PF: > { %s13_s12 = sadd.s32 1, %s1175_s12  }
 0x131   : > { %p10_p4 = scmp.ge.s32.totalorder %s13_s12, 4  }
 0x133   :  { %12 = sbr.rel (!%p10_p4) target bundleno = 1 (0x1), region = 62 }

// kernel: my_resnet_forward.20
= control target key start
LH: loop header
LB: loop body
LE: loop exit
PB: predicated region body
PF: predicated region fallthrough
CT: control target
= control target key end

     0   :  { %s1287_s30 = smov 0   ;;  %s1404_s0 = inlined_call_operand.vmem [shape: bf16[128,128], index: 0, kind: input, shape index: {}]   ;;  %s1405_s1 = inlined_call_operand.vmem [shape: bf16[128,128], index: 1, kind: input, shape index: {}]   ;;  %s1406_s2 = inlined_call_operand.vmem [shape: bf16[128,128], index: 2, kind: input, shape index: {}]   ;;  %s1407_s3 = inlined_call_operand.vmem [shape: bf16[128,128], index: 3, kind: input, shape index: {}]   ;;  %s1408_s4 = inlined_call_operand.vmem [shape: bf16[128,128], index: 4, kind: input, shape index: {}]   ;;  %s1409_s5 = inlined_call_operand.vmem [shape: bf16[128,128], index: 5, kind: input, shape index: {}]   ;;  %s1410_s6 = inlined_call_operand.vmem [shape: bf16[128,128], index: 6, kind: input, shape index: {}]   ;;  %s1411_s7 = inlined_call_operand.vmem [shape: bf16[128,128], index: 7, kind: input, shape index: {}]   ;;  %s1412_s8 = inlined_call_operand.vmem [shape: bf16[128,128], index: 8, kind: input, shape index: {}]   ;;  %s1413_s9 = inlined_call_operand.vmem [shape: bf16[128,128], index: 9, kind: output, shape index: {}]  }
   0x1 LB: > { %s1000_s10 = sadd.s32 4294967295, %s1235_s30   ;;  %p1004_p0 = scmp.ge.s32.totalorder %s1235_s30, 1  ;;  %s1235_s30 = sphi %s1287_s30, %s19_s30  }
   0x2   : > { %p376_p1 = scmp.lt.s32.totalorder %s1235_s30, 3 }
   0x4   : > { %p377_p2 = pnand %p1004_p0, %p376_p1 }
   0x5   : > { %s1005_s11 = sshll.u32 (!%p377_p2), %s1000_s10, 3 }
   0x6   : > { %380 = sbr.rel (%p377_p2) target bundleno = 60 (0x3c), region = 56  ;;  %p453_p3 = scmp.lt.s32.totalorder (!%p377_p2), %s1005_s11, 15 }
   0xb   : > { %s1415_s11 = smov (!%p453_p3, %s1005_s11), 15 }
   0xc   : > { %s1295_s12 = sshll.u32 %s1415_s11, 2 }
   0xd   : > { %s1301_s15 = scalar_lea.vmem %s1404_s0, %s1295_s12  ;;  %s1307_s18 = scalar_lea.vmem %s1405_s1, %s1295_s12 }
   0xe   : > { %s1313_s21 = scalar_lea.vmem %s1406_s2, %s1295_s12  ;;  %s1319_s24 = scalar_lea.vmem %s1407_s3, %s1295_s12  ;;  %v1028_v0 = vld [vmem:[%s1301_s15] sm:$0xff]   ;;  %v1191_v19 = vld [vmem:[%s1301_s15 + $0x8] sm:$0xff]   ;;  %v1192_v61 = vld [vmem:[%s1301_s15 + $0x10] sm:$0xff]  }
   0xf   : > { %v1044_v1 = vld [vmem:[%s1307_s18] sm:$0xff]   ;;  %s1327_s27 = scalar_lea.vmem %s1408_s4, %s1295_s12  ;;  %s1333_s10 = scalar_lea.vmem %s1409_s5, %s1295_s12  ;;  %v1029_v2 = vunpack.c.l.bf16 %v1028_v0  ;;  %v1030_v3 = vunpack.c.h.bf16 %v1028_v0  ;;  %v1194_v25 = vld [vmem:[%s1307_s18 + $0x8] sm:$0xff]   ;;  %v1033_v34 = vunpack.c.l.bf16 %v1191_v19  ;;  %v1034_v35 = vunpack.c.h.bf16 %v1191_v19 }
  0x10   : > { %v1045_v4 = vunpack.c.l.bf16 %v1044_v1  ;;  %v1046_v5 = vunpack.c.h.bf16 %v1044_v1  ;;  %v1060_v6 = vld [vmem:[%s1313_s21] sm:$0xff]   ;;  %s1341_s14 = scalar_lea.vmem %s1410_s6, %s1295_s12  ;;  %s1347_s19 = scalar_lea.vmem %s1411_s7, %s1295_s12  ;;  %v1197_v30 = vld [vmem:[%s1313_s21 + $0x8] sm:$0xff]   ;;  %v1049_v38 = vunpack.c.l.bf16 %v1194_v25  ;;  %v1050_v39 = vunpack.c.h.bf16 %v1194_v25  ;;  %v1204_v25 = vld [vmem:[%s1327_s27 + $0x10] sm:$0xff]  }
  0x11   : > { %v1076_v7 = vld [vmem:[%s1319_s24] sm:$0xff]   ;;  %v1061_v8 = vunpack.c.l.bf16 %v1060_v6  ;;  %v1062_v9 = vunpack.c.h.bf16 %v1060_v6  ;;  %s1355_s23 = scalar_lea.vmem %s1412_s8, %s1295_s12  ;;  %v1200_v31 = vld [vmem:[%s1319_s24 + $0x8] sm:$0xff]   ;;  %v1065_v42 = vunpack.c.l.bf16 %v1197_v30  ;;  %v1066_v43 = vunpack.c.h.bf16 %v1197_v30  ;;  %v1195_v6 = vld [vmem:[%s1307_s18 + $0x10] sm:$0xff]   ;;  %s1382_s28 = scalar_lea.vmem %s1413_s9, %s1295_s12 }
  0x12   : > { %v1077_v10 = vunpack.c.l.bf16 %v1076_v7  ;;  %v1092_v11 = vld [vmem:[%s1327_s27] sm:$0xff]   ;;  %v544_v13 = vmax.f32 %v1029_v2, %v1045_v4  ;;  %v545_v14 = vmax.f32 %v1030_v3, %v1046_v5  ;;  %v1078_v15 = vunpack.c.h.bf16 %v1076_v7  ;;  %v1203_v40 = vld [vmem:[%s1327_s27 + $0x8] sm:$0xff]   ;;  %v1198_v7 = vld [vmem:[%s1313_s21 + $0x10] sm:$0xff]  }
  0x13   : > { %v1108_v12 = vld [vmem:[%s1333_s10] sm:$0xff]   ;;  %v1093_v16 = vunpack.c.l.bf16 %v1092_v11  ;;  %v1094_v20 = vunpack.c.h.bf16 %v1092_v11  ;;  %v1206_v41 = vld [vmem:[%s1333_s10 + $0x8] sm:$0xff]   ;;  %v1081_v44 = vunpack.c.l.bf16 %v1200_v31  ;;  %v1082_v45 = vunpack.c.h.bf16 %v1200_v31  ;;  %v1207_v30 = vld [vmem:[%s1333_s10 + $0x10] sm:$0xff]  }
  0x14   : > { %v1124_v17 = vld [vmem:[%s1341_s14] sm:$0xff]   ;;  %v1109_v21 = vunpack.c.l.bf16 %v1108_v12  ;;  %v1110_v22 = vunpack.c.h.bf16 %v1108_v12  ;;  %v584_v26 = vmax.f32 %v544_v13, %v1061_v8  ;;  %v585_v27 = vmax.f32 %v545_v14, %v1062_v9  ;;  %v1209_v50 = vld [vmem:[%s1341_s14 + $0x8] sm:$0xff]  }
  0x15   : > { %v1140_v18 = vld [vmem:[%s1347_s19] sm:$0xff]   ;;  %v1125_v23 = vunpack.c.l.bf16 %v1124_v17  ;;  %v1126_v28 = vunpack.c.h.bf16 %v1124_v17  ;;  %v546_v48 = vmax.f32 %v1033_v34, %v1049_v38  ;;  %v547_v49 = vmax.f32 %v1034_v35, %v1050_v39  ;;  %v1212_v51 = vld [vmem:[%s1347_s19 + $0x8] sm:$0xff]   ;;  %v1210_v35 = vld [vmem:[%s1341_s14 + $0x10] sm:$0xff]  }
  0x16   : > { %v1361_v24 = vld [vmem:[%s1355_s23] sm:$0xff]   ;;  %v1141_v29 = vunpack.c.l.bf16 %v1140_v18  ;;  %v1142_v32 = vunpack.c.h.bf16 %v1140_v18  ;;  %v624_v36 = vmax.f32 %v584_v26, %v1077_v10  ;;  %v625_v37 = vmax.f32 %v585_v27, %v1078_v15  ;;  %v1215_v60 = vld [vmem:[%s1355_s23 + $0x8] sm:$0xff]  }
  0x17   : > { %v1157_v33 = vunpack.c.l.bf16 %v1361_v24  ;;  %v1158_v52 = vunpack.c.h.bf16 %v1361_v24  ;;  %v1097_v53 = vunpack.c.l.bf16 %v1203_v40  ;;  %v1098_v54 = vunpack.c.h.bf16 %v1203_v40  ;;  %v1213_v40 = vld [vmem:[%s1347_s19 + $0x10] sm:$0xff]  }
  0x18   : > { %v664_v46 = vmax.f32 %v624_v36, %v1093_v16  ;;  %v665_v47 = vmax.f32 %v625_v37, %v1094_v20  ;;  %v1113_v55 = vunpack.c.l.bf16 %v1206_v41  ;;  %v586_v58 = vmax.f32 %v546_v48, %v1065_v42  ;;  %v1201_v16 = vld [vmem:[%s1319_s24 + $0x10] sm:$0xff]  }
  0x19   : > { %v587_v59 = vmax.f32 %v547_v49, %v1066_v43  ;;  %v1114_v62 = vunpack.c.h.bf16 %v1206_v41  ;;  %v1129_v63 = vunpack.c.l.bf16 %v1209_v50  ;;  %v1130_v0 = vunpack.c.h.bf16 %v1209_v50  ;;  %v1196_v49 = vld [vmem:[%s1307_s18 + $0x18] sm:$0xff]  }
  0x1a   : > { %v704_v56 = vmax.f32 %v664_v46, %v1109_v21  ;;  %v705_v57 = vmax.f32 %v665_v47, %v1110_v22  ;;  %v1145_v1 = vunpack.c.l.bf16 %v1212_v51  ;;  %v626_v4 = vmax.f32 %v586_v58, %v1081_v44  ;;  %v1193_v44 = vld [vmem:[%s1301_s15 + $0x18] sm:$0xff]  }
  0x1b   : > { %v627_v5 = vmax.f32 %v587_v59, %v1082_v45  ;;  %v1146_v8 = vunpack.c.h.bf16 %v1212_v51  ;;  %v1161_v9 = vunpack.c.l.bf16 %v1215_v60  ;;  %v1037_v10 = vunpack.c.l.bf16 %v1192_v61  ;;  %v1202_v59 = vld [vmem:[%s1319_s24 + $0x18] sm:$0xff]  }
  0x1c   : > { %v744_v2 = vmax.f32 %v704_v56, %v1125_v23  ;;  %v745_v3 = vmax.f32 %v705_v57, %v1126_v28  ;;  %v1038_v11 = vunpack.c.h.bf16 %v1192_v61  ;;  %v666_v14 = vmax.f32 %v626_v4, %v1097_v53  ;;  %v1216_v61 = vld [vmem:[%s1355_s23 + $0x10] sm:$0xff]  }
  0x1d   : > { %v667_v15 = vmax.f32 %v627_v5, %v1098_v54  ;;  %v1053_v17 = vunpack.c.l.bf16 %v1195_v6  ;;  %v1054_v18 = vunpack.c.h.bf16 %v1195_v6  ;;  %v1069_v19 = vunpack.c.l.bf16 %v1198_v7  ;;  %v1199_v54 = vld [vmem:[%s1313_s21 + $0x18] sm:$0xff]  }
  0x1e   : > { %v784_v12 = vmax.f32 %v744_v2, %v1141_v29  ;;  %v785_v13 = vmax.f32 %v745_v3, %v1142_v32  ;;  %v1070_v20 = vunpack.c.h.bf16 %v1198_v7  ;;  %v706_v23 = vmax.f32 %v666_v14, %v1113_v55  ;;  %v1205_v5 = vld [vmem:[%s1327_s27 + $0x18] sm:$0xff]  }
  0x1f   : > { %v707_v24 = vmax.f32 %v667_v15, %v1114_v62  ;;  %v548_v26 = vmax.f32 %v1037_v10, %v1053_v17  ;;  %v549_v27 = vmax.f32 %v1038_v11, %v1054_v18  ;;  %v1085_v28 = vunpack.c.l.bf16 %v1201_v16  ;;  %v1208_v14 = vld [vmem:[%s1333_s10 + $0x18] sm:$0xff]  }
  0x20   : > { %v824_v21 = vmax.f32 %v784_v12, %v1157_v33  ;;  %v825_v22 = vmax.f32 %v785_v13, %v1158_v52  ;;  %v1086_v29 = vunpack.c.h.bf16 %v1201_v16  ;;  %v746_v32 = vmax.f32 %v706_v23, %v1129_v63 }
  0x21   : > { %v747_v33 = vmax.f32 %v707_v24, %v1130_v0  ;;  %v1162_v34 = vunpack.c.h.bf16 %v1215_v60  ;;  %v588_v36 = vmax.f32 %v548_v26, %v1069_v19  ;;  %v589_v37 = vmax.f32 %v549_v27, %v1070_v20 }
  0x22   : > { %v1174_v31 = vpack.c.bf16 %v825_v22, %v824_v21  ;;  %v1101_v38 = vunpack.c.l.bf16 %v1204_v25  ;;  %v1102_v39 = vunpack.c.h.bf16 %v1204_v25  ;;  %v786_v41 = vmax.f32 %v746_v32, %v1145_v1  ;;  %v1211_v21 = vld [vmem:[%s1341_s14 + $0x18] sm:$0xff]  }
  0x23   : > { %v787_v42 = vmax.f32 %v747_v33, %v1146_v8  ;;  %v1117_v43 = vunpack.c.l.bf16 %v1207_v30  ;;  %v628_v45 = vmax.f32 %v588_v36, %v1085_v28  ;;  %v629_v46 = vmax.f32 %v589_v37, %v1086_v29  ;;  %v1214_v28 = vld [vmem:[%s1347_s19 + $0x18] sm:$0xff]  }
  0x24   : > { %1175 = vst [vmem:[%s1382_s28] sm:$0xff] %v1174_v31   ;;  %v1118_v47 = vunpack.c.h.bf16 %v1207_v30  ;;  %v1133_v48 = vunpack.c.l.bf16 %v1210_v35  ;;  %v826_v50 = vmax.f32 %v786_v41, %v1161_v9  ;;  %v1134_v52 = vunpack.c.h.bf16 %v1210_v35 }
  0x25   : > { %v827_v51 = vmax.f32 %v787_v42, %v1162_v34  ;;  %v1149_v53 = vunpack.c.l.bf16 %v1213_v40  ;;  %v668_v55 = vmax.f32 %v628_v45, %v1101_v38  ;;  %v669_v56 = vmax.f32 %v629_v46, %v1102_v39  ;;  %v1217_v34 = vld [vmem:[%s1355_s23 + $0x18] sm:$0xff]  }
  0x26   : > { %v1150_v57 = vunpack.c.h.bf16 %v1213_v40  ;;  %v1041_v58 = vunpack.c.l.bf16 %v1193_v44  ;;  %v1042_v62 = vunpack.c.h.bf16 %v1193_v44  ;;  %v1057_v63 = vunpack.c.l.bf16 %v1196_v49 }
  0x27   : > { %v1179_v60 = vpack.c.bf16 %v827_v51, %v826_v50  ;;  %v1058_v0 = vunpack.c.h.bf16 %v1196_v49  ;;  %v708_v1 = vmax.f32 %v668_v55, %v1117_v43  ;;  %v709_v2 = vmax.f32 %v669_v56, %v1118_v47 }
  0x28   : > { %v1073_v3 = vunpack.c.l.bf16 %v1199_v54  ;;  %v1074_v4 = vunpack.c.h.bf16 %v1199_v54  ;;  %v550_v6 = vmax.f32 %v1041_v58, %v1057_v63  ;;  %v1089_v8 = vunpack.c.l.bf16 %v1202_v59 }
  0x29   : > { %1218 = vst [vmem:[%s1382_s28 + $0x8] sm:$0xff] %v1179_v60   ;;  %v551_v7 = vmax.f32 %v1042_v62, %v1058_v0  ;;  %v1090_v9 = vunpack.c.h.bf16 %v1202_v59  ;;  %v748_v10 = vmax.f32 %v708_v1, %v1133_v48  ;;  %v749_v11 = vmax.f32 %v709_v2, %v1134_v52 }
  0x2a   : > { %v1165_v12 = vunpack.c.l.bf16 %v1216_v61  ;;  %v1166_v13 = vunpack.c.h.bf16 %v1216_v61  ;;  %v590_v15 = vmax.f32 %v550_v6, %v1073_v3  ;;  %v1105_v17 = vunpack.c.l.bf16 %v1205_v5 }
  0x2b   : > { %v591_v16 = vmax.f32 %v551_v7, %v1074_v4  ;;  %v1106_v18 = vunpack.c.h.bf16 %v1205_v5  ;;  %v788_v19 = vmax.f32 %v748_v10, %v1149_v53  ;;  %v789_v20 = vmax.f32 %v749_v11, %v1150_v57 }
  0x2c   : > { %v630_v22 = vmax.f32 %v590_v15, %v1089_v8  ;;  %v1121_v24 = vunpack.c.l.bf16 %v1208_v14  ;;  %v1122_v25 = vunpack.c.h.bf16 %v1208_v14  ;;  %v1137_v31 = vunpack.c.l.bf16 %v1211_v21 }
  0x2d   : > { %v631_v23 = vmax.f32 %v591_v16, %v1090_v9  ;;  %v828_v26 = vmax.f32 %v788_v19, %v1165_v12  ;;  %v829_v27 = vmax.f32 %v789_v20, %v1166_v13  ;;  %v1138_v32 = vunpack.c.h.bf16 %v1211_v21 }
  0x2e   : > { %v670_v29 = vmax.f32 %v630_v22, %v1105_v17  ;;  %v1153_v37 = vunpack.c.l.bf16 %v1214_v28  ;;  %v1154_v38 = vunpack.c.h.bf16 %v1214_v28  ;;  %v1169_v41 = vunpack.c.l.bf16 %v1217_v34 }
  0x2f   : > { %v671_v30 = vmax.f32 %v631_v23, %v1106_v18  ;;  %v1184_v33 = vpack.c.bf16 %v829_v27, %v828_v26  ;;  %v1170_v42 = vunpack.c.h.bf16 %v1217_v34 }
  0x30   : > { %v710_v35 = vmax.f32 %v670_v29, %v1121_v24 }
  0x31   : > { %v711_v36 = vmax.f32 %v671_v30, %v1122_v25  ;;  %1219 = vst [vmem:[%s1382_s28 + $0x10] sm:$0xff] %v1184_v33  }
  0x32   : > { %v750_v39 = vmax.f32 %v710_v35, %v1137_v31 }
  0x33   : > { %v751_v40 = vmax.f32 %v711_v36, %v1138_v32 }
  0x34   : > { %v790_v43 = vmax.f32 %v750_v39, %v1153_v37 }
  0x35   : > { %v791_v44 = vmax.f32 %v751_v40, %v1154_v38 }
  0x36   : > { %v830_v45 = vmax.f32 %v790_v43, %v1169_v41 }
  0x37   : > { %v831_v46 = vmax.f32 %v791_v44, %v1170_v42 }
  0x39   : > { %v1189_v47 = vpack.c.bf16 %v831_v46, %v830_v45 }
  0x3b   : > { %1220 = vst [vmem:[%s1382_s28 + $0x18] sm:$0xff] %v1189_v47  }
  0x3c PF: > { %s19_s30 = sadd.s32 1, %s1235_s30  }
  0x3d   : > { %p16_p4 = scmp.ge.s32.totalorder %s19_s30, 4  }
  0x3f   :  { %18 = sbr.rel (!%p16_p4) target bundleno = 1 (0x1), region = 110 }

// kernel: my_resnet_forward.21
= control target key start
LH: loop header
LB: loop body
LE: loop exit
PB: predicated region body
PF: predicated region fallthrough
CT: control target
= control target key end

     0   :  { %s499_s12 = smov 0   ;;  %s541_s0 = inlined_call_operand.vmem [shape: bf16[128,72], index: 0, kind: input, shape index: {}]   ;;  %s542_s1 = inlined_call_operand.vmem [shape: bf16[72,128], index: 1, kind: input, shape index: {}]   ;;  %s543_s2 = inlined_call_operand.vmem [shape: f32[1,128], index: 2, kind: input, shape index: {}]   ;;  %s544_s3 = inlined_call_operand.vmem [shape: bf16[128,128], index: 3, kind: output, shape index: {}]  }
   0x1 LB: > { %s369_s13 = sadd.s32 4294967295, %s477_s12   ;;  %p373_p0 = scmp.ge.s32.totalorder %s477_s12, 1  ;;  %s477_s12 = sphi %s499_s12, %s13_s12  }
   0x2   : > { %p138_p1 = scmp.lt.s32.totalorder %s477_s12, 3 }
   0x4   : > { %p139_p2 = pnand %p373_p0, %p138_p1 }
   0x5   : > { %s374_s16 = sshll.u32 (!%p139_p2), %s369_s13, 3 }
   0x6   : > { %142 = sbr.rel (%p139_p2) target bundleno = 185 (0xb9), region = 32  ;;  %p163_p3 = scmp.lt.s32.totalorder (!%p139_p2), %s374_s16, 15 }
   0xb   : > { %v191_v0 = vld [vmem:[%s542_s1 + $0x20] sm:$0xf]  ;;  %vm256_vm0 = vcmask 1043456   ;;  %v423_v4 = vld [vmem:[%s542_s1 + $0x18] sm:$0xff]  ;;  %v422_v5 = vld [vmem:[%s542_s1 + $0x10] sm:$0xff]  ;;  %s546_s16 = smov (!%p163_p3, %s374_s16), 15 }
   0xc   : > { %v233_v1 = vunpack.c.l.b16 %v191_v0  ;;  %v421_v6 = vld [vmem:[%s542_s1 + $0x8] sm:$0xff]  ;;  %s375_s23 = sshll.u32 %s546_s16, 2  ;;  %v420_v7 = vld [vmem:[%s542_s1] sm:$0xff]  ;;  %vm243_vm1 = vcmask 588800  }
   0xd   : > { %s166_s28 = scalar_lea.vmem %s541_s0, %s375_s23  ;;  %v470_v14 = vld [vmem:[%s543_s2] ss:$0 sm:$0xff]  ;;  %s172_s6 = scalar_lea.vmem %s544_s3, %s375_s23 }
   0xe   : > { %v238_v2 = vpack.c.b16 %v233_v1, %v233_v1  ;;  %v416_v8 = vld [vmem:[%s166_s28] sm:$0xff]  ;;  %v417_v9 = vld [vmem:[%s166_s28 + $0x8] sm:$0xff]  ;;  %v418_v10 = vld [vmem:[%s166_s28 + $0x10] sm:$0xff] }
   0xf   : > { %v419_v11 = vld [vmem:[%s166_s28 + $0x18] sm:$0xff] }
  0x10   : > { %v258_v3 = vsel %vm256_vm0, %v238_v2, 0 }
  0x11   : > { %263 = vmatpush.bf16.msra.mxu0 %v258_v3  ;;  %447 = vmatpush.bf16.msra.mxu1 %v258_v3 }
  0x12   : > { %448 = vmatpush.bf16.msra.mxu2 %v258_v3  ;;  %449 = vmatpush.bf16.msra.mxu3 %v258_v3 }
  0x15   : > { %264 = vmatpush.bf16.msra.mxu0 %v423_v4  ;;  %450 = vmatpush.bf16.msra.mxu1 %v423_v4 }
  0x16   : > { %451 = vmatpush.bf16.msra.mxu2 %v423_v4  ;;  %452 = vmatpush.bf16.msra.mxu3 %v423_v4 }
  0x19   : > { %265 = vmatpush.bf16.msra.mxu0 %v422_v5  ;;  %453 = vmatpush.bf16.msra.mxu1 %v422_v5 }
  0x1a   : > { %454 = vmatpush.bf16.msra.mxu2 %v422_v5  ;;  %455 = vmatpush.bf16.msra.mxu3 %v422_v5 }
  0x1d   : > { %266 = vmatpush.bf16.msra.mxu0 %v421_v6  ;;  %456 = vmatpush.bf16.msra.mxu1 %v421_v6 }
  0x1e   : > { %457 = vmatpush.bf16.msra.mxu2 %v421_v6  ;;  %458 = vmatpush.bf16.msra.mxu3 %v421_v6 }
  0x21   : > { %267 = vmatpush.bf16.msra.mxu0 %v420_v7  ;;  %459 = vmatpush.bf16.msra.mxu1 %v420_v7 }
  0x22   : > { %460 = vmatpush.bf16.msra.mxu2 %v420_v7  ;;  %461 = vmatpush.bf16.msra.mxu3 %v420_v7 }
  0x24   : > { %410 = vmatmul.msk.bf16.vlgmr.msra.gmra.mxu0 %vm243_vm1, %v416_v8  ;;  %411 = vmatmul.msk.bf16.vlgmr.msra.gmra.mxu1 %vm243_vm1, %v417_v9 }
  0x25   : > { %412 = vmatmul.msk.bf16.vlgmr.msra.gmra.mxu2 %vm243_vm1, %v418_v10  ;;  %413 = vmatmul.msk.bf16.vlgmr.msra.gmra.mxu3 %vm243_vm1, %v419_v11 }
  0xa1   : > { %v269_v12 = vpop.f32.mrf.mxu0  ;;  %v274_v13 = vpop.f32.mrf.mxu1 }
  0xa2   : > { %v270_v15 = vadd.f32 %v470_v14, %v269_v12  ;;  %v275_v16 = vadd.f32 %v470_v14, %v274_v13 }
  0xa4   : > { %v289_v23 = vmax.f32 %v270_v15, 0.0  ;;  %v291_v24 = vmax.f32 %v275_v16, 0.0 }
  0xa8   : > { %v279_v17 = vpop.f32.mrf.mxu2  ;;  %v284_v18 = vpop.f32.mrf.mxu3 }
  0xa9   : > { %v271_v19 = vpop.f32.mrf.mxu0  ;;  %v276_v20 = vpop.f32.mrf.mxu1  ;;  %v280_v29 = vadd.f32 %v470_v14, %v279_v17  ;;  %v285_v30 = vadd.f32 %v470_v14, %v284_v18 }
  0xaa   : > { %v272_v21 = vadd.f32 %v470_v14, %v271_v19  ;;  %v277_v22 = vadd.f32 %v470_v14, %v276_v20 }
  0xab   : > { %v293_v35 = vmax.f32 %v280_v29, 0.0  ;;  %v295_v36 = vmax.f32 %v285_v30, 0.0 }
  0xac   : > { %v290_v25 = vmax.f32 %v272_v21, 0.0  ;;  %v292_v26 = vmax.f32 %v277_v22, 0.0 }
  0xae   : > { %v427_v27 = vpack.c.bf16 %v290_v25, %v289_v23  ;;  %v432_v28 = vpack.c.bf16 %v292_v26, %v291_v24 }
  0xb0   : > { %428 = vst [vmem:[%s172_s6] sm:$0xff] %v427_v27   ;;  %v281_v31 = vpop.f32.mrf.mxu2  ;;  %v286_v32 = vpop.f32.mrf.mxu3 }
  0xb1   : > { %444 = vst [vmem:[%s172_s6 + $0x8] sm:$0xff] %v432_v28   ;;  %v282_v33 = vadd.f32 %v470_v14, %v281_v31  ;;  %v287_v34 = vadd.f32 %v470_v14, %v286_v32 }
  0xb3   : > { %v294_v37 = vmax.f32 %v282_v33, 0.0  ;;  %v296_v38 = vmax.f32 %v287_v34, 0.0 }
  0xb5   : > { %v437_v39 = vpack.c.bf16 %v294_v37, %v293_v35  ;;  %v442_v40 = vpack.c.bf16 %v296_v38, %v295_v36 }
  0xb7   : > { %445 = vst [vmem:[%s172_s6 + $0x10] sm:$0xff] %v437_v39  }
  0xb8   : > { %446 = vst [vmem:[%s172_s6 + $0x18] sm:$0xff] %v442_v40  }
  0xb9 PF: > { %s13_s12 = sadd.s32 1, %s477_s12  }
  0xba   : > { %p10_p4 = scmp.ge.s32.totalorder %s13_s12, 4  }
  0xbc   :  { %12 = sbr.rel (!%p10_p4) target bundleno = 1 (0x1), region = 62 }

// kernel: my_resnet_forward.22
= control target key start
LH: loop header
LB: loop body
LE: loop exit
PB: predicated region body
PF: predicated region fallthrough
CT: control target
= control target key end

     0   :  { %s610_s15 = smov 0   ;;  %s653_s0 = inlined_call_operand.vmem [shape: bf16[128,72], index: 0, kind: input, shape index: {}]   ;;  %s654_s1 = inlined_call_operand.vmem [shape: bf16[72,128], index: 1, kind: input, shape index: {}]   ;;  %s655_s2 = inlined_call_operand.vmem [shape: f32[1,128], index: 2, kind: input, shape index: {}]   ;;  %s656_s3 = inlined_call_operand.vmem [shape: bf16[128,128], index: 3, kind: input, shape index: {}]   ;;  %s657_s4 = inlined_call_operand.vmem [shape: bf16[128,128], index: 4, kind: output, shape index: {}]  }
   0x1 LB: > { %s454_s16 = sadd.s32 4294967295, %s583_s15   ;;  %p458_p0 = scmp.ge.s32.totalorder %s583_s15, 1  ;;  %s583_s15 = sphi %s610_s15, %s14_s15  }
   0x2   : > { %p174_p1 = scmp.lt.s32.totalorder %s583_s15, 3 }
   0x4   : > { %p175_p2 = pnand %p458_p0, %p174_p1 }
   0x5   : > { %s459_s19 = sshll.u32 (!%p175_p2), %s454_s16, 3 }
   0x6   : > { %178 = sbr.rel (%p175_p2) target bundleno = 187 (0xbb), region = 36  ;;  %p206_p3 = scmp.lt.s32.totalorder (!%p175_p2), %s459_s19, 15 }
   0xb   : > { %v240_v0 = vld [vmem:[%s654_s1 + $0x20] sm:$0xf]  ;;  %vm305_vm0 = vcmask 1043456   ;;  %v510_v4 = vld [vmem:[%s654_s1 + $0x18] sm:$0xff]  ;;  %v509_v5 = vld [vmem:[%s654_s1 + $0x10] sm:$0xff]  ;;  %s659_s19 = smov (!%p206_p3, %s459_s19), 15 }
   0xc   : > { %v282_v1 = vunpack.c.l.b16 %v240_v0  ;;  %v508_v6 = vld [vmem:[%s654_s1 + $0x8] sm:$0xff]  ;;  %s630_s26 = sshll.u32 %s659_s19, 2  ;;  %v507_v7 = vld [vmem:[%s654_s1] sm:$0xff]  ;;  %vm292_vm1 = vcmask 588800  }
   0xd   : > { %s209_s5 = scalar_lea.vmem %s653_s0, %s630_s26  ;;  %s215_s8 = scalar_lea.vmem %s656_s3, %s630_s26  ;;  %v576_v14 = vld [vmem:[%s655_s2] ss:$0 sm:$0xff] }
   0xe   : > { %v287_v2 = vpack.c.b16 %v282_v1, %v282_v1  ;;  %v503_v8 = vld [vmem:[%s209_s5] sm:$0xff]  ;;  %v504_v9 = vld [vmem:[%s209_s5 + $0x8] sm:$0xff]  ;;  %v505_v10 = vld [vmem:[%s209_s5 + $0x10] sm:$0xff]  ;;  %s221_s13 = scalar_lea.vmem %s657_s4, %s630_s26 }
   0xf   : > { %v506_v11 = vld [vmem:[%s209_s5 + $0x18] sm:$0xff]  ;;  %v512_v15 = vld [vmem:[%s215_s8] sm:$0xff]   ;;  %v547_v16 = vld [vmem:[%s215_s8 + $0x8] sm:$0xff]  }
  0x10   : > { %v307_v3 = vsel %vm305_vm0, %v287_v2, 0  ;;  %v513_v18 = vunpack.c.l.bf16 %v512_v15  ;;  %v517_v20 = vunpack.c.l.bf16 %v547_v16  ;;  %v514_v23 = vunpack.c.h.bf16 %v512_v15  ;;  %v548_v29 = vld [vmem:[%s215_s8 + $0x10] sm:$0xff]   ;;  %v549_v30 = vld [vmem:[%s215_s8 + $0x18] sm:$0xff]  }
  0x11   : > { %312 = vmatpush.bf16.msra.mxu0 %v307_v3  ;;  %553 = vmatpush.bf16.msra.mxu1 %v307_v3  ;;  %v518_v24 = vunpack.c.h.bf16 %v547_v16  ;;  %v521_v36 = vunpack.c.l.bf16 %v548_v29  ;;  %v525_v38 = vunpack.c.l.bf16 %v549_v30  ;;  %v522_v43 = vunpack.c.h.bf16 %v548_v29 }
  0x12   : > { %554 = vmatpush.bf16.msra.mxu2 %v307_v3  ;;  %555 = vmatpush.bf16.msra.mxu3 %v307_v3  ;;  %v526_v44 = vunpack.c.h.bf16 %v549_v30 }
  0x15   : > { %313 = vmatpush.bf16.msra.mxu0 %v510_v4  ;;  %556 = vmatpush.bf16.msra.mxu1 %v510_v4 }
  0x16   : > { %557 = vmatpush.bf16.msra.mxu2 %v510_v4  ;;  %558 = vmatpush.bf16.msra.mxu3 %v510_v4 }
  0x19   : > { %314 = vmatpush.bf16.msra.mxu0 %v509_v5  ;;  %559 = vmatpush.bf16.msra.mxu1 %v509_v5 }
  0x1a   : > { %560 = vmatpush.bf16.msra.mxu2 %v509_v5  ;;  %561 = vmatpush.bf16.msra.mxu3 %v509_v5 }
  0x1d   : > { %315 = vmatpush.bf16.msra.mxu0 %v508_v6  ;;  %562 = vmatpush.bf16.msra.mxu1 %v508_v6 }
  0x1e   : > { %563 = vmatpush.bf16.msra.mxu2 %v508_v6  ;;  %564 = vmatpush.bf16.msra.mxu3 %v508_v6 }
  0x21   : > { %316 = vmatpush.bf16.msra.mxu0 %v507_v7  ;;  %565 = vmatpush.bf16.msra.mxu1 %v507_v7 }
  0x22   : > { %566 = vmatpush.bf16.msra.mxu2 %v507_v7  ;;  %567 = vmatpush.bf16.msra.mxu3 %v507_v7 }
  0x24   : > { %497 = vmatmul.msk.bf16.vlgmr.msra.gmra.mxu0 %vm292_vm1, %v503_v8  ;;  %498 = vmatmul.msk.bf16.vlgmr.msra.gmra.mxu1 %vm292_vm1, %v504_v9 }
  0x25   : > { %499 = vmatmul.msk.bf16.vlgmr.msra.gmra.mxu2 %vm292_vm1, %v505_v10  ;;  %500 = vmatmul.msk.bf16.vlgmr.msra.gmra.mxu3 %vm292_vm1, %v506_v11 }
  0xa1   : > { %v318_v12 = vpop.f32.mrf.mxu0  ;;  %v323_v13 = vpop.f32.mrf.mxu1 }
  0xa2   : > { %v319_v17 = vadd.f32 %v576_v14, %v318_v12  ;;  %v324_v19 = vadd.f32 %v576_v14, %v323_v13 }
  0xa4   : > { %v354_v27 = vadd.f32 %v513_v18, %v319_v17  ;;  %v356_v28 = vadd.f32 %v517_v20, %v324_v19 }
  0xa6   : > { %v362_v39 = vmax.f32 %v354_v27, 0.0  ;;  %v364_v40 = vmax.f32 %v356_v28, 0.0 }
  0xa8   : > { %v328_v21 = vpop.f32.mrf.mxu2  ;;  %v333_v22 = vpop.f32.mrf.mxu3 }
  0xa9   : > { %v320_v25 = vpop.f32.mrf.mxu0  ;;  %v325_v26 = vpop.f32.mrf.mxu1  ;;  %v329_v35 = vadd.f32 %v576_v14, %v328_v21  ;;  %v334_v37 = vadd.f32 %v576_v14, %v333_v22 }
  0xaa   : > { %v321_v31 = vadd.f32 %v576_v14, %v320_v25  ;;  %v326_v32 = vadd.f32 %v576_v14, %v325_v26 }
  0xab   : > { %v358_v49 = vadd.f32 %v521_v36, %v329_v35  ;;  %v360_v50 = vadd.f32 %v525_v38, %v334_v37 }
  0xac   : > { %v355_v33 = vadd.f32 %v514_v23, %v321_v31  ;;  %v357_v34 = vadd.f32 %v518_v24, %v326_v32 }
  0xad   : > { %v366_v55 = vmax.f32 %v358_v49, 0.0  ;;  %v368_v56 = vmax.f32 %v360_v50, 0.0 }
  0xae   : > { %v363_v41 = vmax.f32 %v355_v33, 0.0  ;;  %v365_v42 = vmax.f32 %v357_v34, 0.0 }
  0xb0   : > { %v530_v45 = vpack.c.bf16 %v363_v41, %v362_v39  ;;  %v535_v46 = vpack.c.bf16 %v365_v42, %v364_v40  ;;  %v330_v47 = vpop.f32.mrf.mxu2  ;;  %v335_v48 = vpop.f32.mrf.mxu3 }
  0xb1   : > { %v331_v51 = vadd.f32 %v576_v14, %v330_v47  ;;  %v336_v52 = vadd.f32 %v576_v14, %v335_v48 }
  0xb2   : > { %531 = vst [vmem:[%s221_s13] sm:$0xff] %v530_v45  }
  0xb3   : > { %550 = vst [vmem:[%s221_s13 + $0x8] sm:$0xff] %v535_v46   ;;  %v359_v53 = vadd.f32 %v522_v43, %v331_v51  ;;  %v361_v54 = vadd.f32 %v526_v44, %v336_v52 }
  0xb5   : > { %v367_v57 = vmax.f32 %v359_v53, 0.0  ;;  %v369_v58 = vmax.f32 %v361_v54, 0.0 }
  0xb7   : > { %v540_v59 = vpack.c.bf16 %v367_v57, %v366_v55  ;;  %v545_v60 = vpack.c.bf16 %v369_v58, %v368_v56 }
  0xb9   : > { %551 = vst [vmem:[%s221_s13 + $0x10] sm:$0xff] %v540_v59  }
  0xba   : > { %552 = vst [vmem:[%s221_s13 + $0x18] sm:$0xff] %v545_v60  }
  0xbb PF: > { %s14_s15 = sadd.s32 1, %s583_s15  }
  0xbc   : > { %p11_p4 = scmp.ge.s32.totalorder %s14_s15, 4  }
  0xbe   :  { %13 = sbr.rel (!%p11_p4) target bundleno = 1 (0x1), region = 69 }

// kernel: my_resnet_forward.25
= control target key start
LH: loop header
LB: loop body
LE: loop exit
PB: predicated region body
PF: predicated region fallthrough
CT: control target
= control target key end

     0   :  { %s454_s12 = smov 0   ;;  %s529_s0 = inlined_call_operand.vmem [shape: bf16[32,72], index: 0, kind: input, shape index: {}]   ;;  %s530_s1 = inlined_call_operand.vmem [shape: bf16[72,256], index: 1, kind: input, shape index: {}]   ;;  %s531_s2 = inlined_call_operand.vmem [shape: f32[1,256], index: 2, kind: input, shape index: {}]   ;;  %s532_s3 = inlined_call_operand.vmem [shape: bf16[32,256], index: 3, kind: output, shape index: {}]  }
   0x1 LB: > { %s358_s13 = sadd.s32 4294967295, %s432_s12   ;;  %p362_p0 = scmp.ge.s32.totalorder %s432_s12, 1  ;;  %s432_s12 = sphi %s454_s12, %s13_s12  }
   0x2   : > { %p138_p1 = scmp.lt.s32.totalorder %s432_s12, 3 }
   0x4   : > { %p139_p2 = pnand %p362_p0, %p138_p1 }
   0x5   : > { %s363_s28 = sshll.u32 (!%p139_p2), %s358_s13, 1 }
   0x6   : > { %142 = sbr.rel (%p139_p2) target bundleno = 177 (0xb1), region = 32  ;;  %p164_p3 = scmp.lt.s32.totalorder (!%p139_p2), %s363_s28, 3 }
   0xb   : > { %v187_v0 = vld [vmem:[%s530_s1 + $0x40] sm:$0xff]  ;;  %vm248_vm0 = vcmask 1043456   ;;  %v398_v3 = vld [vmem:[%s530_s1 + $0x30] sm:$0xf]  ;;  %v417_v6 = vld [vmem:[%s530_s1 + $0x34] sm:$0xf0] }
   0xc   : > { %v224_v1 = vunpack.c.l.b16 %v187_v0  ;;  %v225_v2 = vunpack.c.h.b16 %v187_v0  ;;  %v416_v7 = vld [vmem:[%s530_s1 + $0x34] sm:$0xf]  ;;  %v400_v8 = vld [vmem:[%s530_s1 + $0x38] sm:$0xf0]  ;;  %v399_v11 = vor.u32 %v417_v6, %v398_v3  ;;  %v390_v13 = vld [vmem:[%s530_s1 + $0x20] sm:$0xf] }
   0xd   : > { %v403_v12 = vor.u32 %v416_v7, %v400_v8  ;;  %v415_v14 = vld [vmem:[%s530_s1 + $0x24] sm:$0xf0]  ;;  %v414_v15 = vld [vmem:[%s530_s1 + $0x24] sm:$0xf]  ;;  %v392_v16 = vld [vmem:[%s530_s1 + $0x28] sm:$0xf0] }
   0xe   : > { %v234_v4 = vpack.c.b16 %v224_v1, %v224_v1  ;;  %v235_v5 = vpack.c.b16 %v225_v2, %v225_v2  ;;  %v391_v17 = vor.u32 %v415_v14, %v390_v13  ;;  %v395_v18 = vor.u32 %v414_v15, %v392_v16  ;;  %v382_v19 = vld [vmem:[%s530_s1 + $0x10] sm:$0xf]  ;;  %v413_v20 = vld [vmem:[%s530_s1 + $0x14] sm:$0xf0]  ;;  %v412_v21 = vld [vmem:[%s530_s1 + $0x14] sm:$0xf] }
   0xf   : > { %v384_v22 = vld [vmem:[%s530_s1 + $0x18] sm:$0xf0]  ;;  %s534_s28 = smov (!%p164_p3, %s363_s28), 3  ;;  %v383_v23 = vor.u32 %v413_v20, %v382_v19  ;;  %v374_v25 = vld [vmem:[%s530_s1] sm:$0xf]  ;;  %vm244_vm1 = vcmask 588800  }
  0x10   : > { %v250_v9 = vsel %vm248_vm0, %v234_v4, 0  ;;  %v253_v10 = vsel %vm248_vm0, %v235_v5, 0  ;;  %v387_v24 = vor.u32 %v412_v21, %v384_v22  ;;  %v411_v26 = vld [vmem:[%s530_s1 + $0x4] sm:$0xf0]  ;;  %v410_v27 = vld [vmem:[%s530_s1 + $0x4] sm:$0xf] }
  0x11   : > { %258 = vmatpush.bf16.msra.mxu0 %v250_v9  ;;  %272 = vmatpush.bf16.msra.mxu1 %v253_v10  ;;  %v376_v28 = vld [vmem:[%s530_s1 + $0x8] sm:$0xf0]  ;;  %s364_s23 = sshll.u32 %s534_s28, 2  ;;  %v375_v29 = vor.u32 %v411_v26, %v374_v25  ;;  %v188_v32 = vld [vmem:[%s531_s2] sm:$0x3]  ;;  %s408_s30 = sshll.u32 %s534_s28, 3 }
  0x12   : > { %v379_v30 = vor.u32 %v410_v27, %v376_v28  ;;  %s167_s26 = scalar_lea.vmem %s529_s0, %s364_s23  ;;  %v190_v33 = vperm.slane %v188_v32, 0  ;;  %v191_v34 = vperm.slane %v188_v32, 1  ;;  %s174_s6 = scalar_lea.vmem %s532_s3, %s408_s30 }
  0x13   : > { %v409_v31 = vld [vmem:[%s167_s26] sm:$0xff] }
  0x15   : > { %259 = vmatpush.bf16.msra.mxu0 %v399_v11  ;;  %273 = vmatpush.bf16.msra.mxu1 %v403_v12 }
  0x19   : > { %260 = vmatpush.bf16.msra.mxu0 %v391_v17  ;;  %274 = vmatpush.bf16.msra.mxu1 %v395_v18 }
  0x1d   : > { %261 = vmatpush.bf16.msra.mxu0 %v383_v23  ;;  %275 = vmatpush.bf16.msra.mxu1 %v387_v24 }
  0x21   : > { %262 = vmatpush.bf16.msra.mxu0 %v375_v29  ;;  %276 = vmatpush.bf16.msra.mxu1 %v379_v30 }
  0x24   : > { %404 = vmatmul.msk.bf16.vlgmr.msra.gmra.mxu0 %vm244_vm1, %v409_v31  ;;  %405 = vmatmul.msk.bf16.vlgmr.msra.gmra.mxu1 %vm244_vm1, %v409_v31 }
  0xa1   : > { %v264_v35 = vpop.f32.mrf.mxu0  ;;  %v278_v36 = vpop.f32.mrf.mxu1 }
  0xa2   : > { %v265_v37 = vadd.f32 %v264_v35, %v190_v33  ;;  %v279_v38 = vadd.f32 %v278_v36, %v191_v34 }
  0xa4   : > { %v288_v39 = vmax.f32 %v265_v37, 0.0 }
  0xa6   : > { %v296_v40 = vpack.c.bf16 %v279_v38, %v288_v39 }
  0xa8   : > { %298 = vst [vmem:[%s174_s6] sm:$0xff] %v296_v40 }
  0xa9   : > { %v266_v41 = vpop.f32.mrf.mxu0  ;;  %v280_v42 = vpop.f32.mrf.mxu1 }
  0xaa   : > { %v267_v43 = vadd.f32 %v266_v41, %v190_v33  ;;  %v281_v45 = vadd.f32 %v280_v42, %v191_v34 }
  0xac   : > { %v290_v44 = vmax.f32 %v267_v43, 0.0 }
  0xae   : > { %v297_v46 = vpack.c.bf16 %v281_v45, %v290_v44 }
  0xb0   : > { %299 = vst [vmem:[%s174_s6 + $0x8] sm:$0xff] %v297_v46 }
  0xb1 PF: > { %s13_s12 = sadd.s32 1, %s432_s12  }
  0xb2   : > { %p10_p4 = scmp.ge.s32.totalorder %s13_s12, 4  }
  0xb4   :  { %12 = sbr.rel (!%p10_p4) target bundleno = 1 (0x1), region = 62 }

// kernel: my_resnet_forward.27
= control target key start
LH: loop header
LB: loop body
LE: loop exit
PB: predicated region body
PF: predicated region fallthrough
CT: control target
= control target key end

     0   :  { %s470_s12 = smov 0   ;;  %s521_s0 = inlined_call_operand.vmem [shape: bf16[32,144], index: 0, kind: input, shape index: {}]   ;;  %s522_s1 = inlined_call_operand.vmem [shape: bf16[144,128], index: 1, kind: input, shape index: {}]   ;;  %s523_s2 = inlined_call_operand.vmem [shape: f32[1,128], index: 2, kind: input, shape index: {}]   ;;  %s524_s3 = inlined_call_operand.vmem [shape: bf16[32,128], index: 3, kind: output, shape index: {}]  }
   0x1 LB: > { %s359_s13 = sadd.s32 4294967295, %s448_s12   ;;  %p363_p0 = scmp.ge.s32.totalorder %s448_s12, 1  ;;  %s448_s12 = sphi %s470_s12, %s13_s12  }
   0x2   : > { %p139_p1 = scmp.lt.s32.totalorder %s448_s12, 3 }
   0x4   : > { %p140_p2 = pnand %p363_p0, %p139_p1 }
   0x5   : > { %s364_s16 = sshll.u32 (!%p140_p2), %s359_s13, 1 }
   0x6   : > { %143 = sbr.rel (%p140_p2) target bundleno = 186 (0xba), region = 32  ;;  %p165_p3 = scmp.lt.s32.totalorder (!%p140_p2), %s364_s16, 3 }
   0xb   : > { %v426_v0 = vld [vmem:[%s522_s1 + $0x38] sm:$0xff]  ;;  %v425_v1 = vld [vmem:[%s522_s1 + $0x30] sm:$0xff]  ;;  %v427_v2 = vld [vmem:[%s522_s1 + $0x40] sm:$0xff]  ;;  %s526_s16 = smov (!%p165_p3, %s364_s16), 3  ;;  %vm265_vm0 = vcmask 130048  }
   0xc   : > { %269 = vmatpush.bf16.msra.mxu0 %v426_v0  ;;  %290 = vmatpush.bf16.msra.mxu1 %v427_v2  ;;  %s416_s21 = sshll.u32 %s526_s16, 3  ;;  %v424_v3 = vld [vmem:[%s522_s1 + $0x28] sm:$0xff]  ;;  %v423_v7 = vld [vmem:[%s522_s1 + $0x20] sm:$0xff]  ;;  %v422_v8 = vld [vmem:[%s522_s1 + $0x18] sm:$0xff]  ;;  %s368_s13 = sshll.u32 %s526_s16, 2 }
   0xd   : > { %s169_s26 = scalar_lea.vmem %s521_s0, %s416_s21  ;;  %v421_v9 = vld [vmem:[%s522_s1 + $0x10] sm:$0xff]  ;;  %v420_v10 = vld [vmem:[%s522_s1 + $0x8] sm:$0xff]  ;;  %v419_v11 = vld [vmem:[%s522_s1] sm:$0xff]  ;;  %s175_s17 = scalar_lea.vmem %s524_s3, %s368_s13 }
   0xe   : > { %v417_v4 = vld [vmem:[%s169_s26 + $0x4] sm:$0xf]  ;;  %v373_v5 = vld [vmem:[%s169_s26 + $0x8] sm:$0xf0]  ;;  %v371_v12 = vld [vmem:[%s169_s26] sm:$0xf] }
   0xf   : > { %v376_v6 = vor.u32 %v417_v4, %v373_v5  ;;  %v418_v13 = vld [vmem:[%s169_s26 + $0x4] sm:$0xf0]  ;;  %v441_v17 = vld [vmem:[%s523_s2] ss:$0 sm:$0xff] }
  0x10   : > { %270 = vmatpush.bf16.msra.mxu0 %v425_v1  ;;  %v372_v14 = vor.u32 %v418_v13, %v371_v12 }
  0x11   : > { %413 = vmatmul.msk.bf16.vlgmr.msra.gmra.mxu1 %vm265_vm0, %v376_v6 }
  0x14   : > { %271 = vmatpush.bf16.msra.mxu0 %v424_v3 }
  0x18   : > { %272 = vmatpush.bf16.msra.mxu0 %v423_v7 }
  0x1c   : > { %273 = vmatpush.bf16.msra.mxu0 %v422_v8 }
  0x20   : > { %274 = vmatpush.bf16.msra.mxu0 %v421_v9 }
  0x24   : > { %275 = vmatpush.bf16.msra.mxu0 %v420_v10 }
  0x28   : > { %276 = vmatpush.bf16.msra.mxu0 %v419_v11 }
  0x2b   : > { %277 = vmatmul.bf16.vlgmr.msra.gmra.mxu0 %v372_v14 }
  0x8e   : > { %v292_v15 = vpop.f32.mrf.mxu1 }
  0x96   : > { %v294_v22 = vpop.f32.mrf.mxu1 }
  0xa8   : > { %v278_v16 = vpop.f32.mrf.mxu0 }
  0xa9   : > { %v279_v18 = vadd.f32 %v441_v17, %v278_v16 }
  0xab   : > { %v293_v20 = vadd.f32 %v292_v15, %v279_v18 }
  0xad   : > { %v297_v24 = vmax.f32 %v293_v20, 0.0 }
  0xb0   : > { %v280_v19 = vpop.f32.mrf.mxu0 }
  0xb1   : > { %v281_v21 = vadd.f32 %v441_v17, %v280_v19 }
  0xb3   : > { %v295_v23 = vadd.f32 %v294_v22, %v281_v21 }
  0xb5   : > { %v298_v25 = vmax.f32 %v295_v23, 0.0 }
  0xb7   : > { %v431_v26 = vpack.c.bf16 %v298_v25, %v297_v24 }
  0xb9   : > { %432 = vst [vmem:[%s175_s17] sm:$0xff] %v431_v26  }
  0xba PF: > { %s13_s12 = sadd.s32 1, %s448_s12  }
  0xbb   : > { %p10_p4 = scmp.ge.s32.totalorder %s13_s12, 4  }
  0xbd   :  { %12 = sbr.rel (!%p10_p4) target bundleno = 1 (0x1), region = 62 }

// kernel: my_resnet_forward.26
= control target key start
LH: loop header
LB: loop body
LE: loop exit
PB: predicated region body
PF: predicated region fallthrough
CT: control target
= control target key end

     0   :  { %s548_s15 = smov 0   ;;  %s602_s0 = inlined_call_operand.vmem [shape: bf16[32,144], index: 0, kind: input, shape index: {}]   ;;  %s603_s1 = inlined_call_operand.vmem [shape: bf16[144,128], index: 1, kind: input, shape index: {}]   ;;  %s604_s2 = inlined_call_operand.vmem [shape: f32[1,128], index: 2, kind: input, shape index: {}]   ;;  %s605_s3 = inlined_call_operand.vmem [shape: bf16[32,128], index: 3, kind: input, shape index: {}]   ;;  %s606_s4 = inlined_call_operand.vmem [shape: bf16[32,128], index: 4, kind: output, shape index: {}]  }
   0x1 LB: > { %s426_s16 = sadd.s32 4294967295, %s521_s15   ;;  %p430_p0 = scmp.ge.s32.totalorder %s521_s15, 1  ;;  %s521_s15 = sphi %s548_s15, %s14_s15  }
   0x2   : > { %p175_p1 = scmp.lt.s32.totalorder %s521_s15, 3 }
   0x4   : > { %p176_p2 = pnand %p430_p0, %p175_p1 }
   0x5   : > { %s431_s19 = sshll.u32 (!%p176_p2), %s426_s16, 1 }
   0x6   : > { %179 = sbr.rel (%p176_p2) target bundleno = 188 (0xbc), region = 36  ;;  %p208_p3 = scmp.lt.s32.totalorder (!%p176_p2), %s431_s19, 3 }
   0xb   : > { %v495_v0 = vld [vmem:[%s603_s1 + $0x38] sm:$0xff]  ;;  %v494_v1 = vld [vmem:[%s603_s1 + $0x30] sm:$0xff]  ;;  %v496_v2 = vld [vmem:[%s603_s1 + $0x40] sm:$0xff]  ;;  %s608_s19 = smov (!%p208_p3, %s431_s19), 3  ;;  %vm314_vm0 = vcmask 130048  }
   0xc   : > { %318 = vmatpush.bf16.msra.mxu0 %v495_v0  ;;  %339 = vmatpush.bf16.msra.mxu1 %v496_v2  ;;  %s485_s24 = sshll.u32 %s608_s19, 3  ;;  %v493_v3 = vld [vmem:[%s603_s1 + $0x28] sm:$0xff]  ;;  %v492_v7 = vld [vmem:[%s603_s1 + $0x20] sm:$0xff]  ;;  %v491_v8 = vld [vmem:[%s603_s1 + $0x18] sm:$0xff]  ;;  %s435_s14 = sshll.u32 %s608_s19, 2 }
   0xd   : > { %s212_s29 = scalar_lea.vmem %s602_s0, %s485_s24  ;;  %v490_v9 = vld [vmem:[%s603_s1 + $0x10] sm:$0xff]  ;;  %v489_v10 = vld [vmem:[%s603_s1 + $0x8] sm:$0xff]  ;;  %v488_v11 = vld [vmem:[%s603_s1] sm:$0xff]  ;;  %s218_s21 = scalar_lea.vmem %s605_s3, %s435_s14 }
   0xe   : > { %v486_v4 = vld [vmem:[%s212_s29 + $0x4] sm:$0xf]  ;;  %v442_v5 = vld [vmem:[%s212_s29 + $0x8] sm:$0xf0]  ;;  %v440_v12 = vld [vmem:[%s212_s29] sm:$0xf]  ;;  %s224_s23 = scalar_lea.vmem %s606_s4, %s435_s14 }
   0xf   : > { %v445_v6 = vor.u32 %v486_v4, %v442_v5  ;;  %v487_v13 = vld [vmem:[%s212_s29 + $0x4] sm:$0xf0]  ;;  %v514_v15 = vld [vmem:[%s604_s2] ss:$0 sm:$0xff] }
  0x10   : > { %319 = vmatpush.bf16.msra.mxu0 %v494_v1  ;;  %v441_v14 = vor.u32 %v487_v13, %v440_v12  ;;  %v498_v19 = vld [vmem:[%s218_s21] sm:$0xff]  }
  0x11   : > { %482 = vmatmul.msk.bf16.vlgmr.msra.gmra.mxu1 %vm314_vm0, %v445_v6  ;;  %v499_v21 = vunpack.c.l.bf16 %v498_v19  ;;  %v500_v24 = vunpack.c.h.bf16 %v498_v19 }
  0x14   : > { %320 = vmatpush.bf16.msra.mxu0 %v493_v3 }
  0x18   : > { %321 = vmatpush.bf16.msra.mxu0 %v492_v7 }
  0x1c   : > { %322 = vmatpush.bf16.msra.mxu0 %v491_v8 }
  0x20   : > { %323 = vmatpush.bf16.msra.mxu0 %v490_v9 }
  0x24   : > { %324 = vmatpush.bf16.msra.mxu0 %v489_v10 }
  0x28   : > { %325 = vmatpush.bf16.msra.mxu0 %v488_v11 }
  0x2b   : > { %326 = vmatmul.bf16.vlgmr.msra.gmra.mxu0 %v441_v14 }
  0x8e   : > { %v341_v16 = vpop.f32.mrf.mxu1 }
  0x96   : > { %v343_v25 = vpop.f32.mrf.mxu1 }
  0xa8   : > { %v327_v17 = vpop.f32.mrf.mxu0 }
  0xa9   : > { %v328_v18 = vadd.f32 %v514_v15, %v327_v17 }
  0xab   : > { %v342_v20 = vadd.f32 %v341_v16, %v328_v18 }
  0xad   : > { %v350_v26 = vadd.f32 %v499_v21, %v342_v20 }
  0xaf   : > { %v352_v29 = vmax.f32 %v350_v26, 0.0 }
  0xb0   : > { %v329_v22 = vpop.f32.mrf.mxu0 }
  0xb1   : > { %v330_v23 = vadd.f32 %v514_v15, %v329_v22 }
  0xb3   : > { %v344_v27 = vadd.f32 %v343_v25, %v330_v23 }
  0xb5   : > { %v351_v28 = vadd.f32 %v500_v24, %v344_v27 }
  0xb7   : > { %v353_v30 = vmax.f32 %v351_v28, 0.0 }
  0xb9   : > { %v504_v31 = vpack.c.bf16 %v353_v30, %v352_v29 }
  0xbb   : > { %505 = vst [vmem:[%s224_s23] sm:$0xff] %v504_v31  }
  0xbc PF: > { %s14_s15 = sadd.s32 1, %s521_s15  }
  0xbd   : > { %p11_p4 = scmp.ge.s32.totalorder %s14_s15, 4  }
  0xbf   :  { %13 = sbr.rel (!%p11_p4) target bundleno = 1 (0x1), region = 69 }

// kernel: my_resnet_forward.29
= control target key start
LH: loop header
LB: loop body
LE: loop exit
PB: predicated region body
PF: predicated region fallthrough
CT: control target
= control target key end

     0   :  { %vm136_vm0 = vcmask 130048   ;;  %s438_s1 = inlined_call_operand.vmem [shape: bf16[144,256], index: 1, kind: input, shape index: {}]   ;;  %s439_s0 = inlined_call_operand.vmem [shape: bf16[8,144], index: 0, kind: input, shape index: {}]   ;;  %s440_s2 = inlined_call_operand.vmem [shape: f32[1,256], index: 2, kind: input, shape index: {}]   ;;  %s441_s3 = inlined_call_operand.vmem [shape: bf16[8,256], index: 3, kind: output, shape index: {}]  }
   0x1   :  { %v265_v0 = vld [vmem:[%s438_s1 + $0x70] sm:$0xf]  ;;  %v296_v1 = vld [vmem:[%s438_s1 + $0x74] sm:$0xf0]  ;;  %v295_v2 = vld [vmem:[%s438_s1 + $0x74] sm:$0xf] }
   0x2   :  { %v266_v3 = vor.u32 %v296_v1, %v265_v0  ;;  %v267_v4 = vld [vmem:[%s438_s1 + $0x78] sm:$0xf0]  ;;  %v257_v5 = vld [vmem:[%s438_s1 + $0x60] sm:$0xf]  ;;  %v294_v6 = vld [vmem:[%s438_s1 + $0x64] sm:$0xf0] }
   0x3   :  { %v270_v7 = vor.u32 %v295_v2, %v267_v4  ;;  %v293_v8 = vld [vmem:[%s438_s1 + $0x64] sm:$0xf]  ;;  %v259_v9 = vld [vmem:[%s438_s1 + $0x68] sm:$0xf0]  ;;  %v258_v10 = vor.u32 %v294_v6, %v257_v5  ;;  %v249_v12 = vld [vmem:[%s438_s1 + $0x50] sm:$0xf] }
   0x4   :  { %140 = vmatpush.bf16.msra.mxu0 %v266_v3  ;;  %v262_v11 = vor.u32 %v293_v8, %v259_v9  ;;  %v292_v13 = vld [vmem:[%s438_s1 + $0x54] sm:$0xf0]  ;;  %v291_v14 = vld [vmem:[%s438_s1 + $0x54] sm:$0xf]  ;;  %v251_v15 = vld [vmem:[%s438_s1 + $0x58] sm:$0xf0] }
   0x5   :  { %166 = vmatpush.bf16.msra.mxu2 %v270_v7  ;;  %v250_v16 = vor.u32 %v292_v13, %v249_v12  ;;  %v241_v17 = vld [vmem:[%s438_s1 + $0x40] sm:$0xf]  ;;  %v290_v18 = vld [vmem:[%s438_s1 + $0x44] sm:$0xf0]  ;;  %v254_v19 = vor.u32 %v291_v14, %v251_v15  ;;  %v297_v20 = vld [vmem:[%s438_s1 + $0x84] sm:$0xf] }
   0x6   :  { %v275_v21 = vld [vmem:[%s438_s1 + $0x88] sm:$0xf0]  ;;  %v15_v22 = vld [vmem:[%s439_s0] sm:$0xff]  ;;  %v298_v28 = vld [vmem:[%s438_s1 + $0x84] sm:$0xf0]  ;;  %v242_v29 = vor.u32 %v290_v18, %v241_v17 }
   0x7   :  { %v289_v23 = vld [vmem:[%s438_s1 + $0x44] sm:$0xf]  ;;  %v243_v24 = vld [vmem:[%s438_s1 + $0x48] sm:$0xf0]  ;;  %v278_v25 = vor.u32 %v297_v20, %v275_v21  ;;  %v42_v26 = vunpack.c.h.b16 %v15_v22  ;;  %v273_v27 = vld [vmem:[%s438_s1 + $0x80] sm:$0xf]  ;;  %v41_v55 = vunpack.c.l.b16 %v15_v22 }
   0x8   :  { %141 = vmatpush.bf16.msra.mxu0 %v258_v10  ;;  %v274_v31 = vor.u32 %v298_v28, %v273_v27  ;;  %v246_v32 = vor.u32 %v289_v23, %v243_v24  ;;  %v233_v33 = vld [vmem:[%s438_s1 + $0x30] sm:$0xf]  ;;  %v288_v34 = vld [vmem:[%s438_s1 + $0x34] sm:$0xf0]  ;;  %v287_v35 = vld [vmem:[%s438_s1 + $0x34] sm:$0xf] }
   0x9   :  { %167 = vmatpush.bf16.msra.mxu2 %v262_v11  ;;  %186 = vmatpush.bf16.msra.mxu3 %v278_v25  ;;  %v44_v30 = vpack.c.b16 %v42_v26, %v42_v26  ;;  %v235_v36 = vld [vmem:[%s438_s1 + $0x38] sm:$0xf0]  ;;  %v234_v37 = vor.u32 %v288_v34, %v233_v33  ;;  %v225_v39 = vld [vmem:[%s438_s1 + $0x20] sm:$0xf]  ;;  %v286_v40 = vld [vmem:[%s438_s1 + $0x24] sm:$0xf0]  ;;  %v43_v58 = vpack.c.b16 %v41_v55, %v41_v55 }
   0xa   :  { %160 = vmatpush.bf16.msra.mxu1 %v274_v31  ;;  %v238_v38 = vor.u32 %v287_v35, %v235_v36  ;;  %v285_v41 = vld [vmem:[%s438_s1 + $0x24] sm:$0xf]  ;;  %v227_v42 = vld [vmem:[%s438_s1 + $0x28] sm:$0xf0]  ;;  %v226_v43 = vor.u32 %v286_v40, %v225_v39  ;;  %v217_v45 = vld [vmem:[%s438_s1 + $0x10] sm:$0xf] }
   0xb   :  { %v230_v44 = vor.u32 %v285_v41, %v227_v42  ;;  %v284_v46 = vld [vmem:[%s438_s1 + $0x14] sm:$0xf0]  ;;  %v283_v47 = vld [vmem:[%s438_s1 + $0x14] sm:$0xf]  ;;  %v219_v48 = vld [vmem:[%s438_s1 + $0x18] sm:$0xf0] }
   0xc   :  { %142 = vmatpush.bf16.msra.mxu0 %v250_v16  ;;  %280 = vmatmul.msk.bf16.vlgmr.msra.gmra.mxu3 %vm136_vm0, %v44_v30  ;;  %v218_v49 = vor.u32 %v284_v46, %v217_v45  ;;  %v222_v50 = vor.u32 %v283_v47, %v219_v48  ;;  %v209_v51 = vld [vmem:[%s438_s1] sm:$0xf]  ;;  %v282_v52 = vld [vmem:[%s438_s1 + $0x4] sm:$0xf0]  ;;  %v281_v53 = vld [vmem:[%s438_s1 + $0x4] sm:$0xf] }
   0xd   :  { %168 = vmatpush.bf16.msra.mxu2 %v254_v19  ;;  %279 = vmatmul.msk.bf16.vlgmr.msra.gmra.mxu1 %vm136_vm0, %v44_v30  ;;  %v211_v54 = vld [vmem:[%s438_s1 + $0x8] sm:$0xf0]  ;;  %v210_v56 = vor.u32 %v282_v52, %v209_v51  ;;  %v34_v62 = vld [vmem:[%s440_s2] sm:$0x3] }
   0xe   :  { %v214_v57 = vor.u32 %v281_v53, %v211_v54  ;;  %v36_v0 = vperm.slane %v34_v62, 0  ;;  %v37_v4 = vperm.slane %v34_v62, 1 }
  0x10   :  { %143 = vmatpush.bf16.msra.mxu0 %v242_v29 }
  0x11   :  { %169 = vmatpush.bf16.msra.mxu2 %v246_v32 }
  0x14   :  { %144 = vmatpush.bf16.msra.mxu0 %v234_v37 }
  0x15   :  { %170 = vmatpush.bf16.msra.mxu2 %v238_v38 }
  0x18   :  { %145 = vmatpush.bf16.msra.mxu0 %v226_v43 }
  0x19   :  { %171 = vmatpush.bf16.msra.mxu2 %v230_v44 }
  0x1c   :  { %146 = vmatpush.bf16.msra.mxu0 %v218_v49 }
  0x1d   :  { %172 = vmatpush.bf16.msra.mxu2 %v222_v50 }
  0x20   :  { %147 = vmatpush.bf16.msra.mxu0 %v210_v56 }
  0x21   :  { %173 = vmatpush.bf16.msra.mxu2 %v214_v57 }
  0x23   :  { %148 = vmatmul.bf16.vlgmr.msra.gmra.mxu0 %v43_v58 }
  0x24   :  { %174 = vmatmul.bf16.vlgmr.msra.gmra.mxu2 %v43_v58 }
  0x8a   :  { %v162_v59 = vpop.f32.mrf.mxu1 }
  0x8f   :  { %v188_v60 = vpop.f32.mrf.mxu3 }
  0x92   :  { %v164_v61 = vpop.f32.mrf.mxu1 }
  0x97   :  { %v190_v63 = vpop.f32.mrf.mxu3 }
  0xa0   :  { %v149_v1 = vpop.f32.mrf.mxu0 }
  0xa1   :  { %v150_v2 = vadd.f32 %v149_v1, %v36_v0 }
  0xa3   :  { %v163_v3 = vadd.f32 %v162_v59, %v150_v2 }
  0xa5   :  { %v197_v6 = vmax.f32 %v163_v3, 0.0 }
  0xa7   :  { %v175_v5 = vpop.f32.mrf.mxu2 }
  0xa8   :  { %v176_v7 = vadd.f32 %v175_v5, %v37_v4  ;;  %v151_v8 = vpop.f32.mrf.mxu0 }
  0xaa   :  { %v189_v9 = vadd.f32 %v188_v60, %v176_v7 }
  0xac   :  { %v201_v10 = vpack.c.bf16 %v189_v9, %v197_v6 }
  0xae   :  { %202 = vst [vmem:[%s441_s3] sm:$0xff] %v201_v10 }
  0xaf   :  { %v177_v11 = vpop.f32.mrf.mxu2 }

// kernel: my_resnet_forward.31
= control target key start
LH: loop header
LB: loop body
LE: loop exit
PB: predicated region body
PF: predicated region fallthrough
CT: control target
= control target key end

     0   :  { %vm175_vm0 = vcmask 261120   ;;  %s403_s1 = inlined_call_operand.vmem [shape: bf16[288,128], index: 1, kind: input, shape index: {}]   ;;  %s404_s0 = inlined_call_operand.vmem [shape: bf16[8,288], index: 0, kind: input, shape index: {}]   ;;  %s405_s2 = inlined_call_operand.vmem [shape: f32[1,128], index: 2, kind: input, shape index: {}]   ;;  %s406_s3 = inlined_call_operand.vmem [shape: bf16[8,128], index: 3, kind: output, shape index: {}]  }
   0x1   :  { %v305_v0 = vld [vmem:[%s403_s1 + $0x38] sm:$0xff]  ;;  %v304_v2 = vld [vmem:[%s403_s1 + $0x30] sm:$0xff]  ;;  %v315_v4 = vld [vmem:[%s403_s1 + $0x88] sm:$0xff] }
   0x2   :  { %v313_v1 = vld [vmem:[%s403_s1 + $0x78] sm:$0xff]  ;;  %179 = vmatpush.bf16.msra.mxu0 %v305_v0  ;;  %v312_v3 = vld [vmem:[%s403_s1 + $0x70] sm:$0xff]  ;;  %211 = vmatpush.bf16.msra.mxu2 %v315_v4  ;;  %v314_v5 = vld [vmem:[%s403_s1 + $0x80] sm:$0xff] }
   0x3   :  { %192 = vmatpush.bf16.msra.mxu1 %v313_v1  ;;  %v16_v6 = vld [vmem:[%s404_s0 + $0x8] sm:$0xf]  ;;  %v302_v11 = vld [vmem:[%s403_s1 + $0x20] sm:$0xff]  ;;  %v301_v13 = vld [vmem:[%s403_s1 + $0x18] sm:$0xff] }
   0x4   :  { %v61_v7 = vunpack.c.l.b16 %v16_v6  ;;  %v303_v8 = vld [vmem:[%s403_s1 + $0x28] sm:$0xff]  ;;  %v310_v12 = vld [vmem:[%s403_s1 + $0x60] sm:$0xff]  ;;  %v309_v14 = vld [vmem:[%s403_s1 + $0x58] sm:$0xff] }
   0x5   :  { %v311_v9 = vld [vmem:[%s403_s1 + $0x68] sm:$0xff]  ;;  %v300_v15 = vld [vmem:[%s403_s1 + $0x10] sm:$0xff]  ;;  %v15_v19 = vld [vmem:[%s404_s0] sm:$0xff] }
   0x6   :  { %180 = vmatpush.bf16.msra.mxu0 %v304_v2  ;;  %v64_v10 = vpack.c.b16 %v61_v7, %v61_v7  ;;  %212 = vmatpush.bf16.msra.mxu2 %v314_v5  ;;  %v308_v16 = vld [vmem:[%s403_s1 + $0x50] sm:$0xff]  ;;  %v299_v17 = vld [vmem:[%s403_s1 + $0x8] sm:$0xff]  ;;  %v59_v20 = vunpack.c.l.b16 %v15_v19  ;;  %v60_v21 = vunpack.c.h.b16 %v15_v19  ;;  %v298_v22 = vld [vmem:[%s403_s1] sm:$0xff] }
   0x7   :  { %193 = vmatpush.bf16.msra.mxu1 %v312_v3  ;;  %v307_v18 = vld [vmem:[%s403_s1 + $0x48] sm:$0xff]  ;;  %v306_v23 = vld [vmem:[%s403_s1 + $0x40] sm:$0xff] }
   0x8   :  { %v62_v24 = vpack.c.b16 %v59_v20, %v59_v20  ;;  %v63_v25 = vpack.c.b16 %v60_v21, %v60_v21  ;;  %v316_v28 = vld [vmem:[%s405_s2] ss:$0 sm:$0xff] }
   0x9   :  { %297 = vmatmul.msk.bf16.vlgmr.msra.gmra.mxu2 %vm175_vm0, %v64_v10 }
   0xa   :  { %181 = vmatpush.bf16.msra.mxu0 %v303_v8 }
   0xb   :  { %194 = vmatpush.bf16.msra.mxu1 %v311_v9 }
   0xe   :  { %182 = vmatpush.bf16.msra.mxu0 %v302_v11 }
   0xf   :  { %195 = vmatpush.bf16.msra.mxu1 %v310_v12 }
  0x12   :  { %183 = vmatpush.bf16.msra.mxu0 %v301_v13 }
  0x13   :  { %196 = vmatpush.bf16.msra.mxu1 %v309_v14 }
  0x16   :  { %184 = vmatpush.bf16.msra.mxu0 %v300_v15 }
  0x17   :  { %197 = vmatpush.bf16.msra.mxu1 %v308_v16 }
  0x1a   :  { %185 = vmatpush.bf16.msra.mxu0 %v299_v17 }
  0x1b   :  { %198 = vmatpush.bf16.msra.mxu1 %v307_v18 }
  0x1e   :  { %186 = vmatpush.bf16.msra.mxu0 %v298_v22 }
  0x1f   :  { %199 = vmatpush.bf16.msra.mxu1 %v306_v23 }
  0x21   :  { %187 = vmatmul.bf16.vlgmr.msra.gmra.mxu0 %v62_v24 }
  0x22   :  { %200 = vmatmul.bf16.vlgmr.msra.gmra.mxu1 %v63_v25 }
  0x8c   :  { %v214_v26 = vpop.f32.mrf.mxu2 }
  0x94   :  { %v216_v27 = vpop.f32.mrf.mxu2 }
  0x9e   :  { %v188_v29 = vpop.f32.mrf.mxu0 }
  0x9f   :  { %v201_v30 = vpop.f32.mrf.mxu1  ;;  %v189_v31 = vadd.f32 %v316_v28, %v188_v29 }
  0xa1   :  { %v202_v32 = vadd.f32 %v201_v30, %v189_v31 }
  0xa3   :  { %v215_v33 = vadd.f32 %v214_v26, %v202_v32 }
  0xa5   :  { %v218_v34 = vmax.f32 %v215_v33, 0.0 }
  0xa6   :  { %v190_v35 = vpop.f32.mrf.mxu0 }
  0xa7   :  { %v203_v36 = vpop.f32.mrf.mxu1  ;;  %v219_v37 = vpack.c.bf16 %v218_v34, %v218_v34 }
  0xa9   :  { %220 = vst [vmem:[%s406_s3] sm:$0xf] %v219_v37 }

// kernel: my_resnet_forward.30
= control target key start
LH: loop header
LB: loop body
LE: loop exit
PB: predicated region body
PF: predicated region fallthrough
CT: control target
= control target key end

     0   :  { %vm178_vm0 = vcmask 261120   ;;  %s417_s1 = inlined_call_operand.vmem [shape: bf16[288,128], index: 1, kind: input, shape index: {}]   ;;  %s418_s0 = inlined_call_operand.vmem [shape: bf16[8,288], index: 0, kind: input, shape index: {}]   ;;  %s419_s2 = inlined_call_operand.vmem [shape: f32[1,128], index: 2, kind: input, shape index: {}]   ;;  %s420_s3 = inlined_call_operand.vmem [shape: bf16[8,128], index: 3, kind: input, shape index: {}]   ;;  %s421_s4 = inlined_call_operand.vmem [shape: bf16[8,128], index: 4, kind: output, shape index: {}]  }
   0x1   :  { %v311_v0 = vld [vmem:[%s417_s1 + $0x38] sm:$0xff]  ;;  %v310_v2 = vld [vmem:[%s417_s1 + $0x30] sm:$0xff]  ;;  %v321_v4 = vld [vmem:[%s417_s1 + $0x88] sm:$0xff] }
   0x2   :  { %v319_v1 = vld [vmem:[%s417_s1 + $0x78] sm:$0xff]  ;;  %182 = vmatpush.bf16.msra.mxu0 %v311_v0  ;;  %v318_v3 = vld [vmem:[%s417_s1 + $0x70] sm:$0xff]  ;;  %214 = vmatpush.bf16.msra.mxu2 %v321_v4  ;;  %v320_v5 = vld [vmem:[%s417_s1 + $0x80] sm:$0xff] }
   0x3   :  { %195 = vmatpush.bf16.msra.mxu1 %v319_v1  ;;  %v19_v6 = vld [vmem:[%s418_s0 + $0x8] sm:$0xf]  ;;  %v308_v11 = vld [vmem:[%s417_s1 + $0x20] sm:$0xff]  ;;  %v307_v13 = vld [vmem:[%s417_s1 + $0x18] sm:$0xff] }
   0x4   :  { %v64_v7 = vunpack.c.l.b16 %v19_v6  ;;  %v309_v8 = vld [vmem:[%s417_s1 + $0x28] sm:$0xff]  ;;  %v316_v12 = vld [vmem:[%s417_s1 + $0x60] sm:$0xff]  ;;  %v315_v14 = vld [vmem:[%s417_s1 + $0x58] sm:$0xff] }
   0x5   :  { %v317_v9 = vld [vmem:[%s417_s1 + $0x68] sm:$0xff]  ;;  %v306_v15 = vld [vmem:[%s417_s1 + $0x10] sm:$0xff]  ;;  %v18_v19 = vld [vmem:[%s418_s0] sm:$0xff] }
   0x6   :  { %183 = vmatpush.bf16.msra.mxu0 %v310_v2  ;;  %v67_v10 = vpack.c.b16 %v64_v7, %v64_v7  ;;  %215 = vmatpush.bf16.msra.mxu2 %v320_v5  ;;  %v314_v16 = vld [vmem:[%s417_s1 + $0x50] sm:$0xff]  ;;  %v305_v17 = vld [vmem:[%s417_s1 + $0x8] sm:$0xff]  ;;  %v62_v20 = vunpack.c.l.b16 %v18_v19  ;;  %v63_v21 = vunpack.c.h.b16 %v18_v19  ;;  %v304_v22 = vld [vmem:[%s417_s1] sm:$0xff] }
   0x7   :  { %196 = vmatpush.bf16.msra.mxu1 %v318_v3  ;;  %v313_v18 = vld [vmem:[%s417_s1 + $0x48] sm:$0xff]  ;;  %v312_v23 = vld [vmem:[%s417_s1 + $0x40] sm:$0xff] }
   0x8   :  { %v65_v24 = vpack.c.b16 %v62_v20, %v62_v20  ;;  %v66_v25 = vpack.c.b16 %v63_v21, %v63_v21  ;;  %v322_v28 = vld [vmem:[%s419_s2] ss:$0 sm:$0xff] }
   0x9   :  { %303 = vmatmul.msk.bf16.vlgmr.msra.gmra.mxu2 %vm178_vm0, %v67_v10  ;;  %v221_v31 = vld [vmem:[%s420_s3] sm:$0xf] }
   0xa   :  { %184 = vmatpush.bf16.msra.mxu0 %v309_v8  ;;  %v222_v34 = vunpack.c.l.bf16 %v221_v31 }
   0xb   :  { %197 = vmatpush.bf16.msra.mxu1 %v317_v9 }
   0xe   :  { %185 = vmatpush.bf16.msra.mxu0 %v308_v11 }
   0xf   :  { %198 = vmatpush.bf16.msra.mxu1 %v316_v12 }
  0x12   :  { %186 = vmatpush.bf16.msra.mxu0 %v307_v13 }
  0x13   :  { %199 = vmatpush.bf16.msra.mxu1 %v315_v14 }
  0x16   :  { %187 = vmatpush.bf16.msra.mxu0 %v306_v15 }
  0x17   :  { %200 = vmatpush.bf16.msra.mxu1 %v314_v16 }
  0x1a   :  { %188 = vmatpush.bf16.msra.mxu0 %v305_v17 }
  0x1b   :  { %201 = vmatpush.bf16.msra.mxu1 %v313_v18 }
  0x1e   :  { %189 = vmatpush.bf16.msra.mxu0 %v304_v22 }
  0x1f   :  { %202 = vmatpush.bf16.msra.mxu1 %v312_v23 }
  0x21   :  { %190 = vmatmul.bf16.vlgmr.msra.gmra.mxu0 %v65_v24 }
  0x22   :  { %203 = vmatmul.bf16.vlgmr.msra.gmra.mxu1 %v66_v25 }
  0x8c   :  { %v217_v26 = vpop.f32.mrf.mxu2 }
  0x94   :  { %v219_v27 = vpop.f32.mrf.mxu2 }
  0x9e   :  { %v191_v29 = vpop.f32.mrf.mxu0 }
  0x9f   :  { %v204_v30 = vpop.f32.mrf.mxu1  ;;  %v192_v32 = vadd.f32 %v322_v28, %v191_v29 }
  0xa1   :  { %v205_v33 = vadd.f32 %v204_v30, %v192_v32 }
  0xa3   :  { %v218_v35 = vadd.f32 %v217_v26, %v205_v33 }
  0xa5   :  { %v223_v36 = vadd.f32 %v222_v34, %v218_v35 }
  0xa6   :  { %v193_v37 = vpop.f32.mrf.mxu0 }
  0xa7   :  { %v206_v38 = vpop.f32.mrf.mxu1  ;;  %v224_v39 = vmax.f32 %v223_v36, 0.0 }
  0xa9   :  { %v225_v40 = vpack.c.bf16 %v224_v39, %v224_v39 }
  0xab   :  { %226 = vst [vmem:[%s421_s4] sm:$0xf] %v225_v40 }

// kernel: my_resnet_forward.33
= control target key start
LH: loop header
LB: loop body
LE: loop exit
PB: predicated region body
PF: predicated region fallthrough
CT: control target
= control target key end

     0   :  { %vm245_vm0 = vcmask 261120   ;;  %vm338_vm1 = vcmask 1040384   ;;  %s781_s1 = inlined_call_operand.vmem [shape: bf16[288,256], index: 1, kind: input, shape index: {}]   ;;  %s782_s0 = inlined_call_operand.vmem [shape: bf16[2,288], index: 0, kind: input, shape index: {}]   ;;  %s783_s2 = inlined_call_operand.vmem [shape: f32[1,256], index: 2, kind: input, shape index: {}]   ;;  %s784_s3 = inlined_call_operand.vmem [shape: bf16[2,256], index: 3, kind: output, shape index: {}]  }
   0x1   :  { %v406_v0 = vld [vmem:[%s781_s1 + $0x70] sm:$0xf]  ;;  %v509_v1 = vld [vmem:[%s781_s1 + $0x74] sm:$0xf0]  ;;  %v508_v5 = vld [vmem:[%s781_s1 + $0x74] sm:$0xf] }
   0x2   :  { %v486_v2 = vld [vmem:[%s781_s1 + $0x110] sm:$0xf]  ;;  %v407_v3 = vor.u32 %v509_v1, %v406_v0  ;;  %v529_v4 = vld [vmem:[%s781_s1 + $0x114] sm:$0xf0]  ;;  %v408_v6 = vld [vmem:[%s781_s1 + $0x78] sm:$0xf0] }
   0x3   :  { %v487_v7 = vor.u32 %v529_v4, %v486_v2  ;;  %v411_v8 = vor.u32 %v508_v5, %v408_v6  ;;  %v470_v9 = vld [vmem:[%s781_s1 + $0xf0] sm:$0xf]  ;;  %v525_v10 = vld [vmem:[%s781_s1 + $0xf4] sm:$0xf0]  ;;  %v398_v11 = vld [vmem:[%s781_s1 + $0x60] sm:$0xf] }
   0x4   :  { %248 = vmatpush.bf16.msra.mxu0 %v407_v3  ;;  %v471_v12 = vor.u32 %v525_v10, %v470_v9  ;;  %v507_v13 = vld [vmem:[%s781_s1 + $0x64] sm:$0xf0]  ;;  %v478_v14 = vld [vmem:[%s781_s1 + $0x100] sm:$0xf]  ;;  %v506_v18 = vld [vmem:[%s781_s1 + $0x64] sm:$0xf] }
   0x5   :  { %v527_v15 = vld [vmem:[%s781_s1 + $0x104] sm:$0xf0]  ;;  %280 = vmatpush.bf16.msra.mxu2 %v487_v7  ;;  %287 = vmatpush.bf16.msra.mxu3 %v411_v8  ;;  %v399_v16 = vor.u32 %v507_v13, %v398_v11  ;;  %v400_v19 = vld [vmem:[%s781_s1 + $0x68] sm:$0xf0]  ;;  %v524_v20 = vld [vmem:[%s781_s1 + $0xf4] sm:$0xf] }
   0x6   :  { %v479_v17 = vor.u32 %v527_v15, %v478_v14  ;;  %261 = vmatpush.bf16.msra.mxu1 %v471_v12  ;;  %v403_v21 = vor.u32 %v506_v18, %v400_v19  ;;  %v472_v22 = vld [vmem:[%s781_s1 + $0xf8] sm:$0xf0]  ;;  %v462_v23 = vld [vmem:[%s781_s1 + $0xe0] sm:$0xf]  ;;  %v523_v24 = vld [vmem:[%s781_s1 + $0xe4] sm:$0xf0] }
   0x7   :  { %v475_v25 = vor.u32 %v524_v20, %v472_v22  ;;  %v463_v26 = vor.u32 %v523_v24, %v462_v23  ;;  %v390_v27 = vld [vmem:[%s781_s1 + $0x50] sm:$0xf]  ;;  %v505_v28 = vld [vmem:[%s781_s1 + $0x54] sm:$0xf0]  ;;  %v504_v29 = vld [vmem:[%s781_s1 + $0x54] sm:$0xf] }
   0x8   :  { %249 = vmatpush.bf16.msra.mxu0 %v399_v16  ;;  %v391_v30 = vor.u32 %v505_v28, %v390_v27  ;;  %v392_v31 = vld [vmem:[%s781_s1 + $0x58] sm:$0xf0]  ;;  %v522_v32 = vld [vmem:[%s781_s1 + $0xe4] sm:$0xf]  ;;  %v464_v33 = vld [vmem:[%s781_s1 + $0xe8] sm:$0xf0] }
   0x9   :  { %281 = vmatpush.bf16.msra.mxu2 %v479_v17  ;;  %288 = vmatpush.bf16.msra.mxu3 %v403_v21  ;;  %v395_v34 = vor.u32 %v504_v29, %v392_v31  ;;  %v454_v35 = vld [vmem:[%s781_s1 + $0xd0] sm:$0xf]  ;;  %v521_v36 = vld [vmem:[%s781_s1 + $0xd4] sm:$0xf0]  ;;  %v382_v37 = vld [vmem:[%s781_s1 + $0x40] sm:$0xf]  ;;  %v467_v38 = vor.u32 %v522_v32, %v464_v33 }
   0xa   :  { %262 = vmatpush.bf16.msra.mxu1 %v463_v26  ;;  %v455_v39 = vor.u32 %v521_v36, %v454_v35  ;;  %v503_v40 = vld [vmem:[%s781_s1 + $0x44] sm:$0xf0]  ;;  %v502_v41 = vld [vmem:[%s781_s1 + $0x44] sm:$0xf]  ;;  %v384_v42 = vld [vmem:[%s781_s1 + $0x48] sm:$0xf0] }
   0xb   :  { %v520_v43 = vld [vmem:[%s781_s1 + $0xd4] sm:$0xf]  ;;  %v456_v44 = vld [vmem:[%s781_s1 + $0xd8] sm:$0xf0]  ;;  %v446_v45 = vld [vmem:[%s781_s1 + $0xc0] sm:$0xf]  ;;  %v383_v46 = vor.u32 %v503_v40, %v382_v37  ;;  %v387_v49 = vor.u32 %v502_v41, %v384_v42 }
   0xc   :  { %250 = vmatpush.bf16.msra.mxu0 %v391_v30  ;;  %v519_v47 = vld [vmem:[%s781_s1 + $0xc4] sm:$0xf0]  ;;  %v15_v48 = vld [vmem:[%s782_s0] sm:$0x7]  ;;  %v374_v50 = vld [vmem:[%s781_s1 + $0x30] sm:$0xf]  ;;  %v459_v52 = vor.u32 %v520_v43, %v456_v44 }
   0xd   :  { %300 = vmatpush.bf16.msrb.mxu2 %v475_v25  ;;  %289 = vmatpush.bf16.msra.mxu3 %v395_v34  ;;  %59 = vst [vmem:[#allocation1] ss:$9 sm:$0xff] %v15_v48  ;;  %v501_v51 = vld [vmem:[%s781_s1 + $0x34] sm:$0xf0]  ;;  %v447_v53 = vor.u32 %v519_v47, %v446_v45  ;;  %v500_v54 = vld [vmem:[%s781_s1 + $0x34] sm:$0xf] }
   0xe   :  { %263 = vmatpush.bf16.msra.mxu1 %v455_v39  ;;  %v376_v55 = vld [vmem:[%s781_s1 + $0x38] sm:$0xf0]  ;;  %v518_v56 = vld [vmem:[%s781_s1 + $0xc4] sm:$0xf]  ;;  %v448_v57 = vld [vmem:[%s781_s1 + $0xc8] sm:$0xf0]  ;;  %v375_v60 = vor.u32 %v501_v51, %v374_v50 }
   0xf   :  { %v438_v58 = vld [vmem:[%s781_s1 + $0xb0] sm:$0xf]  ;;  %v517_v59 = vld [vmem:[%s781_s1 + $0xb4] sm:$0xf0]  ;;  %v379_v61 = vor.u32 %v500_v54, %v376_v55  ;;  %v366_v62 = vld [vmem:[%s781_s1 + $0x20] sm:$0xf]  ;;  %v451_v0 = vor.u32 %v518_v56, %v448_v57 }
  0x10   :  { %251 = vmatpush.bf16.msra.mxu0 %v383_v46  ;;  %v499_v63 = vld [vmem:[%s781_s1 + $0x24] sm:$0xf0]  ;;  %v439_v1 = vor.u32 %v517_v59, %v438_v58  ;;  %v498_v2 = vld [vmem:[%s781_s1 + $0x24] sm:$0xf]  ;;  %v368_v3 = vld [vmem:[%s781_s1 + $0x28] sm:$0xf0] }
  0x11   :  { %301 = vmatpush.bf16.msrb.mxu2 %v467_v38  ;;  %290 = vmatpush.bf16.msra.mxu3 %v387_v49  ;;  %v516_v4 = vld [vmem:[%s781_s1 + $0xb4] sm:$0xf]  ;;  %v440_v5 = vld [vmem:[%s781_s1 + $0xb8] sm:$0xf0]  ;;  %v430_v6 = vld [vmem:[%s781_s1 + $0xa0] sm:$0xf]  ;;  %v367_v9 = vor.u32 %v499_v63, %v366_v62  ;;  %v371_v10 = vor.u32 %v498_v2, %v368_v3 }
  0x12   :  { %264 = vmatpush.bf16.msra.mxu1 %v447_v53  ;;  %v515_v7 = vld [vmem:[%s781_s1 + $0xa4] sm:$0xf0]  ;;  %v358_v11 = vld [vmem:[%s781_s1 + $0x10] sm:$0xf]  ;;  %v497_v12 = vld [vmem:[%s781_s1 + $0x14] sm:$0xf0]  ;;  %v443_v13 = vor.u32 %v516_v4, %v440_v5 }
  0x13   :  { %v431_v14 = vor.u32 %v515_v7, %v430_v6  ;;  %v496_v15 = vld [vmem:[%s781_s1 + $0x14] sm:$0xf]  ;;  %v360_v16 = vld [vmem:[%s781_s1 + $0x18] sm:$0xf0]  ;;  %v514_v17 = vld [vmem:[%s781_s1 + $0xa4] sm:$0xf]  ;;  %v359_v21 = vor.u32 %v497_v12, %v358_v11 }
  0x14   :  { %v703_v8 = vld [vmem:[#allocation1 + $0x12] sm:$0xff]  ;;  %252 = vmatpush.bf16.msra.mxu0 %v375_v60  ;;  %v432_v18 = vld [vmem:[%s781_s1 + $0xa8] sm:$0xf0]  ;;  %v350_v22 = vld [vmem:[%s781_s1] sm:$0xf]  ;;  %v363_v23 = vor.u32 %v496_v15, %v360_v16 }
  0x15   :  { %302 = vmatpush.bf16.msrb.mxu2 %v459_v52  ;;  %291 = vmatpush.bf16.msra.mxu3 %v379_v61  ;;  %v422_v19 = vld [vmem:[%s781_s1 + $0x90] sm:$0xf]  ;;  %v513_v20 = vld [vmem:[%s781_s1 + $0x94] sm:$0xf0]  ;;  %v495_v24 = vld [vmem:[%s781_s1 + $0x4] sm:$0xf0]  ;;  %v435_v27 = vor.u32 %v514_v17, %v432_v18 }
  0x16   :  { %492 = vmatmul.msk.bf16.vlgmr.msra.gmra.mxu2 %vm245_vm0, %v703_v8  ;;  %265 = vmatpush.bf16.msra.mxu1 %v439_v1  ;;  %v494_v25 = vld [vmem:[%s781_s1 + $0x4] sm:$0xf]  ;;  %v352_v26 = vld [vmem:[%s781_s1 + $0x8] sm:$0xf0]  ;;  %v423_v28 = vor.u32 %v513_v20, %v422_v19  ;;  %v512_v29 = vld [vmem:[%s781_s1 + $0x94] sm:$0xf]  ;;  %v351_v35 = vor.u32 %v495_v24, %v350_v22 }
  0x17   :  { %v528_v30 = vld [vmem:[%s781_s1 + $0x114] sm:$0xf]  ;;  %v488_v31 = vld [vmem:[%s781_s1 + $0x118] sm:$0xf0]  ;;  %v414_v33 = vld [vmem:[%s781_s1 + $0x80] sm:$0xf]  ;;  %v355_v36 = vor.u32 %v494_v25, %v352_v26 }
  0x18   :  { %253 = vmatpush.bf16.msra.mxu0 %v367_v9  ;;  %v424_v32 = vld [vmem:[%s781_s1 + $0x98] sm:$0xf0]  ;;  %v511_v34 = vld [vmem:[%s781_s1 + $0x84] sm:$0xf0]  ;;  %v491_v37 = vor.u32 %v528_v30, %v488_v31  ;;  %v526_v40 = vld [vmem:[%s781_s1 + $0x104] sm:$0xf] }
  0x19   :  { %303 = vmatpush.bf16.msrb.mxu2 %v451_v0  ;;  %292 = vmatpush.bf16.msra.mxu3 %v371_v10  ;;  %v427_v38 = vor.u32 %v512_v29, %v424_v32  ;;  %v415_v39 = vor.u32 %v511_v34, %v414_v33  ;;  %v480_v41 = vld [vmem:[%s781_s1 + $0x108] sm:$0xf0]  ;;  %v510_v42 = vld [vmem:[%s781_s1 + $0x84] sm:$0xf]  ;;  %v52_v49 = vld [vmem:[%s783_s2] sm:$0x3] }
  0x1a   :  { %266 = vmatpush.bf16.msra.mxu1 %v431_v14  ;;  %v416_v43 = vld [vmem:[%s781_s1 + $0x88] sm:$0xf0]  ;;  %v60_v44 = vld [vmem:[#allocation1] sm:$0xff]  ;;  %v483_v45 = vor.u32 %v526_v40, %v480_v41  ;;  %v54_v52 = vperm.slane %v52_v49, 0  ;;  %v55_v55 = vperm.slane %v52_v49, 1 }
  0x1b   :  { %v61_v46 = vld [vmem:[#allocation1 + $0x9] sm:$0xff]  ;;  %v419_v47 = vor.u32 %v510_v42, %v416_v43 }
  0x1c   :  { %254 = vmatpush.bf16.msra.mxu0 %v359_v21 }
  0x1d   :  { %304 = vmatpush.bf16.msrb.mxu2 %v443_v13  ;;  %293 = vmatpush.bf16.msra.mxu3 %v363_v23 }
  0x1e   :  { %267 = vmatpush.bf16.msra.mxu1 %v423_v28 }
  0x20   :  { %255 = vmatpush.bf16.msra.mxu0 %v351_v35 }
  0x21   :  { %305 = vmatpush.bf16.msrb.mxu2 %v435_v27  ;;  %294 = vmatpush.bf16.msra.mxu3 %v355_v36 }
  0x22   :  { %268 = vmatpush.bf16.msra.mxu1 %v415_v39 }
  0x23   :  { %256 = vmatmul.bf16.vlgmr.msra.gmra.mxu0 %v60_v44 }
  0x24   :  { %319 = vmatpush.bf16.msrb.mxu0 %v491_v37  ;;  %295 = vmatmul.bf16.vlgmr.msra.gmra.mxu3 %v60_v44 }
  0x25   :  { %306 = vmatpush.bf16.msrb.mxu2 %v427_v38  ;;  %269 = vmatmul.bf16.vlgmr.msra.gmra.mxu1 %v61_v46 }
  0x28   :  { %320 = vmatpush.bf16.msrb.mxu0 %v483_v45 }
  0x29   :  { %307 = vmatpush.bf16.msrb.mxu2 %v419_v47 }
  0x2c   :  { %308 = vmatmul.bf16.vlgmr.msrb.gmra.mxu2 %v61_v46 }
  0x33   :  { %493 = vmatmul.msk.bf16.vlgmr.msrb.gmra.mxu0 %vm245_vm0, %v703_v8 }
  0x99   :  { %v283_v48 = vpop.f32.mrf.mxu2 }
  0xa0   :  { %v257_v51 = vpop.f32.mrf.mxu0 }
  0xa1   :  { %v285_v50 = vpop.f32.mrf.mxu2  ;;  %v258_v54 = vadd.f32 %v257_v51, %v54_v52 }
  0xa2   :  { %v270_v53 = vpop.f32.mrf.mxu1 }
  0xa3   :  { %v271_v58 = vadd.f32 %v270_v53, %v258_v54 }
  0xa5   :  { %v284_v62 = vadd.f32 %v283_v48, %v271_v58 }
  0xa7   :  { %v296_v56 = vpop.f32.mrf.mxu3  ;;  %v331_v2 = vmax.f32 %v284_v62, 0.0 }
  0xa8   :  { %v259_v57 = vpop.f32.mrf.mxu0  ;;  %v297_v59 = vadd.f32 %v296_v56, %v55_v55 }
  0xaa   :  { %v272_v60 = vpop.f32.mrf.mxu1 }
  0xaf   :  { %v309_v61 = vpop.f32.mrf.mxu2  ;;  %v298_v0 = vpop.f32.mrf.mxu3 }
  0xb0   :  { %v310_v63 = vadd.f32 %v309_v61, %v297_v59  ;;  %v322_v1 = vpop.f32.mrf.mxu0 }
  0xb2   :  { %v323_v3 = vadd.f32 %v322_v1, %v310_v63 }
  0xb4   :  { %v335_v4 = vpack.c.bf16 %v323_v3, %v331_v2 }
  0xb6   :  { %v337_v6 = vrot.slane %v335_v4, 3 }
  0xb7   :  { %v311_v5 = vpop.f32.mrf.mxu2 }
  0xb8   :  { %v341_v7 = vsel %vm338_vm1, %v335_v4, %v337_v6  ;;  %v324_v8 = vpop.f32.mrf.mxu0 }
  0xb9   :  { %343 = vst [vmem:[%s784_s3] sm:$0x3] %v341_v7 }

// kernel: my_resnet_forward.37
= control target key start
LH: loop header
LB: loop body
LE: loop exit
PB: predicated region body
PF: predicated region fallthrough
CT: control target
= control target key end

     0   :  { %vm20_vm0 = vcmask 517120   ;;  %v164_v1 = vmov 0.0   ;;  %s212_s0 = inlined_call_operand.vmem [shape: bf16[2,1,64], index: 0, kind: input, shape index: {}]   ;;  %s213_s1 = inlined_call_operand.vmem [shape: bf16[64,128], index: 1, kind: input, shape index: {}]   ;;  %s214_s2 = inlined_call_operand.vmem [shape: f32[1,128], index: 2, kind: input, shape index: {}]   ;;  %s215_s3 = inlined_call_operand.hbm [shape: f32[2,128], index: 3, kind: output, shape index: {}]  }
   0x1   :  { %v134_v0 = vld [vmem:[%s213_s1 + $0x18] sm:$0xff]  ;;  %21 = vst.msk [vmem:[#allocation2] sm:$0x3] %vm20_vm0, %v164_v1  ;;  %v23_v2 = vld [vmem:[%s212_s0] sm:$0x1]  ;;  %v133_v3 = vld [vmem:[%s213_s1 + $0x10] sm:$0xff] }
   0x2   :  { %88 = vmatpush.bf16.msra.mxu0 %v134_v0  ;;  %v24_v4 = vld [vmem:[%s212_s0 + $0x1] sm:$0x1]  ;;  %v25_v5 = vunpack.c.l.bf16 %v23_v2 }
   0x3   :  { %v26_v6 = vunpack.c.l.bf16 %v24_v4 }
   0x4   :  { %8 = vsyncpa [#allocation4], 0  ;;  %v31_v7 = vperm.slane %v25_v5, 0  ;;  %vm33_vm1 = vcmask 1041409   ;;  %v132_v9 = vld [vmem:[%s213_s1 + $0x8] sm:$0xff]  ;;  %v131_v13 = vld [vmem:[%s213_s1] sm:$0xff] }
   0x5   :  { %v32_v8 = vperm.slane %v26_v6, 0  ;;  %vm80_vm2 = vcmask 523264   ;;  %v137_v16 = vld [vmem:[%s214_s2] ss:$0 sm:$0xff]  ;;  %s165_s25 = smov [#allocation3]   ;;  %s105_s29 = sshll.u32 %s215_s3, 4  ;;  %s106_s29 = int_to_ptr.hbm [resolvable:$true] %s105_s29 }
   0x6   :  { %89 = vmatpush.bf16.msra.mxu0 %v133_v3  ;;  %s103_s26 = sshll.u32 %s165_s25, 4  ;;  %s104_s26 = int_to_ptr.vmem [resolvable:$true] %s103_s26 }
   0x7   :  { %v34_v10 = vsel %vm33_vm1, %v32_v8, %v31_v7 }
   0x8   :  { %v22_v11 = vld [vmem:[#allocation2] sm:$0x3] }
   0x9   :  { %v36_v12 = vadd.f32 %v34_v10, %v22_v11 }
   0xa   :  { %90 = vmatpush.bf16.msra.mxu0 %v132_v9 }
   0xb   :  { %38 = vst.msk [vmem:[#allocation2] sm:$0x3] %vm20_vm0, %v36_v12 }
   0xe   :  { %91 = vmatpush.bf16.msra.mxu0 %v131_v13 }
  0x12   :  { %v42_v14 = vld [vmem:[#allocation2] sm:$0x3] }
  0x13   :  { %v43_v15 = vpack.c.bf16 %v42_v14, %v42_v14 }
  0x15   :  { %130 = vmatmul.msk.bf16.vlgmr.msra.gmra.mxu0 %vm80_vm2, %v43_v15 }
  0x92   :  { %v93_v17 = vpop.f32.mrf.mxu0 }
  0x93   :  { %v94_v18 = vadd.f32 %v137_v16, %v93_v17 }
  0x95   :  { %97 = vst [vmem:[#allocation3] sm:$0x3] %v94_v18 }
  0x96   :  { %108 = dma.vmem_to_hbm [thread:$0]  %s104_s26, 32, %s106_s29, [#allocation4]  }
  0x9a   :  { %v95_v19 = vpop.f32.mrf.mxu0 }
  0x9b   :  { %162 = dma.done.wait [#allocation4], 32  }
  0x9c   :  { %163 = vsyncadd [#allocation4], 4294967264 }
  0x9d   :  { %113 = vsyncpa [#allocation4], 1 }

// kernel: my_resnet_forward.35
= control target key start
LH: loop header
LB: loop body
LE: loop exit
PB: predicated region body
PF: predicated region fallthrough
CT: control target
= control target key end

     0   :  { %vm319_vm0 = vcmask 523264   ;;  %s713_s1 = inlined_call_operand.vmem [shape: bf16[576,128], index: 1, kind: input, shape index: {}]   ;;  %s714_s0 = inlined_call_operand.vmem [shape: bf16[2,576], index: 0, kind: input, shape index: {}]   ;;  %s715_s2 = inlined_call_operand.vmem [shape: f32[1,128], index: 2, kind: input, shape index: {}]   ;;  %s716_s3 = inlined_call_operand.vmem [shape: bf16[2,128], index: 3, kind: output, shape index: {}]  }
   0x1   :  { %v546_v0 = vld [vmem:[%s713_s1 + $0x38] sm:$0xff]  ;;  %v545_v4 = vld [vmem:[%s713_s1 + $0x30] sm:$0xff]  ;;  %v544_v8 = vld [vmem:[%s713_s1 + $0x28] sm:$0xff] }
   0x2   :  { %v562_v1 = vld [vmem:[%s713_s1 + $0xb8] sm:$0xff]  ;;  %322 = vmatpush.bf16.msra.mxu0 %v546_v0  ;;  %v561_v5 = vld [vmem:[%s713_s1 + $0xb0] sm:$0xff]  ;;  %v560_v9 = vld [vmem:[%s713_s1 + $0xa8] sm:$0xff] }
   0x3   :  { %v570_v2 = vld [vmem:[%s713_s1 + $0xf8] sm:$0xff]  ;;  %348 = vmatpush.bf16.msra.mxu2 %v562_v1  ;;  %v569_v6 = vld [vmem:[%s713_s1 + $0xf0] sm:$0xff]  ;;  %v568_v10 = vld [vmem:[%s713_s1 + $0xe8] sm:$0xff] }
   0x4   :  { %v554_v3 = vld [vmem:[%s713_s1 + $0x78] sm:$0xff]  ;;  %361 = vmatpush.bf16.msra.mxu3 %v570_v2  ;;  %v553_v7 = vld [vmem:[%s713_s1 + $0x70] sm:$0xff]  ;;  %v552_v11 = vld [vmem:[%s713_s1 + $0x68] sm:$0xff] }
   0x5   :  { %335 = vmatpush.bf16.msra.mxu1 %v554_v3  ;;  %v543_v12 = vld [vmem:[%s713_s1 + $0x20] sm:$0xff]  ;;  %v542_v17 = vld [vmem:[%s713_s1 + $0x18] sm:$0xff]  ;;  %v541_v21 = vld [vmem:[%s713_s1 + $0x10] sm:$0xff] }
   0x6   :  { %323 = vmatpush.bf16.msra.mxu0 %v545_v4  ;;  %v559_v13 = vld [vmem:[%s713_s1 + $0xa0] sm:$0xff]  ;;  %v558_v18 = vld [vmem:[%s713_s1 + $0x98] sm:$0xff]  ;;  %v557_v22 = vld [vmem:[%s713_s1 + $0x90] sm:$0xff] }
   0x7   :  { %349 = vmatpush.bf16.msra.mxu2 %v561_v5  ;;  %v15_v14 = vld [vmem:[%s714_s0] sm:$0x1f]  ;;  %v566_v19 = vld [vmem:[%s713_s1 + $0xd8] sm:$0xff]  ;;  %v565_v23 = vld [vmem:[%s713_s1 + $0xd0] sm:$0xff] }
   0x8   :  { %362 = vmatpush.bf16.msra.mxu3 %v569_v6  ;;  %v567_v15 = vld [vmem:[%s713_s1 + $0xe0] sm:$0xff]  ;;  %93 = vst [vmem:[#allocation1] ss:$9 sm:$0xff] %v15_v14  ;;  %v550_v20 = vld [vmem:[%s713_s1 + $0x58] sm:$0xff]  ;;  %v549_v24 = vld [vmem:[%s713_s1 + $0x50] sm:$0xff] }
   0x9   :  { %336 = vmatpush.bf16.msra.mxu1 %v553_v7  ;;  %v551_v16 = vld [vmem:[%s713_s1 + $0x60] sm:$0xff]  ;;  %v540_v25 = vld [vmem:[%s713_s1 + $0x8] sm:$0xff]  ;;  %v574_v33 = vld [vmem:[%s713_s1 + $0x118] sm:$0xff] }
   0xa   :  { %324 = vmatpush.bf16.msra.mxu0 %v544_v8  ;;  %v556_v26 = vld [vmem:[%s713_s1 + $0x88] sm:$0xff]  ;;  %v539_v29 = vld [vmem:[%s713_s1] sm:$0xff]  ;;  %v573_v38 = vld [vmem:[%s713_s1 + $0x110] sm:$0xff] }
   0xb   :  { %350 = vmatpush.bf16.msra.mxu2 %v560_v9  ;;  %v564_v27 = vld [vmem:[%s713_s1 + $0xc8] sm:$0xff]  ;;  %v555_v30 = vld [vmem:[%s713_s1 + $0x80] sm:$0xff] }
   0xc   :  { %363 = vmatpush.bf16.msra.mxu3 %v568_v10  ;;  %v548_v28 = vld [vmem:[%s713_s1 + $0x48] sm:$0xff]  ;;  %v563_v31 = vld [vmem:[%s713_s1 + $0xc0] sm:$0xff] }
   0xd   :  { %337 = vmatpush.bf16.msra.mxu1 %v552_v11  ;;  %v547_v32 = vld [vmem:[%s713_s1 + $0x40] sm:$0xff]  ;;  %v572_v39 = vld [vmem:[%s713_s1 + $0x108] sm:$0xff] }
   0xe   :  { %325 = vmatpush.bf16.msra.mxu0 %v543_v12  ;;  %v571_v40 = vld [vmem:[%s713_s1 + $0x100] sm:$0xff] }
   0xf   :  { %351 = vmatpush.bf16.msra.mxu2 %v559_v13  ;;  %v94_v34 = vld [vmem:[#allocation1] sm:$0xff]  ;;  %v96_v35 = vld [vmem:[#allocation1 + $0x12] sm:$0xff]  ;;  %v95_v37 = vld [vmem:[#allocation1 + $0x9] sm:$0xff] }
  0x10   :  { %364 = vmatpush.bf16.msra.mxu3 %v567_v15  ;;  %v97_v36 = vld [vmem:[#allocation1 + $0x1b] sm:$0xff]  ;;  %v98_v41 = vld [vmem:[#allocation1 + $0x24] sm:$0xff] }
  0x11   :  { %338 = vmatpush.bf16.msra.mxu1 %v551_v16  ;;  %v575_v43 = vld [vmem:[%s715_s2] ss:$0 sm:$0xff] }
  0x12   :  { %326 = vmatpush.bf16.msra.mxu0 %v542_v17 }
  0x13   :  { %352 = vmatpush.bf16.msra.mxu2 %v558_v18 }
  0x14   :  { %365 = vmatpush.bf16.msra.mxu3 %v566_v19 }
  0x15   :  { %339 = vmatpush.bf16.msra.mxu1 %v550_v20 }
  0x16   :  { %327 = vmatpush.bf16.msra.mxu0 %v541_v21 }
  0x17   :  { %353 = vmatpush.bf16.msra.mxu2 %v557_v22 }
  0x18   :  { %366 = vmatpush.bf16.msra.mxu3 %v565_v23 }
  0x19   :  { %340 = vmatpush.bf16.msra.mxu1 %v549_v24 }
  0x1a   :  { %328 = vmatpush.bf16.msra.mxu0 %v540_v25 }
  0x1b   :  { %354 = vmatpush.bf16.msra.mxu2 %v556_v26 }
  0x1c   :  { %367 = vmatpush.bf16.msra.mxu3 %v564_v27 }
  0x1d   :  { %341 = vmatpush.bf16.msra.mxu1 %v548_v28 }
  0x1e   :  { %329 = vmatpush.bf16.msra.mxu0 %v539_v29 }
  0x1f   :  { %355 = vmatpush.bf16.msra.mxu2 %v555_v30 }
  0x20   :  { %368 = vmatpush.bf16.msra.mxu3 %v563_v31 }
  0x21   :  { %342 = vmatpush.bf16.msra.mxu1 %v547_v32  ;;  %330 = vmatmul.bf16.vlgmr.msra.gmra.mxu0 %v94_v34 }
  0x22   :  { %378 = vmatpush.bf16.msrb.mxu0 %v574_v33  ;;  %356 = vmatmul.bf16.vlgmr.msra.gmra.mxu2 %v96_v35 }
  0x23   :  { %369 = vmatmul.bf16.vlgmr.msra.gmra.mxu3 %v97_v36 }
  0x24   :  { %343 = vmatmul.bf16.vlgmr.msra.gmra.mxu1 %v95_v37 }
  0x26   :  { %379 = vmatpush.bf16.msrb.mxu0 %v573_v38 }
  0x2a   :  { %380 = vmatpush.bf16.msrb.mxu0 %v572_v39 }
  0x2e   :  { %381 = vmatpush.bf16.msrb.mxu0 %v571_v40 }
  0x31   :  { %538 = vmatmul.msk.bf16.vlgmr.msrb.gmra.mxu0 %vm319_vm0, %v98_v41 }
  0x9e   :  { %v331_v42 = vpop.f32.mrf.mxu0 }
  0x9f   :  { %v332_v45 = vadd.f32 %v575_v43, %v331_v42 }
  0xa1   :  { %v344_v44 = vpop.f32.mrf.mxu1 }
  0xa2   :  { %v345_v49 = vadd.f32 %v344_v44, %v332_v45 }
  0xa5   :  { %v357_v46 = vpop.f32.mrf.mxu2 }
  0xa6   :  { %v370_v47 = vpop.f32.mrf.mxu3  ;;  %v333_v48 = vpop.f32.mrf.mxu0  ;;  %v358_v51 = vadd.f32 %v357_v46, %v345_v49 }
  0xa8   :  { %v371_v53 = vadd.f32 %v370_v47, %v358_v51 }
  0xa9   :  { %v346_v50 = vpop.f32.mrf.mxu1 }
  0xad   :  { %v359_v52 = vpop.f32.mrf.mxu2 }
  0xae   :  { %v372_v54 = vpop.f32.mrf.mxu3  ;;  %v383_v55 = vpop.f32.mrf.mxu0 }
  0xaf   :  { %v384_v56 = vadd.f32 %v383_v55, %v371_v53 }
  0xb1   :  { %v387_v57 = vmax.f32 %v384_v56, 0.0 }
  0xb3   :  { %v388_v58 = vpack.c.bf16 %v387_v57, %v387_v57 }
  0xb5   :  { %389 = vst [vmem:[%s716_s3] sm:$0x1] %v388_v58 }
  0xb6   :  { %v385_v59 = vpop.f32.mrf.mxu0 }

// kernel: my_resnet_forward.34
= control target key start
LH: loop header
LB: loop body
LE: loop exit
PB: predicated region body
PF: predicated region fallthrough
CT: control target
= control target key end

     0   :  { %vm322_vm0 = vcmask 523264   ;;  %s727_s1 = inlined_call_operand.vmem [shape: bf16[576,128], index: 1, kind: input, shape index: {}]   ;;  %s728_s0 = inlined_call_operand.vmem [shape: bf16[2,576], index: 0, kind: input, shape index: {}]   ;;  %s729_s2 = inlined_call_operand.vmem [shape: f32[1,128], index: 2, kind: input, shape index: {}]   ;;  %s730_s3 = inlined_call_operand.vmem [shape: bf16[2,128], index: 3, kind: input, shape index: {}]   ;;  %s731_s4 = inlined_call_operand.vmem [shape: bf16[2,128], index: 4, kind: output, shape index: {}]  }
   0x1   :  { %v552_v0 = vld [vmem:[%s727_s1 + $0x38] sm:$0xff]  ;;  %v551_v4 = vld [vmem:[%s727_s1 + $0x30] sm:$0xff]  ;;  %v550_v8 = vld [vmem:[%s727_s1 + $0x28] sm:$0xff] }
   0x2   :  { %v568_v1 = vld [vmem:[%s727_s1 + $0xb8] sm:$0xff]  ;;  %325 = vmatpush.bf16.msra.mxu0 %v552_v0  ;;  %v567_v5 = vld [vmem:[%s727_s1 + $0xb0] sm:$0xff]  ;;  %v566_v9 = vld [vmem:[%s727_s1 + $0xa8] sm:$0xff] }
   0x3   :  { %v576_v2 = vld [vmem:[%s727_s1 + $0xf8] sm:$0xff]  ;;  %351 = vmatpush.bf16.msra.mxu2 %v568_v1  ;;  %v575_v6 = vld [vmem:[%s727_s1 + $0xf0] sm:$0xff]  ;;  %v574_v10 = vld [vmem:[%s727_s1 + $0xe8] sm:$0xff] }
   0x4   :  { %v560_v3 = vld [vmem:[%s727_s1 + $0x78] sm:$0xff]  ;;  %364 = vmatpush.bf16.msra.mxu3 %v576_v2  ;;  %v559_v7 = vld [vmem:[%s727_s1 + $0x70] sm:$0xff]  ;;  %v558_v11 = vld [vmem:[%s727_s1 + $0x68] sm:$0xff] }
   0x5   :  { %338 = vmatpush.bf16.msra.mxu1 %v560_v3  ;;  %v549_v12 = vld [vmem:[%s727_s1 + $0x20] sm:$0xff]  ;;  %v548_v17 = vld [vmem:[%s727_s1 + $0x18] sm:$0xff]  ;;  %v547_v21 = vld [vmem:[%s727_s1 + $0x10] sm:$0xff] }
   0x6   :  { %326 = vmatpush.bf16.msra.mxu0 %v551_v4  ;;  %v565_v13 = vld [vmem:[%s727_s1 + $0xa0] sm:$0xff]  ;;  %v564_v18 = vld [vmem:[%s727_s1 + $0x98] sm:$0xff]  ;;  %v563_v22 = vld [vmem:[%s727_s1 + $0x90] sm:$0xff] }
   0x7   :  { %352 = vmatpush.bf16.msra.mxu2 %v567_v5  ;;  %v18_v14 = vld [vmem:[%s728_s0] sm:$0x1f]  ;;  %v572_v19 = vld [vmem:[%s727_s1 + $0xd8] sm:$0xff]  ;;  %v571_v23 = vld [vmem:[%s727_s1 + $0xd0] sm:$0xff] }
   0x8   :  { %365 = vmatpush.bf16.msra.mxu3 %v575_v6  ;;  %v573_v15 = vld [vmem:[%s727_s1 + $0xe0] sm:$0xff]  ;;  %96 = vst [vmem:[#allocation1] ss:$9 sm:$0xff] %v18_v14  ;;  %v556_v20 = vld [vmem:[%s727_s1 + $0x58] sm:$0xff]  ;;  %v555_v24 = vld [vmem:[%s727_s1 + $0x50] sm:$0xff] }
   0x9   :  { %339 = vmatpush.bf16.msra.mxu1 %v559_v7  ;;  %v557_v16 = vld [vmem:[%s727_s1 + $0x60] sm:$0xff]  ;;  %v546_v25 = vld [vmem:[%s727_s1 + $0x8] sm:$0xff]  ;;  %v580_v33 = vld [vmem:[%s727_s1 + $0x118] sm:$0xff] }
   0xa   :  { %327 = vmatpush.bf16.msra.mxu0 %v550_v8  ;;  %v562_v26 = vld [vmem:[%s727_s1 + $0x88] sm:$0xff]  ;;  %v545_v29 = vld [vmem:[%s727_s1] sm:$0xff]  ;;  %v579_v38 = vld [vmem:[%s727_s1 + $0x110] sm:$0xff] }
   0xb   :  { %353 = vmatpush.bf16.msra.mxu2 %v566_v9  ;;  %v570_v27 = vld [vmem:[%s727_s1 + $0xc8] sm:$0xff]  ;;  %v561_v30 = vld [vmem:[%s727_s1 + $0x80] sm:$0xff] }
   0xc   :  { %366 = vmatpush.bf16.msra.mxu3 %v574_v10  ;;  %v554_v28 = vld [vmem:[%s727_s1 + $0x48] sm:$0xff]  ;;  %v569_v31 = vld [vmem:[%s727_s1 + $0xc0] sm:$0xff] }
   0xd   :  { %340 = vmatpush.bf16.msra.mxu1 %v558_v11  ;;  %v553_v32 = vld [vmem:[%s727_s1 + $0x40] sm:$0xff]  ;;  %v578_v39 = vld [vmem:[%s727_s1 + $0x108] sm:$0xff] }
   0xe   :  { %328 = vmatpush.bf16.msra.mxu0 %v549_v12  ;;  %v577_v40 = vld [vmem:[%s727_s1 + $0x100] sm:$0xff] }
   0xf   :  { %354 = vmatpush.bf16.msra.mxu2 %v565_v13  ;;  %v97_v34 = vld [vmem:[#allocation1] sm:$0xff]  ;;  %v99_v35 = vld [vmem:[#allocation1 + $0x12] sm:$0xff]  ;;  %v98_v37 = vld [vmem:[#allocation1 + $0x9] sm:$0xff] }
  0x10   :  { %367 = vmatpush.bf16.msra.mxu3 %v573_v15  ;;  %v100_v36 = vld [vmem:[#allocation1 + $0x1b] sm:$0xff]  ;;  %v101_v41 = vld [vmem:[#allocation1 + $0x24] sm:$0xff] }
  0x11   :  { %341 = vmatpush.bf16.msra.mxu1 %v557_v16  ;;  %v581_v43 = vld [vmem:[%s729_s2] ss:$0 sm:$0xff] }
  0x12   :  { %329 = vmatpush.bf16.msra.mxu0 %v548_v17  ;;  %v390_v52 = vld [vmem:[%s730_s3] sm:$0x1] }
  0x13   :  { %355 = vmatpush.bf16.msra.mxu2 %v564_v18  ;;  %v391_v56 = vunpack.c.l.bf16 %v390_v52 }
  0x14   :  { %368 = vmatpush.bf16.msra.mxu3 %v572_v19 }
  0x15   :  { %342 = vmatpush.bf16.msra.mxu1 %v556_v20 }
  0x16   :  { %330 = vmatpush.bf16.msra.mxu0 %v547_v21 }
  0x17   :  { %356 = vmatpush.bf16.msra.mxu2 %v563_v22 }
  0x18   :  { %369 = vmatpush.bf16.msra.mxu3 %v571_v23 }
  0x19   :  { %343 = vmatpush.bf16.msra.mxu1 %v555_v24 }
  0x1a   :  { %331 = vmatpush.bf16.msra.mxu0 %v546_v25 }
  0x1b   :  { %357 = vmatpush.bf16.msra.mxu2 %v562_v26 }
  0x1c   :  { %370 = vmatpush.bf16.msra.mxu3 %v570_v27 }
  0x1d   :  { %344 = vmatpush.bf16.msra.mxu1 %v554_v28 }
  0x1e   :  { %332 = vmatpush.bf16.msra.mxu0 %v545_v29 }
  0x1f   :  { %358 = vmatpush.bf16.msra.mxu2 %v561_v30 }
  0x20   :  { %371 = vmatpush.bf16.msra.mxu3 %v569_v31 }
  0x21   :  { %345 = vmatpush.bf16.msra.mxu1 %v553_v32  ;;  %333 = vmatmul.bf16.vlgmr.msra.gmra.mxu0 %v97_v34 }
  0x22   :  { %381 = vmatpush.bf16.msrb.mxu0 %v580_v33  ;;  %359 = vmatmul.bf16.vlgmr.msra.gmra.mxu2 %v99_v35 }
  0x23   :  { %372 = vmatmul.bf16.vlgmr.msra.gmra.mxu3 %v100_v36 }
  0x24   :  { %346 = vmatmul.bf16.vlgmr.msra.gmra.mxu1 %v98_v37 }
  0x26   :  { %382 = vmatpush.bf16.msrb.mxu0 %v579_v38 }
  0x2a   :  { %383 = vmatpush.bf16.msrb.mxu0 %v578_v39 }
  0x2e   :  { %384 = vmatpush.bf16.msrb.mxu0 %v577_v40 }
  0x31   :  { %544 = vmatmul.msk.bf16.vlgmr.msrb.gmra.mxu0 %vm322_vm0, %v101_v41 }
  0x9e   :  { %v334_v42 = vpop.f32.mrf.mxu0 }
  0x9f   :  { %v335_v45 = vadd.f32 %v581_v43, %v334_v42 }
  0xa1   :  { %v347_v44 = vpop.f32.mrf.mxu1 }
  0xa2   :  { %v348_v49 = vadd.f32 %v347_v44, %v335_v45 }
  0xa5   :  { %v360_v46 = vpop.f32.mrf.mxu2 }
  0xa6   :  { %v373_v47 = vpop.f32.mrf.mxu3  ;;  %v336_v48 = vpop.f32.mrf.mxu0  ;;  %v361_v51 = vadd.f32 %v360_v46, %v348_v49 }
  0xa8   :  { %v374_v54 = vadd.f32 %v373_v47, %v361_v51 }
  0xa9   :  { %v349_v50 = vpop.f32.mrf.mxu1 }
  0xad   :  { %v362_v53 = vpop.f32.mrf.mxu2 }
  0xae   :  { %v375_v55 = vpop.f32.mrf.mxu3  ;;  %v386_v57 = vpop.f32.mrf.mxu0 }
  0xaf   :  { %v387_v58 = vadd.f32 %v386_v57, %v374_v54 }
  0xb1   :  { %v392_v59 = vadd.f32 %v391_v56, %v387_v58 }
  0xb3   :  { %v393_v60 = vmax.f32 %v392_v59, 0.0 }
  0xb5   :  { %v394_v61 = vpack.c.bf16 %v393_v60, %v393_v60 }
  0xb6   :  { %v388_v62 = vpop.f32.mrf.mxu0 }
  0xb7   :  { %395 = vst [vmem:[%s731_s4] sm:$0x1] %v394_v61 }

</bundles_post_ra>
